<compile_context>
chip_gen: v5e
topology: v5e:2x2
jax: 0.10.0
libtpu: 0.0.40
codegen_flags: <defaults>
</compile_context>

<pallas_src>
import math
from functools import partial

import jax
import jax.numpy as jnp
from jax.experimental import pallas as pl
from jax.experimental.pallas import tpu as pltpu


def _round_up(v, m):
    return ((v + m - 1) // m) * m


def _choose_tm(m, cap=1024):
    """Row tile: whole level if it fits under `cap`, else `cap` (mult of 16)."""
    m16 = _round_up(max(m, 16), 16)
    return m16 if m16 <= cap else cap


# ----------------------------- Pallas kernel -------------------------------
def _detect_kernel(x_ref, w_ref, c_ref, out_ref, *, nx, ny, tm):
    # 1x1 conv == channel matmul on the MXU (bf16 inputs, f32 accumulate).
    r = jnp.dot(x_ref[...], w_ref[...], preferred_element_type=jnp.float32)

    c = c_ref[...]                     # (16, CP) packed per-level constants
    bias = c[0:1, :]
    c1 = c[1:2, :]                     # coefficient of sigmoid(r)
    c2 = c[2:3, :]                     # coefficient of sigmoid(r)^2
    c3 = c[3:4, :]                     # coefficient of r (1 raw, anchor lmk)
    ao = c[4:5, :]                     # constant offset (-0.5*stride for xy)
    gcoef = c[8:16, :]                 # rows 8/9: grid-x / grid-y coefficients

    r = r + bias
    s = jax.nn.sigmoid(r)              # f32 epilogue (v5e has no bf16 VPU/EUP)

    # Per-row grid coords computed in-kernel (rows ordered b*ny*nx + y*nx + x).
    # Float floor-division is exact here (indices << 2^24, correctly rounded).
    ri = pl.program_id(0) * tm + jax.lax.broadcasted_iota(jnp.int32, (tm, 8), 0)
    lane = jax.lax.broadcasted_iota(jnp.int32, (tm, 8), 1)
    rf = ri.astype(jnp.float32)
    q = jnp.floor(rf / nx)             # row // nx
    gx = rf - q * nx                   # grid x
    gy = q - jnp.floor(q / ny) * ny    # grid y
    gfeat = jnp.where(lane == 0, gx, gy)      # lanes >= 2 hit zero coef rows
    g = jnp.dot(gfeat, gcoef, preferred_element_type=jnp.float32)

    out_ref[...] = c1 * s + c2 * (s * s) + c3 * r + g + ao


# ------------------------- per-level constant packing ----------------------
def _level_constants(weight, bias, anchors_l, stride_l, na, no, cp):
    """Packed 1x1-conv weight (cin, cp) bf16 and constants (16, cp) f32."""
    cout = na * no
    pad = cp - 2 * cout

    c_idx = jnp.arange(cout)
    o = c_idx % no
    a = c_idx // no
    anchor_w = anchors_l[:, 0][a]
    anchor_h = anchors_l[:, 1][a]
    is_xy = o < 2
    is_wh = (o >= 2) & (o < 4)
    is_conf = (o == 4) | (o == 15)
    is_lmk = (o >= 5) & (o < 15)
    lmk_x = is_lmk & ((o - 5) % 2 == 0)
    lmk_y = is_lmk & ((o - 5) % 2 == 1)
    anchor_c = jnp.where((o == 2) | lmk_x, anchor_w,
                         jnp.where((o == 3) | lmk_y, anchor_h, 0.0))

    c1d = jnp.where(is_xy, 2.0 * stride_l, jnp.where(is_conf, 1.0, 0.0))
    c2d = jnp.where(is_wh, 4.0 * anchor_c, 0.0)
    c3d = jnp.where(is_lmk, anchor_c, 0.0)
    axd = stride_l * ((o == 0) | lmk_x).astype(jnp.float32)
    ayd = stride_l * ((o == 1) | lmk_y).astype(jnp.float32)
    aod = jnp.where(is_xy, -0.5 * stride_l, 0.0)

    zc = jnp.zeros((cout,), jnp.float32)
    zp = jnp.zeros((pad,), jnp.float32)
    oc = jnp.ones((cout,), jnp.float32)
    zrow = jnp.zeros((cp,), jnp.float32)
    b = bias.astype(jnp.float32)

    def row(raw_part, dec_part):
        return jnp.concatenate([raw_part, dec_part, zp]).astype(jnp.float32)

    const = jnp.stack([
        row(b, b),            # 0: bias
        row(zc, c1d),         # 1: sigmoid coefficient
        row(zc, c2d),         # 2: sigmoid^2 coefficient
        row(oc, c3d),         # 3: linear coefficient (raw passthrough / lmk anchor)
        row(zc, aod),         # 4: constant offset
        zrow, zrow, zrow,     # 5-7: pad to 8
        row(zc, axd),         # 8: grid-x coefficient
        row(zc, ayd),         # 9: grid-y coefficient
        zrow, zrow, zrow, zrow, zrow, zrow,   # 10-15: zero (lanes>=2 of gfeat)
    ], axis=0)                # (16, cp)

    cin = weight.shape[1]
    wt = jnp.transpose(weight).astype(jnp.float32)                  # (cin, cout)
    w_packed = jnp.concatenate(
        [wt, wt, jnp.zeros((cin, pad), jnp.float32)], axis=1)       # (cin, cp)
    return w_packed.astype(jnp.bfloat16), const


# ------------------------------ per-level call ------------------------------
def _detect_level(x_rows, w_packed, c_packed, tm, nx, ny, cp):
    m_pad, cin = x_rows.shape
    kernel = partial(_detect_kernel, nx=nx, ny=ny, tm=tm)
    return pl.pallas_call(
        kernel,
        out_shape=jax.ShapeDtypeStruct((m_pad, cp), jnp.float32),
        grid=(m_pad // tm,),
        in_specs=[
            pl.BlockSpec((tm, cin), lambda i: (i, 0)),   # activation rows (bf16)
            pl.BlockSpec((cin, cp), lambda i: (0, 0)),   # packed weight (resident)
            pl.BlockSpec((16, cp), lambda i: (0, 0)),    # packed consts (resident)
        ],
        out_specs=pl.BlockSpec((tm, cp), lambda i: (i, 0)),   # lane-dense store
        compiler_params=pltpu.CompilerParams(
            dimension_semantics=("parallel",)),
    )(x_rows, w_packed, c_packed)


# ------------------------------ fused forward --------------------------------
@partial(jax.jit, static_argnames=("strides", "na", "no", "tm_cap"))
def detect_forward(xs, weights, biases, anchors, strides, na, no, tm_cap=1024):
    """Eval-mode Detect.forward: returns (cat(z, axis=1), [x_i permuted])."""
    cout = na * no
    cp = max(128, _round_up(2 * cout, 128))        # lane-dense output width

    zs, outs = [], []
    for i, x in enumerate(xs):
        bs, cin, ny, nx = x.shape
        m = bs * ny * nx
        tm = _choose_tm(m, tm_cap)
        m_pad = _round_up(m, tm)

        # NCHW f32 -> (rows, cin) bf16; XLA fuses transpose+reshape+pad+cast
        # into a single copy pass (and the bf16 cast halves the written bytes).
        xr = jnp.transpose(x, (0, 2, 3, 1)).reshape(m, cin)
        xr = jnp.pad(xr, ((0, m_pad - m), (0, 0))).astype(jnp.bfloat16)

        w_packed, c_packed = _level_constants(
            weights[i], biases[i], anchors[i], strides[i], na, no, cp)

        out = _detect_level(xr, w_packed, c_packed, tm, nx, ny, cp)

        blk = out[:m]
        # TODO(synk): downstream consumers that accept (bs, ny, nx, na, no)
        #             layout could skip these transposes (one fewer HBM pass).
        raw = blk[:, :cout].reshape(bs, ny, nx, na, no).transpose(0, 3, 1, 2, 4)
        dec = blk[:, cout:2 * cout].reshape(bs, ny, nx, na, no).transpose(0, 3, 1, 2, 4)
        outs.append(raw)                                  # (bs, na, ny, nx, no)
        zs.append(dec.reshape(bs, na * ny * nx, no))
    return jnp.concatenate(zs, axis=1), outs


# --------------------------- pure-JAX reference -----------------------------
def _detect_ref(xs, weights, biases, anchors, strides, na, no,
                matmul_dtype=jnp.float32):
    zs, outs = [], []
    for i, x in enumerate(xs):
        bs, cin, ny, nx = x.shape
        xq = x.astype(matmul_dtype).astype(jnp.float32)
        wq = weights[i].astype(matmul_dtype).astype(jnp.float32)
        conv = jnp.einsum("bchw,oc->bohw", xq, wq) + biases[i][None, :, None, None]
        xi = conv.reshape(bs, na, no, ny, nx).transpose(0, 1, 3, 4, 2)
        outs.append(xi)
        yv, xv = jnp.meshgrid(jnp.arange(ny, dtype=jnp.float32),
                              jnp.arange(nx, dtype=jnp.float32), indexing="ij")
        gr = jnp.stack((xv, yv), 2).reshape(1, 1, ny, nx, 2)
        ag = anchors[i].reshape(1, na, 1, 1, 2)
        s = strides[i]
        sig = jax.nn.sigmoid(xi)
        y = jnp.zeros_like(xi)
        y = y.at[..., 0:2].set((sig[..., 0:2] * 2.0 - 0.5 + gr) * s)
        y = y.at[..., 2:4].set((sig[..., 2:4] * 2.0) ** 2 * ag)
        y = y.at[..., 4].set(sig[..., 4])
        y = y.at[..., 15].set(sig[..., 15])
        for k in range(5):
            lo = 5 + 2 * k
            y = y.at[..., lo:lo + 2].set(xi[..., lo:lo + 2] * ag + gr * s)
        zs.append(y.reshape(bs, -1, no))
    return jnp.concatenate(zs, 1), outs


# ---------------------------------- main ------------------------------------
if __name__ == "__main__":
    key = jax.random.PRNGKey(0)

    nc = 1                       # yolov5-face: single class
    na = 3
    no = nc + 5 + 10             # = 16
    cout = na * no               # = 48

    ch = (16, 32, 64)            # per-level feature channels (small, synthetic)
    spatial = ((16, 16), (8, 8), (4, 4))
    strides = (8.0, 16.0, 32.0)
    anchors = jnp.array(
        [[[4, 5], [8, 10], [13, 16]],
         [[23, 29], [43, 55], [73, 105]],
         [[146, 217], [231, 300], [335, 433]]], dtype=jnp.float32)  # anchor_grid

    bs = 2
    keys = jax.random.split(key, 3 * len(ch))
    xs, weights, biases = [], [], []
    for i, (c, (ny, nx), s) in enumerate(zip(ch, spatial, strides)):
        kx, kw, kb = keys[3 * i], keys[3 * i + 1], keys[3 * i + 2]
        xs.append(jax.random.normal(kx, (bs, c, ny, nx), dtype=jnp.float32))
        weights.append(0.05 * jax.random.normal(kw, (cout, c), dtype=jnp.float32))
        b = 0.01 * jax.random.normal(kb, (cout,), dtype=jnp.float32)
        # Model._initialize_biases (deterministic adjustment)
        b2 = b.reshape(na, no)
        b2 = b2.at[:, 4].add(math.log(8.0 / (640.0 / s) ** 2))
        b2 = b2.at[:, 5:].add(math.log(0.6 / (nc - 0.99)))
        biases.append(b2.reshape(-1))

    z, outs = detect_forward(xs, weights, biases, anchors, strides, na, no)
    z = jax.block_until_ready(z)
    outs = [jax.block_until_ready(o) for o in outs]

    # (a) strict check vs a reference that quantizes the matmul inputs exactly
    #     like the kernel (bf16 in, f32 accumulate) -> validates decode algebra.
    z_q, outs_q = _detect_ref(xs, weights, biases, anchors, strides, na, no,
                              matmul_dtype=jnp.bfloat16)
    # (b) sanity check vs the pure-f32 reference (tolerance sized for the
    #     bf16 matmul-input quantization of the conv).
    z_f, outs_f = _detect_ref(xs, weights, biases, anchors, strides, na, no)

    assert z.shape == z_f.shape
    assert all(a.shape == b.shape for a, b in zip(outs, outs_f))
    assert jnp.allclose(z, z_q, rtol=1e-4, atol=1e-2), "decoded mismatch (bf16 ref)"
    assert all(jnp.allclose(a, b, rtol=1e-4, atol=1e-3)
               for a, b in zip(outs, outs_q)), "raw head mismatch (bf16 ref)"
    assert jnp.allclose(z, z_f, rtol=3e-2, atol=0.5), "decoded mismatch (f32 ref)"
    assert all(jnp.allclose(a, b, rtol=3e-2, atol=5e-2)
               for a, b in zip(outs, outs_f)), "raw head mismatch (f32 ref)"

    print("KERNEL_OK")
</pallas_src>

<mosaic_0001>
module attributes {stable_mosaic.version = 11 : i64} {
  func.func @_detect_kernel(%arg0: i32, %arg1: memref<512x16xbf16, #tpu.memory_space<vmem>>, %arg2: memref<16x128xbf16, #tpu.memory_space<vmem>>, %arg3: memref<16x128xf32, #tpu.memory_space<vmem>>, %arg4: memref<512x128xf32, #tpu.memory_space<vmem>>) attributes {dimension_semantics = [#tpu.dimension_semantics<parallel>], iteration_bounds = array<i64: 1>, scalar_prefetch = 0 : i64, scratch_operands = 0 : i64, tpu.core_type = #tpu.core_type<tc>, window_params = [{transform_indices = @transform_0, window_bounds = array<i64: 512, 16>}, {pipeline_mode = #tpu.pipeline_mode<synchronous>, transform_indices = @transform_1, window_bounds = array<i64: 16, 128>}, {pipeline_mode = #tpu.pipeline_mode<synchronous>, transform_indices = @transform_2, window_bounds = array<i64: 16, 128>}, {transform_indices = @transform_3, window_bounds = array<i64: 512, 128>}]} {
    %c0 = arith.constant 0 : index
    %c0_0 = arith.constant 0 : index
    %0 = vector.load %arg1[%c0, %c0_0] : memref<512x16xbf16, #tpu.memory_space<vmem>>, vector<512x16xbf16>
    %c0_1 = arith.constant 0 : index
    %c0_2 = arith.constant 0 : index
    %1 = vector.load %arg2[%c0_1, %c0_2] : memref<16x128xbf16, #tpu.memory_space<vmem>>, vector<16x128xbf16>
    %cst = arith.constant dense<0.000000e+00> : vector<512x128xf32>
    %2 = tpu.matmul %0, %1, %cst {dimension_numbers = #tpu.dot_dimension_numbers<[1], [0], [0], [1], [0, 0, 1, 1], [], []>} : vector<512x16xbf16>, vector<16x128xbf16>, vector<512x128xf32> -> vector<512x128xf32>
    %c0_3 = arith.constant 0 : index
    %c0_4 = arith.constant 0 : index
    %3 = vector.load %arg3[%c0_3, %c0_4] : memref<16x128xf32, #tpu.memory_space<vmem>>, vector<16x128xf32>
    %4 = vector.extract_strided_slice %3 {offsets = [0, 0], sizes = [1, 128], strides = [1, 1]} : vector<16x128xf32> to vector<1x128xf32>
    %5 = vector.extract_strided_slice %3 {offsets = [1, 0], sizes = [1, 128], strides = [1, 1]} : vector<16x128xf32> to vector<1x128xf32>
    %6 = vector.extract_strided_slice %3 {offsets = [2, 0], sizes = [1, 128], strides = [1, 1]} : vector<16x128xf32> to vector<1x128xf32>
    %7 = vector.extract_strided_slice %3 {offsets = [3, 0], sizes = [1, 128], strides = [1, 1]} : vector<16x128xf32> to vector<1x128xf32>
    %8 = vector.extract_strided_slice %3 {offsets = [4, 0], sizes = [1, 128], strides = [1, 1]} : vector<16x128xf32> to vector<1x128xf32>
    %9 = vector.extract_strided_slice %3 {offsets = [8, 0], sizes = [8, 128], strides = [1, 1]} : vector<16x128xf32> to vector<8x128xf32>
    %10 = vector.broadcast %4 : vector<1x128xf32> to vector<512x128xf32>
    %11 = arith.addf %2, %10 : vector<512x128xf32>
    %12 = arith.negf %11 : vector<512x128xf32>
    %13 = math.exp %12 : vector<512x128xf32>
    %cst_5 = arith.constant 1.000000e+00 : f32
    %14 = vector.broadcast %cst_5 : f32 to vector<512x128xf32>
    %15 = arith.addf %14, %13 : vector<512x128xf32>
    %16 = arith.divf %14, %15 : vector<512x128xf32>
    %c512_i32 = arith.constant 512 : i32
    %17 = arith.muli %arg0, %c512_i32 : i32
    %18 = tpu.iota {dimensions = array<i32: 0>} : vector<512x8xi32>
    %19 = vector.broadcast %17 : i32 to vector<512x8xi32>
    %20 = arith.addi %19, %18 : vector<512x8xi32>
    %21 = tpu.iota {dimensions = array<i32: 1>} : vector<512x8xi32>
    %22 = arith.sitofp %20 : vector<512x8xi32> to vector<512x8xf32>
    %cst_6 = arith.constant 1.600000e+01 : f32
    %23 = vector.broadcast %cst_6 : f32 to vector<512x8xf32>
    %24 = arith.divf %22, %23 : vector<512x8xf32>
    %25 = math.floor %24 : vector<512x8xf32>
    %cst_7 = arith.constant 1.600000e+01 : f32
    %26 = vector.broadcast %cst_7 : f32 to vector<512x8xf32>
    %27 = arith.mulf %25, %26 : vector<512x8xf32>
    %28 = arith.subf %22, %27 : vector<512x8xf32>
    %cst_8 = arith.constant 1.600000e+01 : f32
    %29 = vector.broadcast %cst_8 : f32 to vector<512x8xf32>
    %30 = arith.divf %25, %29 : vector<512x8xf32>
    %31 = math.floor %30 : vector<512x8xf32>
    %cst_9 = arith.constant 1.600000e+01 : f32
    %32 = vector.broadcast %cst_9 : f32 to vector<512x8xf32>
    %33 = arith.mulf %31, %32 : vector<512x8xf32>
    %34 = arith.subf %25, %33 : vector<512x8xf32>
    %c0_i32 = arith.constant 0 : i32
    %35 = vector.broadcast %c0_i32 : i32 to vector<512x8xi32>
    %36 = arith.cmpi eq, %21, %35 : vector<512x8xi32>
    %37 = arith.select %36, %28, %34 : vector<512x8xi1>, vector<512x8xf32>
    %cst_10 = arith.constant dense<0.000000e+00> : vector<512x128xf32>
    %38 = tpu.matmul %37, %9, %cst_10 {dimension_numbers = #tpu.dot_dimension_numbers<[1], [0], [0], [1], [0, 0, 1, 1], [], []>} : vector<512x8xf32>, vector<8x128xf32>, vector<512x128xf32> -> vector<512x128xf32>
    %39 = vector.broadcast %5 : vector<1x128xf32> to vector<512x128xf32>
    %40 = arith.mulf %39, %16 : vector<512x128xf32>
    %41 = arith.mulf %16, %16 : vector<512x128xf32>
    %42 = vector.broadcast %6 : vector<1x128xf32> to vector<512x128xf32>
    %43 = arith.mulf %42, %41 : vector<512x128xf32>
    %44 = arith.addf %40, %43 : vector<512x128xf32>
    %45 = vector.broadcast %7 : vector<1x128xf32> to vector<512x128xf32>
    %46 = arith.mulf %45, %11 : vector<512x128xf32>
    %47 = arith.addf %44, %46 : vector<512x128xf32>
    %48 = arith.addf %47, %38 : vector<512x128xf32>
    %49 = vector.broadcast %8 : vector<1x128xf32> to vector<512x128xf32>
    %50 = arith.addf %48, %49 : vector<512x128xf32>
    %c0_11 = arith.constant 0 : index
    %c0_12 = arith.constant 0 : index
    %51 = vector.load %arg4[%c0_11, %c0_12] : memref<512x128xf32, #tpu.memory_space<vmem>>, vector<512x128xf32>
    tpu.vector_store %arg4[%c0_11, %c0_12], %50 {strides = array<i32>} : memref<512x128xf32, #tpu.memory_space<vmem>>, vector<512x128xf32>,
    return
  }
  func.func @transform_0(%arg0: i32) -> (i32, i32) {
    %c0_i32 = arith.constant 0 : i32
    %c0_i32_0 = arith.constant 0 : i32
    return %arg0, %c0_i32 : i32, i32
  }
  func.func @transform_1(%arg0: i32) -> (i32, i32) {
    %c0_i32 = arith.constant 0 : i32
    %c0_i32_0 = arith.constant 0 : i32
    %c0_i32_1 = arith.constant 0 : i32
    return %c0_i32, %c0_i32_0 : i32, i32
  }
  func.func @transform_2(%arg0: i32) -> (i32, i32) {
    %c0_i32 = arith.constant 0 : i32
    %c0_i32_0 = arith.constant 0 : i32
    %c0_i32_1 = arith.constant 0 : i32
    return %c0_i32, %c0_i32_0 : i32, i32
  }
  func.func @transform_3(%arg0: i32) -> (i32, i32) {
    %c0_i32 = arith.constant 0 : i32
    %c0_i32_0 = arith.constant 0 : i32
    return %arg0, %c0_i32 : i32, i32
  }
}

module attributes {stable_mosaic.version = 11 : i64} {
  func.func @_detect_kernel(%arg0: i32, %arg1: memref<128x32xbf16, #tpu.memory_space<vmem>>, %arg2: memref<32x128xbf16, #tpu.memory_space<vmem>>, %arg3: memref<16x128xf32, #tpu.memory_space<vmem>>, %arg4: memref<128x128xf32, #tpu.memory_space<vmem>>) attributes {dimension_semantics = [#tpu.dimension_semantics<parallel>], iteration_bounds = array<i64: 1>, scalar_prefetch = 0 : i64, scratch_operands = 0 : i64, tpu.core_type = #tpu.core_type<tc>, window_params = [{transform_indices = @transform_0, window_bounds = array<i64: 128, 32>}, {pipeline_mode = #tpu.pipeline_mode<synchronous>, transform_indices = @transform_1, window_bounds = array<i64: 32, 128>}, {pipeline_mode = #tpu.pipeline_mode<synchronous>, transform_indices = @transform_2, window_bounds = array<i64: 16, 128>}, {transform_indices = @transform_3, window_bounds = array<i64: 128, 128>}]} {
    %c0 = arith.constant 0 : index
    %c0_0 = arith.constant 0 : index
    %0 = vector.load %arg1[%c0, %c0_0] : memref<128x32xbf16, #tpu.memory_space<vmem>>, vector<128x32xbf16>
    %c0_1 = arith.constant 0 : index
    %c0_2 = arith.constant 0 : index
    %1 = vector.load %arg2[%c0_1, %c0_2] : memref<32x128xbf16, #tpu.memory_space<vmem>>, vector<32x128xbf16>
    %cst = arith.constant dense<0.000000e+00> : vector<128x128xf32>
    %2 = tpu.matmul %0, %1, %cst {dimension_numbers = #tpu.dot_dimension_numbers<[1], [0], [0], [1], [0, 0, 1, 1], [], []>} : vector<128x32xbf16>, vector<32x128xbf16>, vector<128x128xf32> -> vector<128x128xf32>
    %c0_3 = arith.constant 0 : index
    %c0_4 = arith.constant 0 : index
    %3 = vector.load %arg3[%c0_3, %c0_4] : memref<16x128xf32, #tpu.memory_space<vmem>>, vector<16x128xf32>
    %4 = vector.extract_strided_slice %3 {offsets = [0, 0], sizes = [1, 128], strides = [1, 1]} : vector<16x128xf32> to vector<1x128xf32>
    %5 = vector.extract_strided_slice %3 {offsets = [1, 0], sizes = [1, 128], strides = [1, 1]} : vector<16x128xf32> to vector<1x128xf32>
    %6 = vector.extract_strided_slice %3 {offsets = [2, 0], sizes = [1, 128], strides = [1, 1]} : vector<16x128xf32> to vector<1x128xf32>
    %7 = vector.extract_strided_slice %3 {offsets = [3, 0], sizes = [1, 128], strides = [1, 1]} : vector<16x128xf32> to vector<1x128xf32>
    %8 = vector.extract_strided_slice %3 {offsets = [4, 0], sizes = [1, 128], strides = [1, 1]} : vector<16x128xf32> to vector<1x128xf32>
    %9 = vector.extract_strided_slice %3 {offsets = [8, 0], sizes = [8, 128], strides = [1, 1]} : vector<16x128xf32> to vector<8x128xf32>
    %10 = vector.broadcast %4 : vector<1x128xf32> to vector<128x128xf32>
    %11 = arith.addf %2, %10 : vector<128x128xf32>
    %12 = arith.negf %11 : vector<128x128xf32>
    %13 = math.exp %12 : vector<128x128xf32>
    %cst_5 = arith.constant 1.000000e+00 : f32
    %14 = vector.broadcast %cst_5 : f32 to vector<128x128xf32>
    %15 = arith.addf %14, %13 : vector<128x128xf32>
    %16 = arith.divf %14, %15 : vector<128x128xf32>
    %c128_i32 = arith.constant 128 : i32
    %17 = arith.muli %arg0, %c128_i32 : i32
    %18 = tpu.iota {dimensions = array<i32: 0>} : vector<128x8xi32>
    %19 = vector.broadcast %17 : i32 to vector<128x8xi32>
    %20 = arith.addi %19, %18 : vector<128x8xi32>
    %21 = tpu.iota {dimensions = array<i32: 1>} : vector<128x8xi32>
    %22 = arith.sitofp %20 : vector<128x8xi32> to vector<128x8xf32>
    %cst_6 = arith.constant 8.000000e+00 : f32
    %23 = vector.broadcast %cst_6 : f32 to vector<128x8xf32>
    %24 = arith.divf %22, %23 : vector<128x8xf32>
    %25 = math.floor %24 : vector<128x8xf32>
    %cst_7 = arith.constant 8.000000e+00 : f32
    %26 = vector.broadcast %cst_7 : f32 to vector<128x8xf32>
    %27 = arith.mulf %25, %26 : vector<128x8xf32>
    %28 = arith.subf %22, %27 : vector<128x8xf32>
    %cst_8 = arith.constant 8.000000e+00 : f32
    %29 = vector.broadcast %cst_8 : f32 to vector<128x8xf32>
    %30 = arith.divf %25, %29 : vector<128x8xf32>
    %31 = math.floor %30 : vector<128x8xf32>
    %cst_9 = arith.constant 8.000000e+00 : f32
    %32 = vector.broadcast %cst_9 : f32 to vector<128x8xf32>
    %33 = arith.mulf %31, %32 : vector<128x8xf32>
    %34 = arith.subf %25, %33 : vector<128x8xf32>
    %c0_i32 = arith.constant 0 : i32
    %35 = vector.broadcast %c0_i32 : i32 to vector<128x8xi32>
    %36 = arith.cmpi eq, %21, %35 : vector<128x8xi32>
    %37 = arith.select %36, %28, %34 : vector<128x8xi1>, vector<128x8xf32>
    %cst_10 = arith.constant dense<0.000000e+00> : vector<128x128xf32>
    %38 = tpu.matmul %37, %9, %cst_10 {dimension_numbers = #tpu.dot_dimension_numbers<[1], [0], [0], [1], [0, 0, 1, 1], [], []>} : vector<128x8xf32>, vector<8x128xf32>, vector<128x128xf32> -> vector<128x128xf32>
    %39 = vector.broadcast %5 : vector<1x128xf32> to vector<128x128xf32>
    %40 = arith.mulf %39, %16 : vector<128x128xf32>
    %41 = arith.mulf %16, %16 : vector<128x128xf32>
    %42 = vector.broadcast %6 : vector<1x128xf32> to vector<128x128xf32>
    %43 = arith.mulf %42, %41 : vector<128x128xf32>
    %44 = arith.addf %40, %43 : vector<128x128xf32>
    %45 = vector.broadcast %7 : vector<1x128xf32> to vector<128x128xf32>
    %46 = arith.mulf %45, %11 : vector<128x128xf32>
    %47 = arith.addf %44, %46 : vector<128x128xf32>
    %48 = arith.addf %47, %38 : vector<128x128xf32>
    %49 = vector.broadcast %8 : vector<1x128xf32> to vector<128x128xf32>
    %50 = arith.addf %48, %49 : vector<128x128xf32>
    %c0_11 = arith.constant 0 : index
    %c0_12 = arith.constant 0 : index
    %51 = vector.load %arg4[%c0_11, %c0_12] : memref<128x128xf32, #tpu.memory_space<vmem>>, vector<128x128xf32>
    tpu.vector_store %arg4[%c0_11, %c0_12], %50 {strides = array<i32>} : memref<128x128xf32, #tpu.memory_space<vmem>>, vector<128x128xf32>,
    return
  }
  func.func @transform_0(%arg0: i32) -> (i32, i32) {
    %c0_i32 = arith.constant 0 : i32
    %c0_i32_0 = arith.constant 0 : i32
    return %arg0, %c0_i32 : i32, i32
  }
  func.func @transform_1(%arg0: i32) -> (i32, i32) {
    %c0_i32 = arith.constant 0 : i32
    %c0_i32_0 = arith.constant 0 : i32
    %c0_i32_1 = arith.constant 0 : i32
    return %c0_i32, %c0_i32_0 : i32, i32
  }
  func.func @transform_2(%arg0: i32) -> (i32, i32) {
    %c0_i32 = arith.constant 0 : i32
    %c0_i32_0 = arith.constant 0 : i32
    %c0_i32_1 = arith.constant 0 : i32
    return %c0_i32, %c0_i32_0 : i32, i32
  }
  func.func @transform_3(%arg0: i32) -> (i32, i32) {
    %c0_i32 = arith.constant 0 : i32
    %c0_i32_0 = arith.constant 0 : i32
    return %arg0, %c0_i32 : i32, i32
  }
}

module attributes {stable_mosaic.version = 11 : i64} {
  func.func @_detect_kernel(%arg0: i32, %arg1: memref<32x64xbf16, #tpu.memory_space<vmem>>, %arg2: memref<64x128xbf16, #tpu.memory_space<vmem>>, %arg3: memref<16x128xf32, #tpu.memory_space<vmem>>, %arg4: memref<32x128xf32, #tpu.memory_space<vmem>>) attributes {dimension_semantics = [#tpu.dimension_semantics<parallel>], iteration_bounds = array<i64: 1>, scalar_prefetch = 0 : i64, scratch_operands = 0 : i64, tpu.core_type = #tpu.core_type<tc>, window_params = [{transform_indices = @transform_0, window_bounds = array<i64: 32, 64>}, {pipeline_mode = #tpu.pipeline_mode<synchronous>, transform_indices = @transform_1, window_bounds = array<i64: 64, 128>}, {pipeline_mode = #tpu.pipeline_mode<synchronous>, transform_indices = @transform_2, window_bounds = array<i64: 16, 128>}, {transform_indices = @transform_3, window_bounds = array<i64: 32, 128>}]} {
    %c0 = arith.constant 0 : index
    %c0_0 = arith.constant 0 : index
    %0 = vector.load %arg1[%c0, %c0_0] : memref<32x64xbf16, #tpu.memory_space<vmem>>, vector<32x64xbf16>
    %c0_1 = arith.constant 0 : index
    %c0_2 = arith.constant 0 : index
    %1 = vector.load %arg2[%c0_1, %c0_2] : memref<64x128xbf16, #tpu.memory_space<vmem>>, vector<64x128xbf16>
    %cst = arith.constant dense<0.000000e+00> : vector<32x128xf32>
    %2 = tpu.matmul %0, %1, %cst {dimension_numbers = #tpu.dot_dimension_numbers<[1], [0], [0], [1], [0, 0, 1, 1], [], []>} : vector<32x64xbf16>, vector<64x128xbf16>, vector<32x128xf32> -> vector<32x128xf32>
    %c0_3 = arith.constant 0 : index
    %c0_4 = arith.constant 0 : index
    %3 = vector.load %arg3[%c0_3, %c0_4] : memref<16x128xf32, #tpu.memory_space<vmem>>, vector<16x128xf32>
    %4 = vector.extract_strided_slice %3 {offsets = [0, 0], sizes = [1, 128], strides = [1, 1]} : vector<16x128xf32> to vector<1x128xf32>
    %5 = vector.extract_strided_slice %3 {offsets = [1, 0], sizes = [1, 128], strides = [1, 1]} : vector<16x128xf32> to vector<1x128xf32>
    %6 = vector.extract_strided_slice %3 {offsets = [2, 0], sizes = [1, 128], strides = [1, 1]} : vector<16x128xf32> to vector<1x128xf32>
    %7 = vector.extract_strided_slice %3 {offsets = [3, 0], sizes = [1, 128], strides = [1, 1]} : vector<16x128xf32> to vector<1x128xf32>
    %8 = vector.extract_strided_slice %3 {offsets = [4, 0], sizes = [1, 128], strides = [1, 1]} : vector<16x128xf32> to vector<1x128xf32>
    %9 = vector.extract_strided_slice %3 {offsets = [8, 0], sizes = [8, 128], strides = [1, 1]} : vector<16x128xf32> to vector<8x128xf32>
    %10 = vector.broadcast %4 : vector<1x128xf32> to vector<32x128xf32>
    %11 = arith.addf %2, %10 : vector<32x128xf32>
    %12 = arith.negf %11 : vector<32x128xf32>
    %13 = math.exp %12 : vector<32x128xf32>
    %cst_5 = arith.constant 1.000000e+00 : f32
    %14 = vector.broadcast %cst_5 : f32 to vector<32x128xf32>
    %15 = arith.addf %14, %13 : vector<32x128xf32>
    %16 = arith.divf %14, %15 : vector<32x128xf32>
    %c32_i32 = arith.constant 32 : i32
    %17 = arith.muli %arg0, %c32_i32 : i32
    %18 = tpu.iota {dimensions = array<i32: 0>} : vector<32x8xi32>
    %19 = vector.broadcast %17 : i32 to vector<32x8xi32>
    %20 = arith.addi %19, %18 : vector<32x8xi32>
    %21 = tpu.iota {dimensions = array<i32: 1>} : vector<32x8xi32>
    %22 = arith.sitofp %20 : vector<32x8xi32> to vector<32x8xf32>
    %cst_6 = arith.constant 4.000000e+00 : f32
    %23 = vector.broadcast %cst_6 : f32 to vector<32x8xf32>
    %24 = arith.divf %22, %23 : vector<32x8xf32>
    %25 = math.floor %24 : vector<32x8xf32>
    %cst_7 = arith.constant 4.000000e+00 : f32
    %26 = vector.broadcast %cst_7 : f32 to vector<32x8xf32>
    %27 = arith.mulf %25, %26 : vector<32x8xf32>
    %28 = arith.subf %22, %27 : vector<32x8xf32>
    %cst_8 = arith.constant 4.000000e+00 : f32
    %29 = vector.broadcast %cst_8 : f32 to vector<32x8xf32>
    %30 = arith.divf %25, %29 : vector<32x8xf32>
    %31 = math.floor %30 : vector<32x8xf32>
    %cst_9 = arith.constant 4.000000e+00 : f32
    %32 = vector.broadcast %cst_9 : f32 to vector<32x8xf32>
    %33 = arith.mulf %31, %32 : vector<32x8xf32>
    %34 = arith.subf %25, %33 : vector<32x8xf32>
    %c0_i32 = arith.constant 0 : i32
    %35 = vector.broadcast %c0_i32 : i32 to vector<32x8xi32>
    %36 = arith.cmpi eq, %21, %35 : vector<32x8xi32>
    %37 = arith.select %36, %28, %34 : vector<32x8xi1>, vector<32x8xf32>
    %cst_10 = arith.constant dense<0.000000e+00> : vector<32x128xf32>
    %38 = tpu.matmul %37, %9, %cst_10 {dimension_numbers = #tpu.dot_dimension_numbers<[1], [0], [0], [1], [0, 0, 1, 1], [], []>} : vector<32x8xf32>, vector<8x128xf32>, vector<32x128xf32> -> vector<32x128xf32>
    %39 = vector.broadcast %5 : vector<1x128xf32> to vector<32x128xf32>
    %40 = arith.mulf %39, %16 : vector<32x128xf32>
    %41 = arith.mulf %16, %16 : vector<32x128xf32>
    %42 = vector.broadcast %6 : vector<1x128xf32> to vector<32x128xf32>
    %43 = arith.mulf %42, %41 : vector<32x128xf32>
    %44 = arith.addf %40, %43 : vector<32x128xf32>
    %45 = vector.broadcast %7 : vector<1x128xf32> to vector<32x128xf32>
    %46 = arith.mulf %45, %11 : vector<32x128xf32>
    %47 = arith.addf %44, %46 : vector<32x128xf32>
    %48 = arith.addf %47, %38 : vector<32x128xf32>
    %49 = vector.broadcast %8 : vector<1x128xf32> to vector<32x128xf32>
    %50 = arith.addf %48, %49 : vector<32x128xf32>
    %c0_11 = arith.constant 0 : index
    %c0_12 = arith.constant 0 : index
    %51 = vector.load %arg4[%c0_11, %c0_12] : memref<32x128xf32, #tpu.memory_space<vmem>>, vector<32x128xf32>
    tpu.vector_store %arg4[%c0_11, %c0_12], %50 {strides = array<i32>} : memref<32x128xf32, #tpu.memory_space<vmem>>, vector<32x128xf32>,
    return
  }
  func.func @transform_0(%arg0: i32) -> (i32, i32) {
    %c0_i32 = arith.constant 0 : i32
    %c0_i32_0 = arith.constant 0 : i32
    return %arg0, %c0_i32 : i32, i32
  }
  func.func @transform_1(%arg0: i32) -> (i32, i32) {
    %c0_i32 = arith.constant 0 : i32
    %c0_i32_0 = arith.constant 0 : i32
    %c0_i32_1 = arith.constant 0 : i32
    return %c0_i32, %c0_i32_0 : i32, i32
  }
  func.func @transform_2(%arg0: i32) -> (i32, i32) {
    %c0_i32 = arith.constant 0 : i32
    %c0_i32_0 = arith.constant 0 : i32
    %c0_i32_1 = arith.constant 0 : i32
    return %c0_i32, %c0_i32_0 : i32, i32
  }
  func.func @transform_3(%arg0: i32) -> (i32, i32) {
    %c0_i32 = arith.constant 0 : i32
    %c0_i32_0 = arith.constant 0 : i32
    return %arg0, %c0_i32 : i32, i32
  }
}

</mosaic_0001>

<bundles_post_ra>
// kernel: detect_forward.3
= control target key start
LH: loop header
LB: loop body
LE: loop exit
PB: predicated region body
PF: predicated region fallthrough
CT: control target
= control target key end

     0   :  { %v4085_v1 = vmov 16.0   ;;  %vm250_vm0 = vcmask 130048   ;;  %v1733_v5 = vlaneseq  ;;  %vm2513_vm3 = vcmask 64512   ;;  %s7058_s1 = inlined_call_operand.vmem [shape: bf16[16,128], index: 1, kind: input, shape index: {}]   ;;  %s7059_s0 = inlined_call_operand.vmem [shape: bf16[512,16], index: 0, kind: input, shape index: {}]   ;;  %s7060_s2 = inlined_call_operand.vmem [shape: f32[16,128], index: 2, kind: input, shape index: {}]   ;;  %s7061_s3 = inlined_call_operand.vmem [shape: f32[512,128], index: 3, kind: output, shape index: {}]  }
   0x1   :  { %v3823_v0 = vld [vmem:[%s7058_s1] sm:$0xff]  ;;  %3827 = vrcp.f32 %v4085_v1  ;;  %v82_v4 = vld [vmem:[%s7060_s2 + $0x8] sm:$0xff] }
   0x2   :  { %v3791_v2 = vld [vmem:[%s7059_s0] sm:$0xff]  ;;  %354 = vmatpush.bf16.msra.mxu0 %v3823_v0  ;;  %3824 = vmatpush.bf16.msra.mxu2 %v3823_v0  ;;  %v4120_v7 = vshrl.u32 %v1733_v5, 7  ;;  %v3792_v26 = vld [vmem:[%s7059_s0 + $0x8] sm:$0xff]  ;;  %v4154_v33 = vand.u32 127, %v1733_v5 }
   0x3   :  { %v3807_v3 = vld [vmem:[%s7059_s0 + $0x80] sm:$0xff]  ;;  %2721 = vmatpush.msra.mxu1 %v82_v4  ;;  %3825 = vmatpush.msra.mxu3 %v82_v4  ;;  %v3808_v27 = vld [vmem:[%s7059_s0 + $0x88] sm:$0xff] }
   0x4   :  { %v4123_v9 = vadd.s32 8, %v4120_v7  ;;  %v1767_v10 = vadd.s32 264, %v4120_v7  ;;  %v4127_v12 = vadd.s32 16, %v4120_v7  ;;  %v4130_v14 = vadd.s32 272, %v4120_v7 }
   0x5   :  { %3631 = vmatmul.msk.bf16.vlgmr.msra.gmra.mxu0 %vm250_vm0, %v3791_v2  ;;  %3647 = vmatmul.msk.bf16.vlgmr.msra.gmra.mxu2 %vm250_vm0, %v3807_v3  ;;  %v1865_v15 = vcvt.s32.f32 %v4120_v7  ;;  %v4142_v25 = vadd.s32 24, %v4120_v7  ;;  %vm2448_vm2 = vcmp.eq.s32.totalorder %v4154_v33, 0  ;;  %v4169_v48 = vadd.s32 32, %v4120_v7 }
   0x6   :  { %v1866_v16 = vcvt.s32.f32 %v4123_v9  ;;  %v1898_v17 = vcvt.s32.f32 %v1767_v10  ;;  %v1899_v19 = vcvt.s32.f32 %v4130_v14  ;;  %v1867_v20 = vcvt.s32.f32 %v4127_v12  ;;  %v3793_v10 = vld [vmem:[%s7059_s0 + $0x10] sm:$0xff] }
   0x7   :  { %v3828_v6 = vpop.eup %3827  ;;  %v1868_v37 = vcvt.s32.f32 %v4142_v25  ;;  %v1769_v52 = vadd.s32 280, %v4120_v7  ;;  %v1869_v0 = vcvt.s32.f32 %v4169_v48  ;;  %v4195_v14 = vadd.s32 40, %v4120_v7 }
   0x8   :  { %v1930_v8 = vmul.f32 16.0, %v3828_v6  ;;  %vm1934_vm1 = vweird.f32 %v3828_v6 }
   0x9   :  { %v1900_v4 = vcvt.s32.f32 %v1769_v52 }
   0xa   :  { %v1931_v11 = vsub.f32 1.0, %v1930_v8  ;;  %v1770_v8 = vadd.s32 288, %v4120_v7 }
   0xc   :  { %v1932_v13 = vmul.f32 %v3828_v6, %v1931_v11 }
   0xe   :  { %v1933_v18 = vadd.f32 %v3828_v6, %v1932_v13 }
  0x10   :  { %v4136_v21 = vsel %vm1934_vm1, %v3828_v6, %v1933_v18 }
  0x11   :  { %v1936_v22 = vmul.f32 %v4136_v21, %v1865_v15  ;;  %v1937_v23 = vmul.f32 %v4136_v21, %v1866_v16  ;;  %v1969_v24 = vmul.f32 %v4136_v21, %v1898_v17  ;;  %v1970_v28 = vmul.f32 %v4136_v21, %v1899_v19 }
  0x12   :  { %v1938_v31 = vmul.f32 %v4136_v21, %v1867_v20  ;;  %v1939_v47 = vmul.f32 %v4136_v21, %v1868_v37  ;;  %v1971_v9 = vmul.f32 %v4136_v21, %v1900_v4  ;;  %v1940_v13 = vmul.f32 %v4136_v21, %v1869_v0 }
  0x13   :  { %v2000_v29 = vfloor.f32 %v1936_v22  ;;  %v2001_v30 = vfloor.f32 %v1937_v23  ;;  %v2033_v32 = vfloor.f32 %v1969_v24  ;;  %v2034_v40 = vfloor.f32 %v1970_v28 }
  0x14   :  { %v4162_v43 = vfloor.f32 %v1938_v31  ;;  %v4180_v62 = vfloor.f32 %v1939_v47  ;;  %v2035_v22 = vfloor.f32 %v1971_v9  ;;  %v3810_v9 = vld [vmem:[%s7059_s0 + $0x98] sm:$0xff] }
  0x15   :  { %v2064_v34 = vmul.f32 16.0, %v2000_v29  ;;  %v2192_v35 = vmul.f32 %v2000_v29, %v4136_v21  ;;  %v2193_v36 = vmul.f32 %v2001_v30, %v4136_v21  ;;  %3632 = vmatmul.msk.bf16.gmra.mxu0 %vm250_vm0, %v3792_v26  ;;  %3648 = vmatmul.msk.bf16.gmra.mxu2 %vm250_vm0, %v3808_v27  ;;  %v2097_v38 = vmul.f32 16.0, %v2033_v32 }
  0x16   :  { %v2225_v39 = vmul.f32 %v2033_v32, %v4136_v21  ;;  %v2226_v51 = vmul.f32 %v2034_v40, %v4136_v21  ;;  %v2065_v54 = vmul.f32 16.0, %v2001_v30  ;;  %v2194_v56 = vmul.f32 %v4162_v43, %v4136_v21 }
  0x17   :  { %v2256_v41 = vfloor.f32 %v2192_v35  ;;  %v2257_v42 = vfloor.f32 %v2193_v36  ;;  %v2128_v45 = vsub.f32 %v1865_v15, %v2064_v34  ;;  %v2161_v49 = vsub.f32 %v1898_v17, %v2097_v38  ;;  %v3809_v17 = vld [vmem:[%s7059_s0 + $0x90] sm:$0xff] }
  0x18   :  { %v2289_v44 = vfloor.f32 %v2225_v39  ;;  %v2098_v58 = vmul.f32 16.0, %v2034_v40  ;;  %v2290_v59 = vfloor.f32 %v2226_v51  ;;  %v2129_v1 = vsub.f32 %v1866_v16, %v2065_v54 }
  0x19   :  { %v2320_v46 = vmul.f32 16.0, %v2256_v41  ;;  %v2321_v55 = vmul.f32 16.0, %v2257_v42  ;;  %v2258_v3 = vfloor.f32 %v2194_v56  ;;  %v2195_v11 = vmul.f32 %v4180_v62, %v4136_v21 }
  0x1a   :  { %v2353_v50 = vmul.f32 16.0, %v2289_v44  ;;  %v2354_v63 = vmul.f32 16.0, %v2290_v59  ;;  %v2162_v5 = vsub.f32 %v1899_v19, %v2098_v58  ;;  %v1901_v15 = vcvt.s32.f32 %v1770_v8 }
  0x1b   :  { %v2384_v53 = vsub.f32 %v2000_v29, %v2320_v46  ;;  %v2385_v2 = vsub.f32 %v2001_v30, %v2321_v55  ;;  %v2066_v18 = vmul.f32 16.0, %v4162_v43  ;;  %v2322_v19 = vmul.f32 16.0, %v2258_v3 }
  0x1c   :  { %v2417_v57 = vsub.f32 %v2033_v32, %v2353_v50  ;;  %v2418_v6 = vsub.f32 %v2034_v40, %v2354_v63  ;;  %v1972_v24 = vmul.f32 %v4136_v21, %v1901_v15  ;;  %v4207_v26 = vadd.s32 296, %v4120_v7 }
  0x1d   :  { %v2449_v60 = vsel %vm2448_vm2, %v2128_v45, %v2384_v53  ;;  %v2450_v16 = vsel %vm2448_vm2, %v2129_v1, %v2385_v2  ;;  %v2099_v27 = vmul.f32 16.0, %v2035_v22  ;;  %v2227_v28 = vmul.f32 %v2035_v22, %v4136_v21 }
  0x1e   :  { %3727 = vmatmul.msk.f32.vlgmr.msra.gmra.mxu1 %vm2513_vm3, %v2449_v60  ;;  %v2482_v61 = vsel %vm2448_vm2, %v2161_v49, %v2417_v57  ;;  %v2483_v23 = vsel %vm2448_vm2, %v2162_v5, %v2418_v6  ;;  %v2259_v29 = vfloor.f32 %v2195_v11  ;;  %v1870_v30 = vcvt.s32.f32 %v4195_v14  ;;  %v3794_v5 = vld [vmem:[%s7059_s0 + $0x18] sm:$0xff] }
  0x1f   :  { %3760 = vmatmul.msk.f32.vlgmr.msra.gmra.mxu3 %vm2513_vm3, %v2482_v61  ;;  %v2036_v31 = vfloor.f32 %v1972_v24  ;;  %v1902_v32 = vcvt.s32.f32 %v4207_v26  ;;  %v2130_v34 = vsub.f32 %v1867_v20, %v2066_v18  ;;  %v2386_v35 = vsub.f32 %v4162_v43, %v2322_v19 }
  0x20   :  { %v4219_v36 = vfloor.f32 %v1940_v13  ;;  %v2291_v38 = vfloor.f32 %v2227_v28  ;;  %v2067_v40 = vmul.f32 16.0, %v4180_v62  ;;  %v2163_v41 = vsub.f32 %v1900_v4, %v2099_v27 }
  0x21   :  { %v2228_v39 = vmul.f32 %v2036_v31, %v4136_v21  ;;  %v1973_v44 = vmul.f32 %v4136_v21, %v1902_v32  ;;  %v2323_v45 = vmul.f32 16.0, %v2259_v29  ;;  %v1941_v12 = vmul.f32 %v4136_v21, %v1870_v30 }
  0x22   :  { %v2355_v42 = vmul.f32 16.0, %v2291_v38  ;;  %v4228_v43 = vadd.s32 48, %v4120_v7  ;;  %v2451_v46 = vsel %vm2448_vm2, %v2130_v34, %v2386_v35  ;;  %v2196_v47 = vmul.f32 %v4219_v36, %v4136_v21 }
  0x23   :  { %v2292_v20 = vfloor.f32 %v2228_v39  ;;  %v2037_v50 = vfloor.f32 %v1973_v44  ;;  %v2100_v51 = vmul.f32 16.0, %v2036_v31  ;;  %v4235_v53 = vadd.s32 304, %v4120_v7 }
  0x24   :  { %v2419_v49 = vsub.f32 %v2035_v22, %v2355_v42  ;;  %v4241_v56 = vfloor.f32 %v1941_v12  ;;  %v1871_v57 = vcvt.s32.f32 %v4228_v43  ;;  %v2131_v59 = vsub.f32 %v1868_v37, %v2067_v40 }
  0x25   :  { %3633 = vmatmul.msk.bf16.gmra.mxu0 %vm250_vm0, %v3793_v10  ;;  %3649 = vmatmul.msk.bf16.gmra.mxu2 %vm250_vm0, %v3809_v17  ;;  %v2356_v52 = vmul.f32 16.0, %v2292_v20  ;;  %v2229_v55 = vmul.f32 %v2037_v50, %v4136_v21  ;;  %v1903_v58 = vcvt.s32.f32 %v4235_v53  ;;  %v2387_v60 = vsub.f32 %v4180_v62, %v2323_v45 }
  0x26   :  { %3728 = vmatmul.msk.f32.gmra.mxu1 %vm2513_vm3, %v2450_v16  ;;  %v2484_v54 = vsel %vm2448_vm2, %v2163_v41, %v2419_v49  ;;  %v2260_v61 = vfloor.f32 %v2196_v47  ;;  %v2164_v1 = vsub.f32 %v1901_v15, %v2100_v51  ;;  %v2068_v4 = vmul.f32 16.0, %v4219_v36 }
  0x27   :  { %3761 = vmatmul.msk.f32.gmra.mxu3 %vm2513_vm3, %v2483_v23  ;;  %v2293_v63 = vfloor.f32 %v2229_v55  ;;  %v2420_v2 = vsub.f32 %v2036_v31, %v2356_v52  ;;  %v1974_v3 = vmul.f32 %v4136_v21, %v1903_v58  ;;  %v2197_v25 = vmul.f32 %v4241_v56, %v4136_v21 }
  0x28   :  { %v1942_v37 = vmul.f32 %v4136_v21, %v1871_v57  ;;  %v4260_v62 = vadd.s32 56, %v4120_v7  ;;  %v2452_v8 = vsel %vm2448_vm2, %v2131_v59, %v2387_v60  ;;  %v2324_v10 = vmul.f32 16.0, %v2260_v61 }
  0x29   :  { %v2038_v6 = vfloor.f32 %v1974_v3  ;;  %v2101_v11 = vmul.f32 16.0, %v2037_v50  ;;  %v2357_v13 = vmul.f32 16.0, %v2293_v63  ;;  %v2485_v15 = vsel %vm2448_vm2, %v2164_v1, %v2420_v2 }
  0x2a   :  { %v4271_v17 = vadd.s32 312, %v4120_v7  ;;  %v2132_v18 = vsub.f32 %v1869_v0, %v2068_v4  ;;  %v2261_v19 = vfloor.f32 %v2197_v25  ;;  %v4277_v22 = vfloor.f32 %v1942_v37 }
  0x2b   :  { %v2230_v16 = vmul.f32 %v2038_v6, %v4136_v21  ;;  %v1872_v23 = vcvt.s32.f32 %v4260_v62  ;;  %v2388_v26 = vsub.f32 %v4219_v36, %v2324_v10  ;;  %v2165_v27 = vsub.f32 %v1902_v32, %v2101_v11 }
  0x2c   :  { %v1904_v24 = vcvt.s32.f32 %v4271_v17  ;;  %v2421_v48 = vsub.f32 %v2037_v50, %v2357_v13  ;;  %v2069_v29 = vmul.f32 16.0, %v4241_v56  ;;  %v2325_v31 = vmul.f32 16.0, %v2261_v19 }
  0x2d   :  { %v2294_v0 = vfloor.f32 %v2230_v16  ;;  %v2198_v34 = vmul.f32 %v4277_v22, %v4136_v21  ;;  %v1943_v35 = vmul.f32 %v4136_v21, %v1872_v23  ;;  %v2453_v36 = vsel %vm2448_vm2, %v2132_v18, %v2388_v26 }
  0x2e   :  { %3729 = vmatmul.msk.f32.gmra.mxu1 %vm2513_vm3, %v2451_v46  ;;  %v1975_v28 = vmul.f32 %v4136_v21, %v1904_v24  ;;  %v2486_v32 = vsel %vm2448_vm2, %v2165_v27, %v2421_v48  ;;  %v4296_v39 = vadd.s32 64, %v4120_v7  ;;  %v2102_v40 = vmul.f32 16.0, %v2038_v6 }
  0x2f   :  { %3762 = vmatmul.msk.f32.gmra.mxu3 %vm2513_vm3, %v2484_v54  ;;  %v2358_v41 = vmul.f32 16.0, %v2294_v0  ;;  %v4300_v44 = vadd.s32 320, %v4120_v7  ;;  %v2133_v45 = vsub.f32 %v1870_v30, %v2069_v29  ;;  %v2389_v12 = vsub.f32 %v4241_v56, %v2325_v31  ;;  %v3795_v54 = vld [vmem:[%s7059_s0 + $0x20] sm:$0xff] }
  0x30   :  { %v2039_v38 = vfloor.f32 %v1975_v28  ;;  %v2262_v20 = vfloor.f32 %v2198_v34  ;;  %v4306_v46 = vfloor.f32 %v1943_v35  ;;  %v1873_v47 = vcvt.s32.f32 %v4296_v39 }
  0x31   :  { %v1905_v50 = vcvt.s32.f32 %v4300_v44  ;;  %v2166_v51 = vsub.f32 %v1903_v58, %v2102_v40  ;;  %v2422_v52 = vsub.f32 %v2038_v6, %v2358_v41  ;;  %v4312_v53 = vadd.s32 72, %v4120_v7  ;;  %v3811_v58 = vld [vmem:[%s7059_s0 + $0xa0] sm:$0xff] }
  0x32   :  { %v2231_v42 = vmul.f32 %v2039_v38, %v4136_v21  ;;  %v2454_v30 = vsel %vm2448_vm2, %v2133_v45, %v2389_v12  ;;  %v2070_v55 = vmul.f32 16.0, %v4277_v22  ;;  %v2326_v56 = vmul.f32 16.0, %v2262_v20  ;;  %v3812_v20 = vld [vmem:[%s7059_s0 + $0xa8] sm:$0xff] }
  0x33   :  { %v1976_v14 = vmul.f32 %v4136_v21, %v1905_v50  ;;  %v2199_v59 = vmul.f32 %v4306_v46, %v4136_v21  ;;  %v1944_v60 = vmul.f32 %v4136_v21, %v1873_v47  ;;  %v2103_v61 = vmul.f32 16.0, %v2039_v38 }
  0x34   :  { %v2295_v49 = vfloor.f32 %v2231_v42  ;;  %v2487_v2 = vsel %vm2448_vm2, %v2166_v51, %v2422_v52  ;;  %v4332_v3 = vadd.s32 328, %v4120_v7  ;;  %v1874_v4 = vcvt.s32.f32 %v4312_v53 }
  0x35   :  { %3634 = vmatmul.msk.bf16.gmra.mxu0 %vm250_vm0, %v3794_v5  ;;  %3650 = vmatmul.msk.bf16.gmra.mxu2 %vm250_vm0, %v3810_v9  ;;  %v2040_v1 = vfloor.f32 %v1976_v14  ;;  %v2134_v25 = vsub.f32 %v1871_v57, %v2070_v55  ;;  %v2263_v37 = vfloor.f32 %v2199_v59  ;;  %v4344_v9 = vfloor.f32 %v1944_v60 }
  0x36   :  { %3730 = vmatmul.msk.f32.gmra.mxu1 %vm2513_vm3, %v2452_v8  ;;  %v2359_v63 = vmul.f32 16.0, %v2295_v49  ;;  %v1906_v6 = vcvt.s32.f32 %v4332_v3  ;;  %v2390_v8 = vsub.f32 %v4277_v22, %v2326_v56  ;;  %v2167_v10 = vsub.f32 %v1904_v24, %v2103_v61 }
  0x37   :  { %3763 = vmatmul.msk.f32.gmra.mxu3 %vm2513_vm3, %v2485_v15  ;;  %v2232_v5 = vmul.f32 %v2040_v1, %v4136_v21  ;;  %v1945_v43 = vmul.f32 %v4136_v21, %v1874_v4  ;;  %v2071_v57 = vmul.f32 16.0, %v4306_v46  ;;  %v2327_v16 = vmul.f32 16.0, %v2263_v37 }
  0x38   :  { %v2423_v11 = vsub.f32 %v2039_v38, %v2359_v63  ;;  %v1977_v15 = vmul.f32 %v4136_v21, %v1906_v6  ;;  %v4352_v17 = vadd.s32 80, %v4120_v7  ;;  %v2455_v19 = vsel %vm2448_vm2, %v2134_v25, %v2390_v8 }
  0x39   :  { %v2296_v13 = vfloor.f32 %v2232_v5  ;;  %v2200_v22 = vmul.f32 %v4344_v9, %v4136_v21  ;;  %v2104_v26 = vmul.f32 16.0, %v2040_v1  ;;  %v4362_v0 = vadd.s32 336, %v4120_v7 }
  0x3a   :  { %v2041_v18 = vfloor.f32 %v1977_v15  ;;  %v2488_v24 = vsel %vm2448_vm2, %v2167_v10, %v2423_v11  ;;  %v4364_v28 = vfloor.f32 %v1945_v43  ;;  %v2135_v29 = vsub.f32 %v1872_v23, %v2071_v57  ;;  %v3796_v23 = vld [vmem:[%s7059_s0 + $0x28] sm:$0xff] }
  0x3b   :  { %v2360_v27 = vmul.f32 16.0, %v2296_v13  ;;  %v2391_v31 = vsub.f32 %v4306_v46, %v2327_v16  ;;  %v1875_v34 = vcvt.s32.f32 %v4352_v17  ;;  %v2264_v35 = vfloor.f32 %v2200_v22 }
  0x3c   :  { %v2233_v48 = vmul.f32 %v2041_v18, %v4136_v21  ;;  %v2201_v41 = vmul.f32 %v4364_v28, %v4136_v21  ;;  %v2072_v44 = vmul.f32 16.0, %v4344_v9  ;;  %v4386_v12 = vadd.s32 88, %v4120_v7 }
  0x3d   :  { %v2424_v40 = vsub.f32 %v2040_v1, %v2360_v27  ;;  %v2456_v62 = vsel %vm2448_vm2, %v2135_v29, %v2391_v31  ;;  %v1946_v45 = vmul.f32 %v4136_v21, %v1875_v34  ;;  %v2328_v46 = vmul.f32 16.0, %v2264_v35  ;;  %v3813_v31 = vld [vmem:[%s7059_s0 + $0xb0] sm:$0xff] }
  0x3e   :  { %3731 = vmatmul.msk.f32.gmra.mxu1 %vm2513_vm3, %v2453_v36  ;;  %v2297_v38 = vfloor.f32 %v2233_v48  ;;  %v1907_v36 = vcvt.s32.f32 %v4362_v0  ;;  %v2105_v49 = vmul.f32 16.0, %v2041_v18  ;;  %v4394_v14 = vadd.s32 344, %v4120_v7  ;;  %v3797_v48 = vld [vmem:[%s7059_s0 + $0x30] sm:$0xff] }
  0x3f   :  { %3764 = vmatmul.msk.f32.gmra.mxu3 %vm2513_vm3, %v2486_v32  ;;  %v2168_v32 = vsub.f32 %v1905_v50, %v2104_v26  ;;  %v2136_v55 = vsub.f32 %v1873_v47, %v2072_v44  ;;  %v4401_v56 = vfloor.f32 %v1946_v45  ;;  %v1876_v59 = vcvt.s32.f32 %v4386_v12 }
  0x40   :  { %v1978_v42 = vmul.f32 %v4136_v21, %v1907_v36  ;;  %v2361_v50 = vmul.f32 16.0, %v2297_v38  ;;  %v2392_v60 = vsub.f32 %v4344_v9, %v2328_v46  ;;  %v2169_v61 = vsub.f32 %v1906_v6, %v2105_v49 }
  0x41   :  { %v2489_v52 = vsel %vm2448_vm2, %v2168_v32, %v2424_v40  ;;  %v2073_v39 = vmul.f32 16.0, %v4364_v28  ;;  %v2202_v3 = vmul.f32 %v4401_v56, %v4136_v21  ;;  %v1947_v5 = vmul.f32 %v4136_v21, %v1876_v59 }
  0x42   :  { %v2042_v51 = vfloor.f32 %v1978_v42  ;;  %v2425_v63 = vsub.f32 %v2041_v18, %v2361_v50  ;;  %v4416_v25 = vadd.s32 96, %v4120_v7  ;;  %v2457_v6 = vsel %vm2448_vm2, %v2136_v55, %v2392_v60 }
  0x43   :  { %v4424_v13 = vadd.s32 352, %v4120_v7  ;;  %v2137_v15 = vsub.f32 %v1874_v4, %v2073_v39  ;;  %v2266_v57 = vfloor.f32 %v2202_v3  ;;  %v4430_v16 = vfloor.f32 %v1947_v5 }
  0x44   :  { %v2490_v8 = vsel %vm2448_vm2, %v2169_v61, %v2425_v63  ;;  %v2106_v9 = vmul.f32 16.0, %v2042_v51  ;;  %v1877_v18 = vcvt.s32.f32 %v4416_v25  ;;  %v2074_v53 = vmul.f32 16.0, %v4401_v56 }
  0x45   :  { %3635 = vmatmul.msk.bf16.gmra.mxu0 %vm250_vm0, %v3795_v54  ;;  %3651 = vmatmul.msk.bf16.gmra.mxu2 %vm250_vm0, %v3811_v58  ;;  %v2234_v54 = vmul.f32 %v2042_v51, %v4136_v21  ;;  %v1908_v58 = vcvt.s32.f32 %v4394_v14  ;;  %v2330_v0 = vmul.f32 16.0, %v2266_v57  ;;  %v4466_v45 = vadd.s32 112, %v4120_v7 }
  0x46   :  { %3732 = vmatmul.msk.f32.gmra.mxu1 %vm2513_vm3, %v2454_v30  ;;  %v2265_v30 = vfloor.f32 %v2201_v41  ;;  %v1948_v29 = vmul.f32 %v4136_v21, %v1877_v18  ;;  %v4456_v41 = vadd.s32 360, %v4120_v7  ;;  %v2138_v42 = vsub.f32 %v1875_v34, %v2074_v53 }
  0x47   :  { %3765 = vmatmul.msk.f32.gmra.mxu3 %vm2513_vm3, %v2487_v2  ;;  %v2298_v1 = vfloor.f32 %v2234_v54  ;;  %v1979_v2 = vmul.f32 %v4136_v21, %v1908_v58  ;;  %v2394_v46 = vsub.f32 %v4401_v56, %v2330_v0  ;;  %v1879_v54 = vcvt.s32.f32 %v4466_v45 }
  0x48   :  { %v2329_v47 = vmul.f32 16.0, %v2265_v30  ;;  %v4463_v44 = vfloor.f32 %v1948_v29  ;;  %v4507_v12 = vadd.s32 128, %v4120_v7 }
  0x49   :  { %v2043_v37 = vfloor.f32 %v1979_v2  ;;  %v2362_v10 = vmul.f32 16.0, %v2298_v1  ;;  %v2459_v56 = vsel %vm2448_vm2, %v2138_v42, %v2394_v46  ;;  %v4490_v2 = vadd.s32 368, %v4120_v7 }
  0x4a   :  { %v2393_v43 = vsub.f32 %v4364_v28, %v2329_v47  ;;  %v2203_v28 = vmul.f32 %v4430_v16, %v4136_v21  ;;  %v2204_v30 = vmul.f32 %v4463_v44, %v4136_v21  ;;  %v4495_v47 = vadd.s32 120, %v4120_v7 }
  0x4b   :  { %v2235_v11 = vmul.f32 %v2043_v37, %v4136_v21  ;;  %v2426_v26 = vsub.f32 %v2042_v51, %v2362_v10  ;;  %v2107_v35 = vmul.f32 16.0, %v2043_v37  ;;  %v2076_v57 = vmul.f32 16.0, %v4463_v44 }
  0x4c   :  { %v2458_v4 = vsel %vm2448_vm2, %v2137_v15, %v2393_v43  ;;  %v2268_v5 = vfloor.f32 %v2204_v30  ;;  %v3798_v43 = vld [vmem:[%s7059_s0 + $0x38] sm:$0xff]  ;;  %v1881_v53 = vcvt.s32.f32 %v4507_v12 }
  0x4d   :  { %v2299_v22 = vfloor.f32 %v2235_v11  ;;  %v2171_v17 = vsub.f32 %v1908_v58, %v2107_v35  ;;  %v2140_v29 = vsub.f32 %v1877_v18, %v2076_v57  ;;  %v4542_v35 = vadd.s32 376, %v4120_v7 }
  0x4e   :  { %3733 = vmatmul.msk.f32.gmra.mxu1 %vm2513_vm3, %v2455_v19  ;;  %v1909_v19 = vcvt.s32.f32 %v4424_v13  ;;  %v1880_v13 = vcvt.s32.f32 %v4495_v47 }
  0x4f   :  { %3766 = vmatmul.msk.f32.gmra.mxu3 %vm2513_vm3, %v2488_v24  ;;  %v2170_v24 = vsub.f32 %v1907_v36, %v2106_v9  ;;  %v2363_v38 = vmul.f32 16.0, %v2299_v22  ;;  %v4451_v36 = vadd.s32 104, %v4120_v7  ;;  %v1912_v42 = vcvt.s32.f32 %v4542_v35 }
  0x50   :  { %v1980_v27 = vmul.f32 %v4136_v21, %v1909_v19  ;;  %v1951_v0 = vmul.f32 %v4136_v21, %v1880_v13  ;;  %v4662_v35 = vadd.s32 152, %v4120_v7 }
  0x51   :  { %v2491_v40 = vsel %vm2448_vm2, %v2170_v24, %v2426_v26  ;;  %v2427_v34 = vsub.f32 %v2043_v37, %v2363_v38  ;;  %v1878_v49 = vcvt.s32.f32 %v4451_v36  ;;  %v1950_v37 = vmul.f32 %v4136_v21, %v1879_v54 }
  0x52   :  { %v2044_v32 = vfloor.f32 %v1980_v27  ;;  %v4556_v46 = vfloor.f32 %v1951_v0 }
  0x53   :  { %v2492_v58 = vsel %vm2448_vm2, %v2171_v17, %v2427_v34  ;;  %v1949_v60 = vmul.f32 %v4136_v21, %v1878_v49  ;;  %v4517_v22 = vfloor.f32 %v1950_v37  ;;  %v1983_v17 = vmul.f32 %v4136_v21, %v1912_v42 }
  0x54   :  { %v2108_v61 = vmul.f32 16.0, %v2044_v32  ;;  %v2079_v57 = vmul.f32 16.0, %v4556_v46 }
  0x55   :  { %3636 = vmatmul.msk.bf16.gmra.mxu0 %vm250_vm0, %v3796_v23  ;;  %3652 = vmatmul.msk.bf16.gmra.mxu2 %vm250_vm0, %v3812_v20  ;;  %v2267_v23 = vfloor.f32 %v2203_v28  ;;  %v1910_v20 = vcvt.s32.f32 %v4456_v41  ;;  %v1952_v41 = vmul.f32 %v4136_v21, %v1881_v53 }
  0x56   :  { %3734 = vmatmul.msk.f32.gmra.mxu1 %vm2513_vm3, %v2456_v62  ;;  %v2236_v62 = vmul.f32 %v2044_v32, %v4136_v21 }
  0x57   :  { %3767 = vmatmul.msk.f32.gmra.mxu3 %vm2513_vm3, %v2489_v52  ;;  %v1981_v51 = vmul.f32 %v4136_v21, %v1910_v20  ;;  %v2075_v52 = vmul.f32 16.0, %v4430_v16  ;;  %v2331_v14 = vmul.f32 16.0, %v2267_v23 }
  0x58   :  { %v2300_v50 = vfloor.f32 %v2236_v62  ;;  %v4553_v62 = vadd.s32 136, %v4120_v7 }
  0x59   :  { %v4478_v55 = vfloor.f32 %v1981_v51  ;;  %v2139_v39 = vsub.f32 %v1876_v59, %v2075_v52  ;;  %v2395_v3 = vsub.f32 %v4430_v16, %v2331_v14  ;;  %v2172_v59 = vsub.f32 %v1909_v19, %v2108_v61  ;;  %v3814_v19 = vld [vmem:[%s7059_s0 + $0xb8] sm:$0xff] }
  0x5a   :  { %v2364_v63 = vmul.f32 16.0, %v2300_v50  ;;  %v2332_v16 = vmul.f32 16.0, %v2268_v5  ;;  %v1882_v34 = vcvt.s32.f32 %v4553_v62  ;;  %v4570_v14 = vfloor.f32 %v1952_v41 }
  0x5b   :  { %v2237_v1 = vmul.f32 %v4478_v55, %v4136_v21  ;;  %v2460_v15 = vsel %vm2448_vm2, %v2139_v39, %v2395_v3  ;;  %v2109_v26 = vmul.f32 16.0, %v4478_v55  ;;  %v4591_v3 = vadd.s32 384, %v4120_v7 }
  0x5c   :  { %v2428_v9 = vsub.f32 %v2044_v32, %v2364_v63  ;;  %v2396_v38 = vsub.f32 %v4463_v44, %v2332_v16  ;;  %v4561_v44 = vld [vmem:[%s7060_s2] sm:$0xff]  ;;  %v2207_v63 = vmul.f32 %v4556_v46, %v4136_v21  ;;  %v2080_v41 = vmul.f32 16.0, %v4570_v14 }
  0x5d   :  { %v2301_v10 = vfloor.f32 %v2237_v1  ;;  %v2078_v1 = vmul.f32 16.0, %v4517_v22 }
  0x5e   :  { %3735 = vmatmul.msk.f32.gmra.mxu1 %vm2513_vm3, %v2457_v6  ;;  %v1911_v6 = vcvt.s32.f32 %v4490_v2  ;;  %v2461_v50 = vsel %vm2448_vm2, %v2140_v29, %v2396_v38 }
  0x5f   :  { %3768 = vmatmul.msk.f32.gmra.mxu3 %vm2513_vm3, %v2490_v8  ;;  %v4504_v8 = vfloor.f32 %v1949_v60  ;;  %v4580_v60 = vperm.slane %v4561_v44, 0 }
  0x60   :  { %v1982_v11 = vmul.f32 %v4136_v21, %v1911_v6 }
  0x61   :  { %v2205_v24 = vmul.f32 %v4504_v8, %v4136_v21  ;;  %v2077_v23 = vmul.f32 16.0, %v4504_v8 }
  0x62   :  { %v4525_v27 = vfloor.f32 %v1982_v11  ;;  %v4602_v11 = vadd.s32 144, %v4120_v7 }
  0x63   :  { %v2269_v32 = vfloor.f32 %v2205_v24  ;;  %v2141_v61 = vsub.f32 %v1878_v49, %v2077_v23  ;;  %v2208_v49 = vmul.f32 %v4570_v14, %v4136_v21 }
  0x64   :  { %v2238_v28 = vmul.f32 %v4525_v27, %v4136_v21  ;;  %v2110_v52 = vmul.f32 16.0, %v4525_v27 }
  0x65   :  { %3637 = vmatmul.msk.bf16.gmra.mxu0 %vm250_vm0, %v3797_v48  ;;  %3653 = vmatmul.msk.bf16.gmra.mxu2 %vm250_vm0, %v3813_v31  ;;  %v2365_v48 = vmul.f32 16.0, %v2301_v10  ;;  %v2206_v31 = vmul.f32 %v4517_v22, %v4136_v21  ;;  %v2333_v51 = vmul.f32 16.0, %v2269_v32  ;;  %v1913_v10 = vcvt.s32.f32 %v4591_v3 }
  0x66   :  { %3736 = vmatmul.msk.f32.gmra.mxu1 %vm2513_vm3, %v2458_v4  ;;  %v2493_v4 = vsel %vm2448_vm2, %v2172_v59, %v2428_v9  ;;  %v2302_v18 = vfloor.f32 %v2238_v28  ;;  %v2174_v36 = vsub.f32 %v1911_v6, %v2110_v52  ;;  %v2142_v6 = vsub.f32 %v1879_v54, %v2078_v1 }
  0x67   :  { %3769 = vmatmul.msk.f32.gmra.mxu3 %vm2513_vm3, %v2491_v40  ;;  %v2173_v40 = vsub.f32 %v1910_v20, %v2109_v26  ;;  %v2429_v25 = vsub.f32 %v4478_v55, %v2365_v48  ;;  %v2270_v20 = vfloor.f32 %v2206_v31  ;;  %v2397_v5 = vsub.f32 %v4504_v8, %v2333_v51  ;;  %v3799_v8 = vld [vmem:[%s7059_s0 + $0x40] sm:$0xff] }
  0x68   :  { %v2366_v55 = vmul.f32 16.0, %v2302_v18  ;;  %v1984_v16 = vmul.f32 %v4136_v21, %v1913_v10  ;;  %v3815_v26 = vld [vmem:[%s7059_s0 + $0xc0] sm:$0xff]  ;;  %v1883_v54 = vcvt.s32.f32 %v4602_v11  ;;  %v4704_v3 = vperm.slane %v4561_v44, 1 }
  0x69   :  { %v2494_v30 = vsel %vm2448_vm2, %v2173_v40, %v2429_v25  ;;  %v2334_v2 = vmul.f32 16.0, %v2270_v20  ;;  %v2462_v24 = vsel %vm2448_vm2, %v2141_v61, %v2397_v5  ;;  %v2143_v40 = vsub.f32 %v1880_v13, %v2079_v57 }
  0x6a   :  { %v2430_v59 = vsub.f32 %v4525_v27, %v2366_v55  ;;  %v2272_v27 = vfloor.f32 %v2208_v49  ;;  %v4628_v29 = vfloor.f32 %v1984_v16  ;;  %v1954_v31 = vmul.f32 %v4136_v21, %v1883_v54 }
  0x6b   :  { %v4648_v20 = vadd.s32 392, %v4120_v7  ;;  %v2144_v61 = vsub.f32 %v1881_v53, %v2080_v41 }
  0x6c   :  { %v2240_v18 = vmul.f32 %v4628_v29, %v4136_v21  ;;  %v4645_v23 = vfloor.f32 %v1954_v31  ;;  %v3816_v31 = vld [vmem:[%s7059_s0 + $0xc8] sm:$0xff] }
  0x6d   :  { %v1914_v55 = vcvt.s32.f32 %v4648_v20 }
  0x6e   :  { %3737 = vmatmul.msk.f32.gmra.mxu1 %vm2513_vm3, %v2459_v56  ;;  %v4574_v56 = vfloor.f32 %v1983_v17  ;;  %v2336_v17 = vmul.f32 16.0, %v2272_v27  ;;  %v2304_v52 = vfloor.f32 %v2240_v18 }
  0x6f   :  { %3770 = vmatmul.msk.f32.gmra.mxu3 %vm2513_vm3, %v2492_v58  ;;  %v1953_v58 = vmul.f32 %v4136_v21, %v1882_v34 }
  0x70   :  { %v2239_v39 = vmul.f32 %v4574_v56, %v4136_v21  ;;  %v2111_v48 = vmul.f32 16.0, %v4574_v56  ;;  %v2368_v1 = vmul.f32 16.0, %v2304_v52  ;;  %v2400_v12 = vsub.f32 %v4570_v14, %v2336_v17 }
  0x71   :  { %v4597_v37 = vfloor.f32 %v1953_v58 }
  0x72   :  { %v2303_v9 = vfloor.f32 %v2239_v39  ;;  %v2175_v47 = vsub.f32 %v1912_v42, %v2111_v48 }
  0x73   :  { %v2209_v45 = vmul.f32 %v4597_v37, %v4136_v21 }
  0x74   :  { %v2367_v0 = vmul.f32 16.0, %v2303_v9 }
  0x75   :  { %3638 = vmatmul.msk.bf16.gmra.mxu0 %vm250_vm0, %v3798_v43  ;;  %3654 = vmatmul.msk.bf16.gmra.mxu2 %vm250_vm0, %v3814_v19  ;;  %v2398_v43 = vsub.f32 %v4517_v22, %v2334_v2  ;;  %v2273_v25 = vfloor.f32 %v2209_v45  ;;  %v1985_v2 = vmul.f32 %v4136_v21, %v1914_v55  ;;  %v3800_v45 = vld [vmem:[%s7059_s0 + $0x48] sm:$0xff] }
  0x76   :  { %3738 = vmatmul.msk.f32.gmra.mxu1 %vm2513_vm3, %v2460_v15  ;;  %v2271_v15 = vfloor.f32 %v2207_v63  ;;  %v2431_v13 = vsub.f32 %v4574_v56, %v2367_v0  ;;  %v2081_v63 = vmul.f32 16.0, %v4597_v37 }
  0x77   :  { %3771 = vmatmul.msk.f32.gmra.mxu3 %vm2513_vm3, %v2493_v4  ;;  %v2495_v4 = vsel %vm2448_vm2, %v2174_v36, %v2430_v59  ;;  %v2463_v32 = vsel %vm2448_vm2, %v2142_v6, %v2398_v43  ;;  %v2337_v56 = vmul.f32 16.0, %v2273_v25  ;;  %v4675_v36 = vperm.slane %v4561_v44, 3 }
  0x78   :  { %v2335_v28 = vmul.f32 16.0, %v2271_v15  ;;  %v2496_v53 = vsel %vm2448_vm2, %v2175_v47, %v2431_v13  ;;  %v4679_v9 = vfloor.f32 %v1985_v2  ;;  %v2145_v14 = vsub.f32 %v1882_v34, %v2081_v63 }
  0x79   :  { %v1884_v6 = vcvt.s32.f32 %v4662_v35  ;;  %v2401_v57 = vsub.f32 %v4597_v37, %v2337_v56 }
  0x7a   :  { %v2399_v51 = vsub.f32 %v4556_v46, %v2335_v28  ;;  %v2112_v46 = vmul.f32 16.0, %v4628_v29  ;;  %v2241_v62 = vmul.f32 %v4679_v9, %v4136_v21  ;;  %v2113_v18 = vmul.f32 16.0, %v4679_v9 }
  0x7b   :  { %v1955_v34 = vmul.f32 %v4136_v21, %v1884_v6 }
  0x7c   :  { %v2464_v49 = vsel %vm2448_vm2, %v2143_v40, %v2399_v51  ;;  %v2176_v16 = vsub.f32 %v1913_v10, %v2112_v46  ;;  %v2082_v10 = vmul.f32 16.0, %v4645_v23  ;;  %v2305_v48 = vfloor.f32 %v2241_v62 }
  0x7d   :  { %v4714_v0 = vfloor.f32 %v1955_v34 }
  0x7e   :  { %3739 = vmatmul.msk.f32.gmra.mxu1 %vm2513_vm3, %v2461_v50  ;;  %v2369_v17 = vmul.f32 16.0, %v2305_v48 }
  0x7f   :  { %3772 = vmatmul.msk.f32.gmra.mxu3 %vm2513_vm3, %v2494_v30  ;;  %v2210_v30 = vmul.f32 %v4645_v23, %v4136_v21 }
  0x80   :  { %v2433_v56 = vsub.f32 %v4679_v9, %v2369_v17 }
  0x81   :  { %v2274_v59 = vfloor.f32 %v2210_v30 }
  0x82   :  { %v356_v19 = vpop.f32.mrf.mxu0 }
  0x83   :  { %v4623_v22 = vadd.f32 %v356_v19, %v4580_v60  ;;  %v2432_v19 = vsub.f32 %v4628_v29, %v2368_v1 }
  0x85   :  { %v3663_v38 = vmul.f32 -1.442695, %v4623_v22  ;;  %3639 = vmatmul.msk.bf16.gmra.mxu0 %vm250_vm0, %v3799_v8  ;;  %3655 = vmatmul.msk.bf16.gmra.mxu2 %vm250_vm0, %v3815_v26  ;;  %v2338_v26 = vmul.f32 16.0, %v2274_v59  ;;  %v4718_v28 = vmul.f32 %v4675_v36, %v4623_v22  ;;  %v2497_v40 = vsel %vm2448_vm2, %v2176_v16, %v2432_v19 }
  0x86   :  { %3740 = vmatmul.msk.f32.gmra.mxu1 %vm2513_vm3, %v2462_v24  ;;  %v4695_v24 = vsel %vm2448_vm2, %v2144_v61, %v2400_v12 }
  0x87   :  { %3773 = vmatmul.msk.f32.gmra.mxu3 %vm2513_vm3, %v2495_v4  ;;  %3829 = vpow2.f32 %v3663_v38  ;;  %v4712_v4 = vperm.slane %v4561_v44, 2  ;;  %v4724_v38 = vperm.slane %v4561_v44, 4  ;;  %v2146_v44 = vsub.f32 %v1883_v54, %v2082_v10 }
  0x88   :  { %v436_v50 = vpop.f32.mrf.mxu2  ;;  %v2402_v13 = vsub.f32 %v4645_v23, %v2338_v26 }
  0x89   :  { %v437_v58 = vadd.f32 %v436_v50, %v4580_v60  ;;  %v2211_v50 = vmul.f32 %v4714_v0, %v4136_v21 }
  0x8a   :  { %v358_v42 = vpop.f32.mrf.mxu0  ;;  %v4765_v2 = vsel %vm2448_vm2, %v2146_v44, %v2402_v13  ;;  %v3801_v44 = vld [vmem:[%s7059_s0 + $0x50] sm:$0xff] }
  0x8b   :  { %v3695_v39 = vmul.f32 -1.442695, %v437_v58  ;;  %v4669_v5 = vadd.f32 %v358_v42, %v4580_v60  ;;  %v4742_v52 = vmul.f32 %v4675_v36, %v437_v58  ;;  %v2275_v23 = vfloor.f32 %v2211_v50 }
  0x8c   :  { %v2177_v42 = vsub.f32 %v1914_v55, %v2113_v18  ;;  %v2083_v55 = vmul.f32 16.0, %v4714_v0 }
  0x8d   :  { %v3830_v15 = vpop.eup %3829  ;;  %3831 = vpow2.f32 %v3695_v39  ;;  %v3664_v8 = vmul.f32 -1.442695, %v4669_v5  ;;  %7065 = vst [vmem:[#allocation3_spill] sm:$0xff] %v4742_v52  ;;  %v4760_v46 = vmul.f32 %v4675_v36, %v4669_v5  ;;  %v2339_v59 = vmul.f32 16.0, %v2275_v23 }
  0x8e   :  { %3741 = vmatmul.msk.f32.gmra.mxu1 %vm2513_vm3, %v2463_v32  ;;  %v4686_v43 = vadd.f32 1.0, %v3830_v15  ;;  %v4728_v32 = vsel %vm2448_vm2, %v2145_v14, %v2401_v57  ;;  %v2498_v57 = vsel %vm2448_vm2, %v2177_v42, %v2433_v56 }
  0x8f   :  { %3774 = vmatmul.msk.f32.gmra.mxu3 %vm2513_vm3, %v2496_v53  ;;  %3833 = vpow2.f32 %v3664_v8 }
  0x90   :  { %3835 = vrcp.f32 %v4686_v43  ;;  %v438_v37 = vpop.f32.mrf.mxu2  ;;  %v781_v61 = vand.u32 2147483647, %v4686_v43  ;;  %v783_v54 = vand.u32 2147483648, %v4686_v43  ;;  %vm777_vm4 = vweird.f32 %v4686_v43 }
  0x91   :  { %v439_v27 = vadd.f32 %v438_v37, %v4580_v60 }
  0x92   :  { %v361_v29 = vpop.f32.mrf.mxu0  ;;  %vm4768_vm5 = vcmp.eq.f32.partialorder %v781_v61, 8.507059e+37  ;;  %v784_v5 = vor.u32 1.1754944e-38, %v783_v54  ;;  %v3817_v61 = vld [vmem:[%s7059_s0 + $0xd0] sm:$0xff] }
  0x93   :  { %v3832_v41 = vpop.eup %3831  ;;  %v3696_v25 = vmul.f32 -1.442695, %v439_v27  ;;  %v362_v22 = vadd.f32 %v361_v29, %v4580_v60  ;;  %v4774_v53 = vmul.f32 %v4675_v36, %v439_v27 }
  0x94   :  { %v4734_v47 = vadd.f32 1.0, %v3832_v41 }
  0x95   :  { %v3834_v51 = vpop.eup %3833  ;;  %3837 = vpow2.f32 %v3696_v25  ;;  %v3665_v30 = vmul.f32 -1.442695, %v362_v22  ;;  %3640 = vmatmul.msk.bf16.gmra.mxu0 %vm250_vm0, %v3800_v45  ;;  %3656 = vmatmul.msk.bf16.gmra.mxu2 %vm250_vm0, %v3816_v31  ;;  %v4784_v62 = vmul.f32 %v4675_v36, %v362_v22  ;;  %v2147_v45 = vsub.f32 %v1884_v6, %v2083_v55 }
  0x96   :  { %7064 = vst [vmem:[#allocation2_spill] sm:$0xff] %v4734_v47  ;;  %3742 = vmatmul.msk.f32.gmra.mxu1 %vm2513_vm3, %v2464_v49  ;;  %v3836_v63 = vpop.eup %3835  ;;  %3839 = vrcp.f32 %v4734_v47  ;;  %v4748_v11 = vadd.f32 1.0, %v3834_v51 }
  0x97   :  { %3775 = vmatmul.msk.f32.gmra.mxu3 %vm2513_vm3, %v2497_v40  ;;  %v773_v58 = vmul.f32 %v3836_v63, %v4686_v43  ;;  %3841 = vpow2.f32 %v3665_v30  ;;  %vm778_vm6 = vweird.f32 %v3836_v63 }
  0x98   :  { %3843 = vrcp.f32 %v4748_v11  ;;  %v441_v1 = vpop.f32.mrf.mxu2  ;;  %v796_v34 = vand.u32 2147483647, %v4748_v11  ;;  %v798_v37 = vand.u32 2147483648, %v4748_v11  ;;  %vm779_vm7 = vmor %vm777_vm4, %vm778_vm6  ;;  %vm792_vm8 = vweird.f32 %v4748_v11 }
  0x99   :  { %v774_v39 = vsub.f32 1.0, %v773_v58  ;;  %v442_v12 = vadd.f32 %v441_v1, %v4580_v60 }
  0x9a   :  { %v363_v49 = vpop.f32.mrf.mxu0  ;;  %vm4809_vm9 = vcmp.eq.f32.partialorder %v796_v34, 8.507059e+37  ;;  %v799_v43 = vor.u32 1.1754944e-38, %v798_v37 }
  0x9b   :  { %v3838_v9 = vpop.eup %3837  ;;  %v3697_v15 = vmul.f32 -1.442695, %v442_v12  ;;  %v775_v8 = vmul.f32 %v3836_v63, %v774_v39  ;;  %v364_v14 = vadd.f32 %v363_v49, %v4580_v60  ;;  %v2723_v50 = vpop.f32.mrf.mxu1 }
  0x9c   :  { %v4779_v16 = vpop.eup %3839  ;;  %v4781_v19 = vadd.f32 1.0, %v3838_v9 }
  0x9d   :  { %v3842_v10 = vpop.eup %3841  ;;  %3845 = vpow2.f32 %v3697_v15  ;;  %v776_v26 = vadd.f32 %v3836_v63, %v775_v8  ;;  %v3666_v27 = vmul.f32 -1.442695, %v364_v14  ;;  %v4794_v29 = vmul.f32 %v4779_v16, %v4734_v47 }
  0x9e   :  { %3743 = vmatmul.msk.f32.gmra.mxu1 %vm2513_vm3, %v4695_v24  ;;  %v3844_v48 = vpop.eup %3843  ;;  %3847 = vrcp.f32 %v4781_v19  ;;  %v4797_v31 = vadd.f32 1.0, %v3842_v10  ;;  %v2403_v24 = vsub.f32 %v4714_v0, %v2339_v59  ;;  %v4814_v0 = vmul.f32 %v4675_v36, %v442_v12 }
  0x9f   :  { %3776 = vmatmul.msk.f32.gmra.mxu3 %vm2513_vm3, %v2498_v57  ;;  %v788_v35 = vmul.f32 %v3844_v48, %v4748_v11  ;;  %v780_v6 = vsel %vm779_vm7, %v3836_v63, %v776_v26  ;;  %3849 = vpow2.f32 %v3666_v27  ;;  %v4822_v51 = vmul.f32 %v4675_v36, %v364_v14 }
  0xa0   :  { %3851 = vrcp.f32 %v4797_v31  ;;  %v785_v40 = vsel %vm4768_vm5, %v784_v5, %v780_v6  ;;  %v443_v41 = vpop.f32.mrf.mxu2  ;;  %vm793_vm10 = vweird.f32 %v3844_v48  ;;  %v4829_v63 = vsel %vm2448_vm2, %v2147_v45, %v2403_v24 }
  0xa1   :  { %v789_v22 = vsub.f32 1.0, %v788_v35  ;;  %v2980_v18 = vmul.f32 %v785_v40, %v785_v40  ;;  %v444_v17 = vadd.f32 %v443_v41, %v4580_v60  ;;  %v2916_v23 = vmul.f32 %v4704_v3, %v785_v40  ;;  %vm794_vm12 = vmor %vm792_vm8, %vm793_vm10 }
  0xa2   :  { %v366_v30 = vpop.f32.mrf.mxu0  ;;  %vm807_vm11 = vweird.f32 %v4797_v31  ;;  %v811_v20 = vand.u32 2147483647, %v4797_v31  ;;  %v813_v55 = vand.u32 2147483648, %v4797_v31  ;;  %v1276_v57 = vand.u32 2147483647, %v4781_v19 }
  0xa3   :  { %v3846_v54 = vpop.eup %3845  ;;  %v3045_v58 = vmul.f32 %v4712_v4, %v2980_v18  ;;  %v3698_v42 = vmul.f32 -1.442695, %v444_v17  ;;  %v790_v56 = vmul.f32 %v3844_v48, %v789_v22  ;;  %v367_v12 = vadd.f32 %v366_v30, %v4580_v60 }
  0xa4   :  { %v4833_v1 = vpop.eup %3847  ;;  %v4835_v39 = vadd.f32 1.0, %v3846_v54  ;;  %v4860_v37 = vmul.f32 %v4675_v36, %v444_v17  ;;  %vm4865_vm13 = vcmp.eq.f32.partialorder %v811_v20, 8.507059e+37  ;;  %v814_v27 = vor.u32 1.1754944e-38, %v813_v55 }
  0xa5   :  { %v3850_v5 = vpop.eup %3849  ;;  %v1268_v49 = vmul.f32 %v4833_v1, %v4781_v19  ;;  %v3109_v59 = vadd.f32 %v3045_v58, %v2916_v23  ;;  %3853 = vpow2.f32 %v3698_v42  ;;  %v791_v9 = vadd.f32 %v3844_v48, %v790_v56  ;;  %3641 = vmatmul.msk.bf16.gmra.mxu0 %vm250_vm0, %v3801_v44  ;;  %3657 = vmatmul.msk.bf16.gmra.mxu2 %vm250_vm0, %v3817_v61  ;;  %v2726_v61 = vpop.f32.mrf.mxu1 }
  0xa6   :  { %3744 = vmatmul.msk.f32.gmra.mxu1 %vm2513_vm3, %v4728_v32  ;;  %v4846_v15 = vpop.eup %3851  ;;  %3855 = vrcp.f32 %v4835_v39  ;;  %v4849_v8 = vadd.f32 1.0, %v3850_v5  ;;  %v3667_v14 = vmul.f32 -1.442695, %v367_v12  ;;  %v4881_v54 = vmul.f32 %v4675_v36, %v367_v12 }
  0xa7   :  { %v803_v32 = vmul.f32 %v4846_v15, %v4797_v31  ;;  %v3238_v34 = vadd.f32 %v4718_v28, %v3109_v59  ;;  %v795_v10 = vsel %vm794_vm12, %v3844_v48, %v791_v9  ;;  %v1269_v45 = vsub.f32 1.0, %v1268_v49 }
  0xa8   :  { %3857 = vrcp.f32 %v4849_v8  ;;  %v800_v11 = vsel %vm4809_vm9, %v799_v43, %v795_v10  ;;  %v446_v40 = vpop.f32.mrf.mxu2  ;;  %v826_v22 = vand.u32 2147483647, %v4849_v8  ;;  %vm808_vm14 = vweird.f32 %v4846_v15 }
  0xa9   :  { %v804_v24 = vsub.f32 1.0, %v803_v32  ;;  %v3302_v35 = vadd.f32 %v3238_v34, %v2723_v50  ;;  %v2981_v6 = vmul.f32 %v800_v11, %v800_v11  ;;  %v2917_v28 = vmul.f32 %v4704_v3, %v800_v11  ;;  %vm809_vm4 = vmor %vm807_vm11, %vm808_vm14 }
  0xaa   :  { %3859 = vpow2.f32 %v3667_v14  ;;  %v447_v48 = vadd.f32 %v446_v40, %v4580_v60  ;;  %v368_v41 = vpop.f32.mrf.mxu0  ;;  %vm1272_vm15 = vweird.f32 %v4781_v19  ;;  %vm822_vm1 = vweird.f32 %v4849_v8  ;;  %v3818_v40 = vld [vmem:[%s7059_s0 + $0xd8] sm:$0xff] }
  0xab   :  { %v3854_v25 = vpop.eup %3853  ;;  %v3367_v43 = vadd.f32 %v4724_v38, %v3302_v35  ;;  %v3046_v18 = vmul.f32 %v4712_v4, %v2981_v6  ;;  %v805_v17 = vmul.f32 %v4846_v15, %v804_v24  ;;  %v369_v44 = vadd.f32 %v368_v41, %v4580_v60 }
  0xac   :  { %v4876_v50 = vpop.eup %3855  ;;  %v4878_v30 = vadd.f32 1.0, %v3854_v25  ;;  %v3699_v23 = vmul.f32 -1.442695, %v447_v48  ;;  %v4894_v20 = vmul.f32 %v4675_v36, %v447_v48  ;;  %v828_v55 = vand.u32 2147483648, %v4849_v8 }
  0xad   :  { %3431 = vst [vmem:[%s7061_s3] sm:$0xff] %v3367_v43  ;;  %v3110_v58 = vadd.f32 %v3046_v18, %v2917_v28  ;;  %v806_v42 = vadd.f32 %v4846_v15, %v805_v17  ;;  %v3668_v56 = vmul.f32 -1.442695, %v369_v44  ;;  %v1270_v5 = vmul.f32 %v4833_v1, %v1269_v45 }
  0xae   :  { %3745 = vmatmul.msk.f32.gmra.mxu1 %vm2513_vm3, %v4765_v2  ;;  %v3858_v12 = vpop.eup %3857  ;;  %3861 = vrcp.f32 %v4878_v30  ;;  %v4900_v49 = vmul.f32 %v4876_v50, %v4835_v39  ;;  %vm4908_vm5 = vcmp.eq.f32.partialorder %v826_v22, 8.507059e+37  ;;  %v4914_v34 = vmul.f32 %v4675_v36, %v369_v44 }
  0xaf   :  { %v818_v59 = vmul.f32 %v3858_v12, %v4849_v8  ;;  %v3239_v2 = vadd.f32 %v4760_v46, %v3110_v58  ;;  %3863 = vpow2.f32 %v3699_v23  ;;  %v810_v32 = vsel %vm809_vm4, %v4846_v15, %v806_v42  ;;  %v3802_v15 = vld [vmem:[%s7059_s0 + $0x58] sm:$0xff] }
  0xb0   :  { %v3860_v14 = vpop.eup %3859  ;;  %3865 = vpow2.f32 %v3668_v56  ;;  %vm823_vm6 = vweird.f32 %v3858_v12  ;;  %v815_v31 = vsel %vm4865_vm13, %v814_v27, %v810_v32  ;;  %v448_v45 = vpop.f32.mrf.mxu2  ;;  %v1271_v28 = vadd.f32 %v4833_v1, %v1270_v5 }
  0xb1   :  { %v819_v10 = vsub.f32 1.0, %v818_v59  ;;  %v3303_v46 = vadd.f32 %v3239_v2, %v2726_v61  ;;  %v4916_v11 = vadd.f32 1.0, %v3860_v14  ;;  %v2982_v24 = vmul.f32 %v815_v31, %v815_v31  ;;  %v2729_v5 = vpop.f32.mrf.mxu1  ;;  %vm824_vm9 = vmor %vm822_vm1, %vm823_vm6 }
  0xb2   :  { %v449_v35 = vadd.f32 %v448_v45, %v4580_v60  ;;  %v371_v6 = vpop.f32.mrf.mxu0  ;;  %vm1273_vm7 = vweird.f32 %v4833_v1  ;;  %v2918_v22 = vmul.f32 %v4704_v3, %v815_v31  ;;  %v829_v18 = vor.u32 1.1754944e-38, %v828_v55 }
  0xb3   :  { %v3368_v26 = vadd.f32 %v4724_v38, %v3303_v46  ;;  %3867 = vrcp.f32 %v4916_v11  ;;  %v820_v27 = vmul.f32 %v3858_v12, %v819_v10  ;;  %v372_v48 = vadd.f32 %v371_v6, %v4580_v60  ;;  %vm4949_vm8 = vmor %vm1272_vm15, %vm1273_vm7 }
  0xb4   :  { %v4932_v41 = vpop.eup %3861  ;;  %v3047_v25 = vmul.f32 %v4712_v4, %v2982_v24  ;;  %v3700_v43 = vmul.f32 -1.442695, %v449_v35  ;;  %v1284_v44 = vsub.f32 1.0, %v4900_v49  ;;  %v4941_v61 = vmul.f32 %v4675_v36, %v449_v35 }
  0xb5   :  { %v3864_v17 = vpop.eup %3863  ;;  %3432 = vst [vmem:[%s7061_s3 + $0x8] sm:$0xff] %v3368_v26  ;;  %v821_v23 = vadd.f32 %v3858_v12, %v820_v27  ;;  %v3669_v58 = vmul.f32 -1.442695, %v372_v48  ;;  %3642 = vmatmul.msk.bf16.gmra.mxu0 %vm250_vm0, %v3802_v15  ;;  %3658 = vmatmul.msk.bf16.gmra.mxu2 %vm250_vm0, %v3818_v40  ;;  %v4965_v2 = vmul.f32 %v4932_v41, %v4878_v30  ;;  %v1278_v46 = vand.u32 2147483648, %v4781_v19 }
  0xb6   :  { %3746 = vmatmul.msk.f32.gmra.mxu1 %vm2513_vm3, %v4829_v63  ;;  %v3866_v56 = vpop.eup %3865  ;;  %v4953_v55 = vadd.f32 1.0, %v3864_v17  ;;  %v3111_v59 = vadd.f32 %v3047_v25, %v2918_v22  ;;  %3869 = vpow2.f32 %v3700_v43  ;;  %v1275_v63 = vsel %vm4949_vm8, %v4833_v1, %v1271_v28 }
  0xb7   :  { %v4967_v14 = vadd.f32 1.0, %v3866_v56  ;;  %v825_v32 = vsel %vm824_vm9, %v3858_v12, %v821_v23  ;;  %3871 = vpow2.f32 %v3669_v58  ;;  %v4976_v45 = vmul.f32 %v4675_v36, %v372_v48 }
  0xb8   :  { %3873 = vrcp.f32 %v4953_v55  ;;  %v3240_v8 = vadd.f32 %v4784_v62, %v3111_v59  ;;  %v830_v10 = vsel %vm4908_vm5, %v829_v18, %v825_v32  ;;  %vm1277_vm10 = vcmp.eq.f32.partialorder %v1276_v57, 8.507059e+37  ;;  %v451_v12 = vpop.f32.mrf.mxu2 }
  0xb9   :  { %v3868_v31 = vpop.eup %3867  ;;  %3875 = vrcp.f32 %v4967_v14  ;;  %v2983_v1 = vmul.f32 %v830_v10, %v830_v10  ;;  %v1279_v62 = vor.u32 1.1754944e-38, %v1278_v46  ;;  %v452_v9 = vadd.f32 %v451_v12, %v4580_v60  ;;  %v2732_v46 = vpop.f32.mrf.mxu1 }
  0xba   :  { %v833_v24 = vmul.f32 %v3868_v31, %v4916_v11  ;;  %v3304_v35 = vadd.f32 %v3240_v8, %v2729_v5  ;;  %v2919_v6 = vmul.f32 %v4704_v3, %v830_v10  ;;  %vm837_vm11 = vweird.f32 %v4916_v11  ;;  %v373_v32 = vpop.f32.mrf.mxu0 }
  0xbb   :  { %v3048_v15 = vmul.f32 %v4712_v4, %v2983_v1  ;;  %vm838_vm12 = vweird.f32 %v3868_v31  ;;  %v1280_v19 = vsel %vm1277_vm10, %v1279_v62, %v1275_v63  ;;  %v3701_v57 = vmul.f32 -1.442695, %v452_v9 }
  0xbc   :  { %v3870_v40 = vpop.eup %3869  ;;  %v834_v28 = vsub.f32 1.0, %v833_v24  ;;  %v3369_v26 = vadd.f32 %v4724_v38, %v3304_v35  ;;  %v3013_v25 = vmul.f32 %v1280_v19, %v1280_v19  ;;  %v843_v43 = vand.u32 2147483648, %v4916_v11  ;;  %vm839_vm13 = vmor %vm837_vm11, %vm838_vm12  ;;  %v2822_v35 = vpop.f32.mrf.mxu3 }
  0xbd   :  { %v3872_v27 = vpop.eup %3871  ;;  %v4986_v48 = vadd.f32 1.0, %v3870_v40  ;;  %v3112_v22 = vadd.f32 %v3048_v15, %v2919_v6  ;;  %3877 = vpow2.f32 %v3701_v57  ;;  %v841_v58 = vand.u32 2147483647, %v4916_v11 }
  0xbe   :  { %v4989_v18 = vpop.eup %3873  ;;  %3433 = vst [vmem:[%s7061_s3 + $0x10] sm:$0xff] %v3369_v26  ;;  %v4994_v17 = vadd.f32 1.0, %v3872_v27  ;;  %v835_v23 = vmul.f32 %v3868_v31, %v834_v28  ;;  %v2949_v59 = vmul.f32 %v4704_v3, %v1280_v19  ;;  %v3078_v63 = vmul.f32 %v4712_v4, %v3013_v25 }
  0xbf   :  { %v4997_v42 = vpop.eup %3875  ;;  %v3241_v5 = vadd.f32 %v4822_v51, %v3112_v22  ;;  %v5005_v8 = vmul.f32 %v4989_v18, %v4953_v55  ;;  %3879 = vrcp.f32 %v4986_v48  ;;  %v844_v24 = vor.u32 1.1754944e-38, %v843_v43 }
  0xc0   :  { %v5009_v10 = vmul.f32 %v4997_v42, %v4967_v14  ;;  %v836_v1 = vadd.f32 %v3868_v31, %v835_v23  ;;  %3881 = vrcp.f32 %v4994_v17  ;;  %v3142_v51 = vadd.f32 %v3078_v63, %v2949_v59 }
  0xc1   :  { %v3305_v12 = vadd.f32 %v3241_v5, %v2732_v46  ;;  %vm842_vm14 = vcmp.eq.f32.partialorder %v841_v58, 8.507059e+37  ;;  %v374_v6 = vadd.f32 %v373_v32, %v4580_v60  ;;  %v1784_v15 = vadd.s32 400, %v4120_v7 }
  0xc2   :  { %v840_v62 = vsel %vm839_vm13, %v3868_v31, %v836_v1  ;;  %v3271_v28 = vadd.f32 %v4774_v53, %v3142_v51  ;;  %v5021_v19 = vadd.s32 160, %v4120_v7  ;;  %v5025_v27 = vmul.f32 %v4675_v36, %v452_v9 }
  0xc3   :  { %v3370_v40 = vadd.f32 %v4724_v38, %v3305_v12  ;;  %v845_v26 = vsel %vm842_vm14, %v844_v24, %v840_v62  ;;  %v3878_v57 = vpop.eup %3877  ;;  %v3670_v22 = vmul.f32 -1.442695, %v374_v6  ;;  %v1915_v53 = vcvt.s32.f32 %v1784_v15 }
  0xc4   :  { %v2984_v31 = vmul.f32 %v845_v26, %v845_v26  ;;  %v3335_v25 = vadd.f32 %v3271_v28, %v2822_v35  ;;  %v5030_v43 = vadd.f32 1.0, %v3878_v57  ;;  %v1885_v23 = vcvt.s32.f32 %v5021_v19  ;;  %v453_v35 = vpop.f32.mrf.mxu2  ;;  %v2735_v57 = vpop.f32.mrf.mxu1 }
  0xc5   :  { %3434 = vst [vmem:[%s7061_s3 + $0x18] sm:$0xff] %v3370_v40  ;;  %v5033_v58 = vpop.eup %3879  ;;  %v2920_v5 = vmul.f32 %v4704_v3, %v845_v26  ;;  %3883 = vpow2.f32 %v3670_v22  ;;  %v1285_v9 = vmul.f32 %v4876_v50, %v1284_v44  ;;  %v849_v32 = vsub.f32 1.0, %v5009_v10  ;;  %v3803_v44 = vld [vmem:[%s7059_s0 + $0x60] sm:$0xff] }
  0xc6   :  { %v3049_v59 = vmul.f32 %v4712_v4, %v2984_v31  ;;  %v5040_v63 = vpop.eup %3881  ;;  %v3400_v46 = vadd.f32 %v4724_v38, %v3335_v25  ;;  %3885 = vrcp.f32 %v5030_v43  ;;  %v1986_v1 = vmul.f32 %v4136_v21, %v1915_v53  ;;  %v3819_v10 = vld [vmem:[%s7059_s0 + $0xe0] sm:$0xff]  ;;  %3643 = vmatmul.msk.bf16.gmra.mxu0 %vm250_vm0, %v3803_v44 }
  0xc7   :  { %v5047_v51 = vmul.f32 %v4675_v36, %v374_v6  ;;  %v1956_v24 = vmul.f32 %v4136_v21, %v1885_v23  ;;  %v1286_v49 = vadd.f32 %v4876_v50, %v1285_v9  ;;  %v5059_v62 = vmul.f32 %v5033_v58, %v4986_v48  ;;  %3659 = vmatmul.msk.bf16.gmra.mxu2 %vm250_vm0, %v3819_v10 }
  0xc8   :  { %v3113_v12 = vadd.f32 %v3049_v59, %v2920_v5  ;;  %3464 = vst [vmem:[%s7061_s3 + $0x108] sm:$0xff] %v3400_v46  ;;  %v2050_v6 = vfloor.f32 %v1986_v1  ;;  %vm1287_vm15 = vweird.f32 %v4835_v39  ;;  %vm1288_vm1 = vweird.f32 %v4876_v50 }
  0xc9   :  { %v2020_v40 = vfloor.f32 %v1956_v24  ;;  %v1291_v28 = vand.u32 2147483647, %v4835_v39  ;;  %v1293_v26 = vand.u32 2147483648, %v4835_v39  ;;  %v5073_v19 = vmul.f32 %v5040_v63, %v4994_v17  ;;  %vm5076_vm4 = vmor %vm1287_vm15, %vm1288_vm1 }
  0xca   :  { %v3242_v15 = vadd.f32 %v4881_v54, %v3113_v12  ;;  %v2114_v31 = vmul.f32 16.0, %v2050_v6  ;;  %v2242_v22 = vmul.f32 %v2050_v6, %v4136_v21  ;;  %v454_v54 = vadd.f32 %v453_v35, %v4580_v60 }
  0xcb   :  { %v3884_v5 = vpop.eup %3883  ;;  %v2084_v59 = vmul.f32 16.0, %v2020_v40  ;;  %v2212_v9 = vmul.f32 %v2020_v40, %v4136_v21  ;;  %v1290_v46 = vsel %vm5076_vm4, %v4876_v50, %v1286_v49  ;;  %v1294_v10 = vor.u32 1.1754944e-38, %v1293_v26 }
  0xcc   :  { %v3306_v39 = vadd.f32 %v3242_v15, %v2735_v57  ;;  %v5085_v1 = vpop.eup %3885  ;;  %v5088_v24 = vadd.f32 1.0, %v3884_v5  ;;  %v2306_v44 = vfloor.f32 %v2242_v22  ;;  %v2178_v35 = vsub.f32 %v1915_v53, %v2114_v31  ;;  %v376_v31 = vpop.f32.mrf.mxu0 }
  0xcd   :  { %v2276_v11 = vfloor.f32 %v2212_v9  ;;  %vm1292_vm5 = vcmp.eq.f32.partialorder %v1291_v28, 8.507059e+37  ;;  %v3702_v56 = vmul.f32 -1.442695, %v454_v54  ;;  %v5094_v50 = vmul.f32 %v5085_v1, %v5030_v43 }
  0xce   :  { %v3371_v13 = vadd.f32 %v4724_v38, %v3306_v39  ;;  %3887 = vrcp.f32 %v5088_v24  ;;  %v2370_v15 = vmul.f32 16.0, %v2306_v44  ;;  %v1295_v57 = vsel %vm1292_vm5, %v1294_v10, %v1290_v46 }
  0xcf   :  { %v2148_v49 = vsub.f32 %v1885_v23, %v2084_v59  ;;  %v2340_v26 = vmul.f32 16.0, %v2276_v11  ;;  %v3014_v22 = vmul.f32 %v1295_v57, %v1295_v57  ;;  %v2950_v53 = vmul.f32 %v4704_v3, %v1295_v57 }
  0xd0   :  { %3435 = vst [vmem:[%s7061_s3 + $0x20] sm:$0xff] %v3371_v13  ;;  %v2434_v25 = vsub.f32 %v2050_v6, %v2370_v15  ;;  %3889 = vpow2.f32 %v3702_v56  ;;  %v850_v28 = vmul.f32 %v4997_v42, %v849_v32  ;;  %vm852_vm6 = vweird.f32 %v4967_v14 }
  0xd1   :  { %v2404_v5 = vsub.f32 %v2020_v40, %v2340_v26  ;;  %v3079_v39 = vmul.f32 %v4712_v4, %v3014_v22  ;;  %vm853_vm7 = vweird.f32 %v4997_v42  ;;  %v856_v23 = vand.u32 2147483647, %v4967_v14 }
  0xd2   :  { %v2499_v13 = vsel %vm2448_vm2, %v2178_v35, %v2434_v25  ;;  %v851_v11 = vadd.f32 %v4997_v42, %v850_v28  ;;  %v858_v6 = vand.u32 2147483648, %v4967_v14  ;;  %vm5112_vm8 = vmor %vm852_vm6, %vm853_vm7  ;;  %v377_v59 = vadd.f32 %v376_v31, %v4580_v60  ;;  %v2825_v14 = vpop.f32.mrf.mxu3 }
  0xd3   :  { %3777 = vmatmul.msk.f32.gmra.mxu3 %vm2513_vm3, %v2499_v13  ;;  %v2469_v56 = vsel %vm2448_vm2, %v2148_v49, %v2404_v5  ;;  %v3143_v32 = vadd.f32 %v3079_v39, %v2950_v53  ;;  %v1785_v9 = vadd.s32 408, %v4120_v7  ;;  %v864_v44 = vsub.f32 1.0, %v5073_v19 }
  0xd4   :  { %v5118_v46 = vpop.eup %3887  ;;  %3747 = vmatmul.msk.f32.gmra.mxu1 %vm2513_vm3, %v2469_v56  ;;  %v855_v10 = vsel %vm5112_vm8, %v4997_v42, %v851_v11  ;;  %v859_v35 = vor.u32 1.1754944e-38, %v858_v6  ;;  %v1755_v15 = vadd.s32 168, %v4120_v7  ;;  %vm857_vm9 = vcmp.eq.f32.partialorder %v856_v23, 8.507059e+37  ;;  %v456_v6 = vpop.f32.mrf.mxu2 }
  0xd5   :  { %v3272_v49 = vadd.f32 %v4814_v0, %v3143_v32  ;;  %v3671_v26 = vmul.f32 -1.442695, %v377_v59  ;;  %v1916_v53 = vcvt.s32.f32 %v1785_v9  ;;  %v7080_v28 = vsub.f32 1.0, %v4965_v2 }
  0xd6   :  { %v3890_v22 = vpop.eup %3889  ;;  %v860_v25 = vsel %vm857_vm9, %v859_v35, %v855_v10  ;;  %v1886_v19 = vcvt.s32.f32 %v1755_v15  ;;  %v5133_v42 = vmul.f32 %v5118_v46, %v5088_v24  ;;  %v5138_v13 = vmul.f32 %v4675_v36, %v454_v54 }
  0xd7   :  { %v1300_v31 = vmul.f32 %v4932_v41, %v7080_v28  ;;  %v3336_v5 = vadd.f32 %v3272_v49, %v2825_v14  ;;  %v5135_v39 = vadd.f32 1.0, %v3890_v22  ;;  %v2985_v0 = vmul.f32 %v860_v25, %v860_v25 }
  0xd8   :  { %3891 = vpow2.f32 %v3671_v26  ;;  %v1987_v11 = vmul.f32 %v4136_v21, %v1916_v53  ;;  %v1957_v23 = vmul.f32 %v4136_v21, %v1886_v19  ;;  %v2921_v56 = vmul.f32 %v4704_v3, %v860_v25 }
  0xd9   :  { %v3401_v2 = vadd.f32 %v4724_v38, %v3336_v5  ;;  %v5145_v32 = vmul.f32 %v4675_v36, %v377_v59  ;;  %v1301_v40 = vadd.f32 %v4932_v41, %v1300_v31  ;;  %v3050_v9 = vmul.f32 %v4712_v4, %v2985_v0 }
  0xda   :  { %v2051_v54 = vfloor.f32 %v1987_v11  ;;  %v2021_v14 = vfloor.f32 %v1957_v23  ;;  %vm1303_vm10 = vweird.f32 %v4932_v41  ;;  %vm1302_vm11 = vweird.f32 %v4878_v30  ;;  %v2738_v23 = vpop.f32.mrf.mxu1 }
  0xdb   :  { %3465 = vst [vmem:[%s7061_s3 + $0x110] sm:$0xff] %v3401_v2  ;;  %v1306_v10 = vand.u32 2147483647, %v4878_v30  ;;  %v1308_v35 = vand.u32 2147483648, %v4878_v30  ;;  %v457_v59 = vadd.f32 %v456_v6, %v4580_v60  ;;  %3893 = vrcp.f32 %v5135_v39  ;;  %vm1304_vm12 = vmor %vm1302_vm11, %vm1303_vm10 }
  0xdc   :  { %v3114_v15 = vadd.f32 %v3050_v9, %v2921_v56  ;;  %v2115_v49 = vmul.f32 16.0, %v2051_v54  ;;  %v2243_v26 = vmul.f32 %v2051_v54, %v4136_v21  ;;  %v2085_v22 = vmul.f32 16.0, %v2021_v14 }
  0xdd   :  { %v2213_v25 = vmul.f32 %v2021_v14, %v4136_v21  ;;  %v1305_v28 = vsel %vm1304_vm12, %v4932_v41, %v1301_v40  ;;  %v1309_v31 = vor.u32 1.1754944e-38, %v1308_v35  ;;  %vm1307_vm13 = vcmp.eq.f32.partialorder %v1306_v10, 8.507059e+37 }
  0xde   :  { %v3892_v5 = vpop.eup %3891  ;;  %v3243_v0 = vadd.f32 %v4914_v34, %v3114_v15  ;;  %v2307_v11 = vfloor.f32 %v2243_v26  ;;  %v865_v30 = vmul.f32 %v5040_v63, %v864_v44  ;;  %v3703_v9 = vmul.f32 -1.442695, %v457_v59  ;;  %v378_v26 = vpop.f32.mrf.mxu0 }
  0xdf   :  { %v5163_v6 = vadd.f32 1.0, %v3892_v5  ;;  %v2277_v2 = vfloor.f32 %v2213_v25  ;;  %v1310_v56 = vsel %vm1307_vm13, %v1309_v31, %v1305_v28  ;;  %v879_v57 = vsub.f32 1.0, %v5133_v42 }
  0xe0   :  { %v3307_v12 = vadd.f32 %v3243_v0, %v2738_v23  ;;  %v2179_v52 = vsub.f32 %v1916_v53, %v2115_v49  ;;  %v2371_v47 = vmul.f32 16.0, %v2307_v11  ;;  %v2149_v41 = vsub.f32 %v1886_v19, %v2085_v22 }
  0xe1   :  { %3895 = vrcp.f32 %v5163_v6  ;;  %v2341_v40 = vmul.f32 16.0, %v2277_v2  ;;  %v3015_v34 = vmul.f32 %v1310_v56, %v1310_v56  ;;  %v5167_v35 = vpop.eup %3893  ;;  %v2951_v15 = vmul.f32 %v4704_v3, %v1310_v56 }
  0xe2   :  { %v3372_v44 = vadd.f32 %v4724_v38, %v3307_v12  ;;  %v2435_v10 = vsub.f32 %v2051_v54, %v2371_v47  ;;  %3897 = vpow2.f32 %v3703_v9  ;;  %v866_v53 = vadd.f32 %v5040_v63, %v865_v30 }
  0xe3   :  { %v2405_v25 = vsub.f32 %v2021_v14, %v2341_v40  ;;  %v3080_v28 = vmul.f32 %v4712_v4, %v3015_v34  ;;  %vm867_vm14 = vweird.f32 %v4994_v17  ;;  %vm868_vm15 = vweird.f32 %v5040_v63 }
  0xe4   :  { %3436 = vst [vmem:[%s7061_s3 + $0x28] sm:$0xff] %v3372_v44  ;;  %v2500_v19 = vsel %vm2448_vm2, %v2179_v52, %v2435_v10  ;;  %v871_v47 = vand.u32 2147483647, %v4994_v17  ;;  %v873_v12 = vand.u32 2147483648, %v4994_v17  ;;  %vm5185_vm1 = vmor %vm867_vm14, %vm868_vm15  ;;  %v379_v22 = vadd.f32 %v378_v26, %v4580_v60  ;;  %v2828_v17 = vpop.f32.mrf.mxu3 }
  0xe5   :  { %3778 = vmatmul.msk.f32.gmra.mxu3 %vm2513_vm3, %v2500_v19  ;;  %v2470_v54 = vsel %vm2448_vm2, %v2149_v41, %v2405_v25  ;;  %v3144_v14 = vadd.f32 %v3080_v28, %v2951_v15  ;;  %v5191_v52 = vadd.s32 416, %v4120_v7  ;;  %v5195_v31 = vmul.f32 %v5167_v35, %v5135_v39  ;;  %v3820_v19 = vld [vmem:[%s7059_s0 + $0xe8] sm:$0xff] }
  0xe6   :  { %3748 = vmatmul.msk.f32.gmra.mxu1 %vm2513_vm3, %v2470_v54  ;;  %v870_v5 = vsel %vm5185_vm1, %v5040_v63, %v866_v53  ;;  %v874_v0 = vor.u32 1.1754944e-38, %v873_v12  ;;  %v1756_v11 = vadd.s32 176, %v4120_v7  ;;  %vm872_vm4 = vcmp.eq.f32.partialorder %v871_v47, 8.507059e+37  ;;  %v458_v53 = vpop.f32.mrf.mxu2  ;;  %3660 = vmatmul.msk.bf16.gmra.mxu2 %vm250_vm0, %v3820_v19 }
  0xe7   :  { %v5202_v30 = vpop.eup %3895  ;;  %v3273_v23 = vadd.f32 %v4860_v37, %v3144_v14  ;;  %v3672_v2 = vmul.f32 -1.442695, %v379_v22  ;;  %v1917_v56 = vcvt.s32.f32 %v5191_v52  ;;  %v5207_v41 = vmul.f32 %v4675_v36, %v457_v59 }
  0xe8   :  { %v3898_v9 = vpop.eup %3897  ;;  %v875_v40 = vsel %vm872_vm4, %v874_v0, %v870_v5  ;;  %v1887_v34 = vcvt.s32.f32 %v1756_v11  ;;  %v7083_v44 = vsub.f32 1.0, %v5005_v8  ;;  %v5214_v10 = vmul.f32 %v5202_v30, %v5163_v6  ;;  %v3804_v8 = vld [vmem:[%s7059_s0 + $0x68] sm:$0xff] }
  0xe9   :  { %v3337_v15 = vadd.f32 %v3273_v23, %v2828_v17  ;;  %v5216_v37 = vadd.f32 1.0, %v3898_v9  ;;  %v2986_v26 = vmul.f32 %v875_v40, %v875_v40  ;;  %v2922_v25 = vmul.f32 %v4704_v3, %v875_v40  ;;  %3644 = vmatmul.msk.bf16.gmra.mxu0 %vm250_vm0, %v3804_v8 }
  0xea   :  { %v1315_v63 = vmul.f32 %v4989_v18, %v7083_v44  ;;  %3899 = vpow2.f32 %v3672_v2  ;;  %v1988_v59 = vmul.f32 %v4136_v21, %v1917_v56  ;;  %v1958_v28 = vmul.f32 %v4136_v21, %v1887_v34 }
  0xeb   :  { %v3402_v47 = vadd.f32 %v4724_v38, %v3337_v15  ;;  %3901 = vrcp.f32 %v5216_v37  ;;  %v3051_v12 = vmul.f32 %v4712_v4, %v2986_v26  ;;  %vm1317_vm5 = vweird.f32 %v4953_v55 }
  0xec   :  { %v1316_v54 = vadd.f32 %v4989_v18, %v1315_v63  ;;  %v2052_v14 = vfloor.f32 %v1988_v59  ;;  %v2022_v49 = vfloor.f32 %v1958_v28  ;;  %vm1318_vm6 = vweird.f32 %v4989_v18 }
  0xed   :  { %3466 = vst [vmem:[%s7061_s3 + $0x118] sm:$0xff] %v3402_v47  ;;  %v3115_v52 = vadd.f32 %v3051_v12, %v2922_v25  ;;  %v1321_v17 = vand.u32 2147483647, %v4953_v55  ;;  %v1323_v5 = vand.u32 2147483648, %v4953_v55  ;;  %v459_v0 = vadd.f32 %v458_v53, %v4580_v60  ;;  %vm1319_vm7 = vmor %vm1317_vm5, %vm1318_vm6  ;;  %v2741_v25 = vpop.f32.mrf.mxu1 }
  0xee   :  { %v2116_v11 = vmul.f32 16.0, %v2052_v14  ;;  %v2244_v23 = vmul.f32 %v2052_v14, %v4136_v21  ;;  %v2086_v2 = vmul.f32 16.0, %v2022_v49  ;;  %v2214_v9 = vmul.f32 %v2022_v49, %v4136_v21 }
  0xef   :  { %v3244_v44 = vadd.f32 %v4976_v45, %v3115_v52  ;;  %v1320_v63 = vsel %vm1319_vm7, %v4989_v18, %v1316_v54  ;;  %v1324_v15 = vor.u32 1.1754944e-38, %v1323_v5  ;;  %v5247_v55 = vmul.f32 %v4675_v36, %v379_v22 }
  0xf0   :  { %v3900_v26 = vpop.eup %3899  ;;  %v2308_v59 = vfloor.f32 %v2244_v23  ;;  %v2278_v28 = vfloor.f32 %v2214_v9  ;;  %vm1322_vm8 = vcmp.eq.f32.partialorder %v1321_v17, 8.507059e+37  ;;  %v3704_v12 = vmul.f32 -1.442695, %v459_v0 }
  0xf1   :  { %v5249_v53 = vpop.eup %3901  ;;  %v3308_v19 = vadd.f32 %v3244_v44, %v2741_v25  ;;  %v1325_v47 = vsel %vm1322_vm8, %v1324_v15, %v1320_v63  ;;  %v2180_v40 = vsub.f32 %v1917_v56, %v2116_v11  ;;  %v2150_v52 = vsub.f32 %v1887_v34, %v2086_v2  ;;  %v381_v44 = vpop.f32.mrf.mxu0 }
  0xf2   :  { %v2372_v45 = vmul.f32 16.0, %v2308_v59  ;;  %v2342_v18 = vmul.f32 16.0, %v2278_v28  ;;  %v5254_v54 = vmul.f32 %v5249_v53, %v5216_v37  ;;  %v5257_v5 = vadd.f32 1.0, %v3900_v26 }
  0xf3   :  { %v3373_v22 = vadd.f32 %v4724_v38, %v3308_v19  ;;  %v3016_v17 = vmul.f32 %v1325_v47, %v1325_v47  ;;  %v2952_v8 = vmul.f32 %v4704_v3, %v1325_v47  ;;  %3903 = vpow2.f32 %v3704_v12 }
  0xf4   :  { %v2436_v23 = vsub.f32 %v2052_v14, %v2372_v45  ;;  %v2406_v9 = vsub.f32 %v2022_v49, %v2342_v18  ;;  %v880_v34 = vmul.f32 %v5118_v46, %v879_v57  ;;  %vm882_vm9 = vweird.f32 %v5088_v24 }
  0xf5   :  { %3437 = vst [vmem:[%s7061_s3 + $0x30] sm:$0xff] %v3373_v22  ;;  %v3081_v56 = vmul.f32 %v4712_v4, %v3016_v17  ;;  %vm883_vm10 = vweird.f32 %v5118_v46  ;;  %v886_v11 = vand.u32 2147483647, %v5088_v24  ;;  %v888_v2 = vand.u32 2147483648, %v5088_v24 }
  0xf6   :  { %v2501_v14 = vsel %vm2448_vm2, %v2180_v40, %v2436_v23  ;;  %v2471_v49 = vsel %vm2448_vm2, %v2150_v52, %v2406_v9  ;;  %v881_v57 = vadd.f32 %v5118_v46, %v880_v34  ;;  %v382_v63 = vadd.f32 %v381_v44, %v4580_v60  ;;  %v2831_v40 = vpop.f32.mrf.mxu3  ;;  %vm884_vm11 = vmor %vm882_vm9, %vm883_vm10  ;;  %v461_v44 = vpop.f32.mrf.mxu2 }
  0xf7   :  { %3779 = vmatmul.msk.f32.gmra.mxu3 %vm2513_vm3, %v2501_v14  ;;  %3749 = vmatmul.msk.f32.gmra.mxu1 %vm2513_vm3, %v2471_v49  ;;  %v3145_v42 = vadd.f32 %v3081_v56, %v2952_v8  ;;  %v1787_v15 = vadd.s32 424, %v4120_v7  ;;  %3905 = vrcp.f32 %v5257_v5  ;;  %vm887_vm12 = vcmp.eq.f32.partialorder %v886_v11, 8.507059e+37 }
  0xf8   :  { %v889_v26 = vor.u32 1.1754944e-38, %v888_v2  ;;  %v1757_v25 = vadd.s32 184, %v4120_v7  ;;  %v885_v59 = vsel %vm884_vm11, %v5118_v46, %v881_v57  ;;  %v3673_v28 = vmul.f32 -1.442695, %v382_v63 }
  0xf9   :  { %v3274_v24 = vadd.f32 %v4894_v20, %v3145_v42  ;;  %v7084_v8 = vsub.f32 1.0, %v5059_v62  ;;  %v3904_v47 = vpop.eup %3903  ;;  %v5288_v12 = vmul.f32 %v4675_v36, %v459_v0  ;;  %v1918_v52 = vcvt.s32.f32 %v1787_v15 }
  0xfa   :  { %v890_v45 = vsel %vm887_vm12, %v889_v26, %v885_v59  ;;  %v1888_v18 = vcvt.s32.f32 %v1757_v25  ;;  %v5291_v23 = vadd.f32 1.0, %v3904_v47  ;;  %3907 = vpow2.f32 %v3673_v28 }
  0xfb   :  { %v1330_v19 = vmul.f32 %v5033_v58, %v7084_v8  ;;  %v3338_v17 = vadd.f32 %v3274_v24, %v2831_v40  ;;  %v2987_v20 = vmul.f32 %v890_v45, %v890_v45  ;;  %v2923_v46 = vmul.f32 %v4704_v3, %v890_v45  ;;  %v2744_v45 = vpop.f32.mrf.mxu1 }
  0xfc   :  { %v1989_v62 = vmul.f32 %v4136_v21, %v1918_v52  ;;  %v1959_v9 = vmul.f32 %v4136_v21, %v1888_v18  ;;  %3909 = vrcp.f32 %v5291_v23  ;;  %vm1332_vm13 = vweird.f32 %v4986_v48 }
  0xfd   :  { %v3403_v0 = vadd.f32 %v4724_v38, %v3338_v17  ;;  %v3052_v56 = vmul.f32 %v4712_v4, %v2987_v20  ;;  %v1331_v34 = vadd.f32 %v5033_v58, %v1330_v19  ;;  %v5300_v14 = vpop.eup %3905  ;;  %vm1333_vm14 = vweird.f32 %v5033_v58 }
  0xfe   :  { %v2053_v49 = vfloor.f32 %v1989_v62  ;;  %v2023_v11 = vfloor.f32 %v1959_v9  ;;  %v1336_v42 = vand.u32 2147483647, %v4986_v48  ;;  %v1338_v57 = vand.u32 2147483648, %v4986_v48  ;;  %vm1334_vm15 = vmor %vm1332_vm13, %vm1333_vm14 }
  0xff   :  { %3467 = vst [vmem:[%s7061_s3 + $0x120] sm:$0xff] %v3403_v0  ;;  %v3116_v2 = vadd.f32 %v3052_v56, %v2923_v46  ;;  %v462_v15 = vadd.f32 %v461_v44, %v4580_v60  ;;  %v5314_v28 = vmul.f32 %v4675_v36, %v382_v63  ;;  %v1335_v8 = vsel %vm1334_vm15, %v5033_v58, %v1331_v34 }
 0x100   :  { %v2117_v40 = vmul.f32 16.0, %v2053_v49  ;;  %v2245_v26 = vmul.f32 %v2053_v49, %v4136_v21  ;;  %v2087_v25 = vmul.f32 16.0, %v2023_v11  ;;  %v2215_v24 = vmul.f32 %v2023_v11, %v4136_v21  ;;  %v3908_v47 = vpop.eup %3907 }
 0x101   :  { %v3245_v59 = vadd.f32 %v5047_v51, %v3116_v2  ;;  %v1339_v19 = vor.u32 1.1754944e-38, %v1338_v57  ;;  %v5319_v48 = vmul.f32 %v5300_v14, %v5257_v5  ;;  %vm1337_vm1 = vcmp.eq.f32.partialorder %v1336_v42, 8.507059e+37 }
 0x102   :  { %v2309_v17 = vfloor.f32 %v2245_v26  ;;  %v2279_v20 = vfloor.f32 %v2215_v24  ;;  %v5321_v46 = vpop.eup %3909  ;;  %v5323_v9 = vadd.f32 1.0, %v3908_v47  ;;  %v3705_v63 = vmul.f32 -1.442695, %v462_v15 }
 0x103   :  { %v3309_v62 = vadd.f32 %v3245_v59, %v2744_v45  ;;  %v1340_v51 = vsel %vm1337_vm1, %v1339_v19, %v1335_v8  ;;  %v2181_v44 = vsub.f32 %v1918_v52, %v2117_v40  ;;  %v2151_v58 = vsub.f32 %v1888_v18, %v2087_v25  ;;  %v383_v59 = vpop.f32.mrf.mxu0 }
 0x104   :  { %v2373_v0 = vmul.f32 16.0, %v2309_v17  ;;  %v2343_v56 = vmul.f32 16.0, %v2279_v20  ;;  %v5327_v34 = vmul.f32 %v5321_v46, %v5291_v23  ;;  %3911 = vrcp.f32 %v5323_v9  ;;  %v2834_v20 = vpop.f32.mrf.mxu3 }
 0x105   :  { %v3374_v2 = vadd.f32 %v4724_v38, %v3309_v62  ;;  %v3017_v42 = vmul.f32 %v1340_v51, %v1340_v51  ;;  %v2953_v24 = vmul.f32 %v4704_v3, %v1340_v51  ;;  %3913 = vpow2.f32 %v3705_v63 }
 0x106   :  { %v2437_v57 = vsub.f32 %v2053_v49, %v2373_v0  ;;  %v2407_v26 = vsub.f32 %v2023_v11, %v2343_v56  ;;  %v7085_v18 = vsub.f32 1.0, %v5214_v10  ;;  %vm897_vm4 = vweird.f32 %v5163_v6 }
 0x107   :  { %3438 = vst [vmem:[%s7061_s3 + $0x38] sm:$0xff] %v3374_v2  ;;  %v3082_v52 = vmul.f32 %v4712_v4, %v3017_v42  ;;  %vm898_vm5 = vweird.f32 %v5202_v30  ;;  %v901_v25 = vand.u32 2147483647, %v5163_v6  ;;  %v903_v8 = vand.u32 2147483648, %v5163_v6 }
 0x108   :  { %v895_v40 = vmul.f32 %v5202_v30, %v7085_v18  ;;  %v2502_v49 = vsel %vm2448_vm2, %v2181_v44, %v2437_v57  ;;  %v2472_v11 = vsel %vm2448_vm2, %v2151_v58, %v2407_v26  ;;  %v384_v47 = vadd.f32 %v383_v59, %v4580_v60  ;;  %vm899_vm6 = vmor %vm897_vm4, %vm898_vm5 }
 0x109   :  { %3780 = vmatmul.msk.f32.gmra.mxu3 %vm2513_vm3, %v2502_v49  ;;  %3750 = vmatmul.msk.f32.gmra.mxu1 %vm2513_vm3, %v2472_v11  ;;  %v3146_v10 = vadd.f32 %v3082_v52, %v2953_v24  ;;  %v5352_v45 = vadd.s32 432, %v4120_v7  ;;  %vm902_vm7 = vcmp.eq.f32.partialorder %v901_v25, 8.507059e+37  ;;  %v904_v62 = vor.u32 1.1754944e-38, %v903_v8  ;;  %v3805_v49 = vld [vmem:[%s7059_s0 + $0x70] sm:$0xff] }
 0x10a   :  { %v896_v19 = vadd.f32 %v5202_v30, %v895_v40  ;;  %v1758_v6 = vadd.s32 192, %v4120_v7  ;;  %v5356_v51 = vpop.eup %3911  ;;  %v3674_v0 = vmul.f32 -1.442695, %v384_v47  ;;  %v7086_v58 = vsub.f32 1.0, %v5094_v50  ;;  %v463_v40 = vpop.f32.mrf.mxu2  ;;  %v3821_v11 = vld [vmem:[%s7059_s0 + $0xf0] sm:$0xff]  ;;  %3645 = vmatmul.msk.bf16.gmra.mxu0 %vm250_vm0, %v3805_v49 }
 0x10b   :  { %v3275_v63 = vadd.f32 %v4941_v61, %v3146_v10  ;;  %v3914_v2 = vpop.eup %3913  ;;  %v5364_v42 = vmul.f32 %v4675_v36, %v462_v15  ;;  %v1919_v26 = vcvt.s32.f32 %v5352_v45  ;;  %v5370_v61 = vmul.f32 %v5356_v51, %v5323_v9  ;;  %3661 = vmatmul.msk.bf16.gmra.mxu2 %vm250_vm0, %v3821_v11 }
 0x10c   :  { %v900_v44 = vsel %vm899_vm6, %v5202_v30, %v896_v19  ;;  %v1345_v56 = vmul.f32 %v5085_v1, %v7086_v58  ;;  %v1889_v24 = vcvt.s32.f32 %v1758_v6  ;;  %v5372_v18 = vadd.f32 1.0, %v3914_v2 }
 0x10d   :  { %v905_v57 = vsel %vm902_vm7, %v904_v62, %v900_v44  ;;  %v3339_v30 = vadd.f32 %v3275_v63, %v2834_v20  ;;  %3915 = vpow2.f32 %v3674_v0  ;;  %v1990_v50 = vmul.f32 %v4136_v21, %v1919_v26 }
 0x10e   :  { %v2988_v52 = vmul.f32 %v905_v57, %v905_v57  ;;  %v1960_v15 = vmul.f32 %v4136_v21, %v1889_v24  ;;  %v2924_v8 = vmul.f32 %v4704_v3, %v905_v57  ;;  %v1346_v19 = vadd.f32 %v5085_v1, %v1345_v56 }
 0x10f   :  { %v3404_v25 = vadd.f32 %v4724_v38, %v3339_v30  ;;  %v2054_v45 = vfloor.f32 %v1990_v50  ;;  %vm1347_vm8 = vweird.f32 %v5030_v43  ;;  %vm1348_vm9 = vweird.f32 %v5085_v1 }
 0x110   :  { %v3053_v10 = vmul.f32 %v4712_v4, %v2988_v52  ;;  %v2024_v20 = vfloor.f32 %v1960_v15  ;;  %v1351_v6 = vand.u32 2147483647, %v5030_v43  ;;  %v1353_v63 = vand.u32 2147483648, %v5030_v43  ;;  %vm1349_vm10 = vmor %vm1347_vm8, %vm1348_vm9  ;;  %v2747_v15 = vpop.f32.mrf.mxu1 }
 0x111   :  { %3468 = vst [vmem:[%s7061_s3 + $0x128] sm:$0xff] %v3404_v25  ;;  %v464_v44 = vadd.f32 %v463_v40, %v4580_v60  ;;  %v2118_v0 = vmul.f32 16.0, %v2054_v45  ;;  %v2246_v58 = vmul.f32 %v2054_v45, %v4136_v21  ;;  %3917 = vrcp.f32 %v5372_v18 }
 0x112   :  { %v3117_v62 = vadd.f32 %v3053_v10, %v2924_v8  ;;  %v2088_v56 = vmul.f32 16.0, %v2024_v20  ;;  %v2216_v2 = vmul.f32 %v2024_v20, %v4136_v21  ;;  %v1350_v30 = vsel %vm1349_vm10, %v5085_v1, %v1346_v19 }
 0x113   :  { %v1354_v52 = vor.u32 1.1754944e-38, %v1353_v63  ;;  %v3916_v50 = vpop.eup %3915  ;;  %v5402_v43 = vmul.f32 %v4675_v36, %v384_v47  ;;  %v2310_v40 = vfloor.f32 %v2246_v58  ;;  %vm1352_vm11 = vcmp.eq.f32.partialorder %v1351_v6, 8.507059e+37  ;;  %v386_v58 = vpop.f32.mrf.mxu0 }
 0x114   :  { %v3246_v57 = vadd.f32 %v5145_v32, %v3117_v62  ;;  %v2280_v49 = vfloor.f32 %v2216_v2  ;;  %v5404_v25 = vadd.f32 1.0, %v3916_v50  ;;  %v3706_v10 = vmul.f32 -1.442695, %v464_v44 }
 0x115   :  { %v1355_v8 = vsel %vm1352_vm11, %v1354_v52, %v1350_v30  ;;  %v2182_v59 = vsub.f32 %v1919_v26, %v2118_v0  ;;  %v2374_v22 = vmul.f32 16.0, %v2310_v40  ;;  %v2152_v17 = vsub.f32 %v1889_v24, %v2088_v56 }
 0x116   :  { %v3310_v11 = vadd.f32 %v3246_v57, %v2747_v15  ;;  %v2344_v32 = vmul.f32 16.0, %v2280_v49  ;;  %v924_v1 = vsub.f32 1.0, %v5370_v61  ;;  %3919 = vrcp.f32 %v5404_v25 }
 0x117   :  { %v3018_v47 = vmul.f32 %v1355_v8, %v1355_v8  ;;  %v2438_v62 = vsub.f32 %v2054_v45, %v2374_v22  ;;  %v2954_v6 = vmul.f32 %v4704_v3, %v1355_v8  ;;  %3921 = vpow2.f32 %v3706_v10  ;;  %v5410_v2 = vpop.eup %3917 }
 0x118   :  { %v3375_v19 = vadd.f32 %v4724_v38, %v3310_v11  ;;  %v2408_v63 = vsub.f32 %v2024_v20, %v2344_v32  ;;  %v7087_v24 = vsub.f32 1.0, %v5319_v48  ;;  %vm912_vm12 = vweird.f32 %v5257_v5 }
 0x119   :  { %v3083_v26 = vmul.f32 %v4712_v4, %v3018_v47  ;;  %vm913_vm13 = vweird.f32 %v5300_v14  ;;  %v2503_v22 = vsel %vm2448_vm2, %v2182_v59, %v2438_v62  ;;  %v916_v20 = vand.u32 2147483647, %v5257_v5 }
 0x11a   :  { %3439 = vst [vmem:[%s7061_s3 + $0x40] sm:$0xff] %v3375_v19  ;;  %v910_v0 = vmul.f32 %v5300_v14, %v7087_v24  ;;  %v2473_v45 = vsel %vm2448_vm2, %v2152_v17, %v2408_v63  ;;  %v918_v56 = vand.u32 2147483648, %v5257_v5  ;;  %3781 = vmatmul.msk.f32.gmra.mxu3 %vm2513_vm3, %v2503_v22  ;;  %v387_v30 = vadd.f32 %v386_v58, %v4580_v60  ;;  %v2837_v17 = vpop.f32.mrf.mxu3  ;;  %vm914_vm14 = vmor %vm912_vm12, %vm913_vm13 }
 0x11b   :  { %3751 = vmatmul.msk.f32.gmra.mxu1 %vm2513_vm3, %v2473_v45  ;;  %v3147_v48 = vadd.f32 %v3083_v26, %v2954_v6  ;;  %v1789_v52 = vadd.s32 440, %v4120_v7  ;;  %v5434_v59 = vmul.f32 %v5410_v2, %v5372_v18  ;;  %vm917_vm15 = vcmp.eq.f32.partialorder %v916_v20, 8.507059e+37 }
 0x11c   :  { %v911_v57 = vadd.f32 %v5300_v14, %v910_v0  ;;  %v919_v50 = vor.u32 1.1754944e-38, %v918_v56  ;;  %v1759_v5 = vadd.s32 200, %v4120_v7  ;;  %v5437_v15 = vpop.eup %3919  ;;  %v3675_v11 = vmul.f32 -1.442695, %v387_v30 }
 0x11d   :  { %v3276_v40 = vadd.f32 %v5025_v27, %v3147_v48  ;;  %v7088_v8 = vsub.f32 1.0, %v5195_v31  ;;  %v3922_v32 = vpop.eup %3921  ;;  %v5445_v19 = vmul.f32 %v4675_v36, %v464_v44  ;;  %v1920_v62 = vcvt.s32.f32 %v1789_v52  ;;  %v466_v44 = vpop.f32.mrf.mxu2 }
 0x11e   :  { %v915_v49 = vsel %vm914_vm14, %v5300_v14, %v911_v57  ;;  %v1890_v63 = vcvt.s32.f32 %v1759_v5  ;;  %v5449_v6 = vmul.f32 %v5437_v15, %v5404_v25  ;;  %v5451_v27 = vadd.f32 1.0, %v3922_v32 }
 0x11f   :  { %v1360_v10 = vmul.f32 %v5167_v35, %v7088_v8  ;;  %v920_v47 = vsel %vm917_vm15, %v919_v50, %v915_v49  ;;  %v3340_v58 = vadd.f32 %v3276_v40, %v2837_v17  ;;  %3923 = vpow2.f32 %v3675_v11 }
 0x120   :  { %v2989_v14 = vmul.f32 %v920_v47, %v920_v47  ;;  %v2925_v26 = vmul.f32 %v4704_v3, %v920_v47  ;;  %v1991_v31 = vmul.f32 %v4136_v21, %v1920_v62  ;;  %v1961_v24 = vmul.f32 %v4136_v21, %v1890_v63 }
 0x121   :  { %v3405_v0 = vadd.f32 %v4724_v38, %v3340_v58  ;;  %3925 = vrcp.f32 %v5451_v27  ;;  %v1361_v45 = vadd.f32 %v5167_v35, %v1360_v10  ;;  %vm1362_vm1 = vweird.f32 %v5135_v39  ;;  %v2750_v58 = vpop.f32.mrf.mxu1 }
 0x122   :  { %v3054_v22 = vmul.f32 %v4712_v4, %v2989_v14  ;;  %v2055_v20 = vfloor.f32 %v1991_v31  ;;  %v2025_v56 = vfloor.f32 %v1961_v24  ;;  %vm1363_vm4 = vweird.f32 %v5167_v35 }
 0x123   :  { %3469 = vst [vmem:[%s7061_s3 + $0x130] sm:$0xff] %v3405_v0  ;;  %v1366_v57 = vand.u32 2147483647, %v5135_v39  ;;  %v1368_v52 = vand.u32 2147483648, %v5135_v39  ;;  %v467_v17 = vadd.f32 %v466_v44, %v4580_v60  ;;  %vm1364_vm5 = vmor %vm1362_vm1, %vm1363_vm4  ;;  %v5474_v39 = vmul.f32 %v4675_v36, %v387_v30 }
 0x124   :  { %v3118_v48 = vadd.f32 %v3054_v22, %v2925_v26  ;;  %v2119_v50 = vmul.f32 16.0, %v2055_v20  ;;  %v2247_v5 = vmul.f32 %v2055_v20, %v4136_v21  ;;  %v2089_v40 = vmul.f32 16.0, %v2025_v56 }
 0x125   :  { %v2217_v49 = vmul.f32 %v2025_v56, %v4136_v21  ;;  %v1365_v10 = vsel %vm1364_vm5, %v5167_v35, %v1361_v45  ;;  %v1369_v32 = vor.u32 1.1754944e-38, %v1368_v52  ;;  %v3924_v47 = vpop.eup %3923  ;;  %vm1367_vm6 = vcmp.eq.f32.partialorder %v1366_v57, 8.507059e+37 }
 0x126   :  { %v3247_v8 = vadd.f32 %v5247_v55, %v3118_v48  ;;  %v2311_v14 = vfloor.f32 %v2247_v5  ;;  %v3707_v22 = vmul.f32 -1.442695, %v467_v17  ;;  %v2183_v11 = vsub.f32 %v1920_v62, %v2119_v50 }
 0x127   :  { %v2281_v26 = vfloor.f32 %v2217_v49  ;;  %v5476_v31 = vpop.eup %3925  ;;  %v1370_v0 = vsel %vm1367_vm6, %v1369_v32, %v1365_v10  ;;  %v2153_v48 = vsub.f32 %v1890_v63, %v2089_v40  ;;  %v5484_v52 = vadd.f32 1.0, %v3924_v47 }
 0x128   :  { %v3311_v44 = vadd.f32 %v3247_v8, %v2750_v58  ;;  %v2375_v55 = vmul.f32 16.0, %v2311_v14  ;;  %v5481_v45 = vmul.f32 %v5476_v31, %v5451_v27  ;;  %v3019_v57 = vmul.f32 %v1370_v0, %v1370_v0  ;;  %v388_v8 = vpop.f32.mrf.mxu0 }
 0x129   :  { %v2345_v35 = vmul.f32 16.0, %v2281_v26  ;;  %v2955_v24 = vmul.f32 %v4704_v3, %v1370_v0  ;;  %3927 = vpow2.f32 %v3707_v22  ;;  %v925_v63 = vmul.f32 %v5356_v51, %v924_v1 }
 0x12a   :  { %v3376_v30 = vadd.f32 %v4724_v38, %v3311_v44  ;;  %v2439_v5 = vsub.f32 %v2055_v20, %v2375_v55  ;;  %v3084_v62 = vmul.f32 %v4712_v4, %v3019_v57  ;;  %vm927_vm7 = vweird.f32 %v5323_v9 }
 0x12b   :  { %v2409_v49 = vsub.f32 %v2025_v56, %v2345_v35  ;;  %vm928_vm8 = vweird.f32 %v5356_v51  ;;  %v931_v50 = vand.u32 2147483647, %v5323_v9  ;;  %v933_v40 = vand.u32 2147483648, %v5323_v9 }
 0x12c   :  { %3440 = vst [vmem:[%s7061_s3 + $0x48] sm:$0xff] %v3376_v30  ;;  %v2504_v20 = vsel %vm2448_vm2, %v2183_v11, %v2439_v5  ;;  %v3148_v61 = vadd.f32 %v3084_v62, %v2955_v24  ;;  %v926_v1 = vadd.f32 %v5356_v51, %v925_v63  ;;  %v389_v10 = vadd.f32 %v388_v8, %v4580_v60  ;;  %v2840_v11 = vpop.f32.mrf.mxu3  ;;  %vm929_vm9 = vmor %vm927_vm7, %vm928_vm8  ;;  %v468_v8 = vpop.f32.mrf.mxu2  ;;  %v3822_v62 = vld [vmem:[%s7059_s0 + $0xf8] sm:$0xff] }
 0x12d   :  { %v2474_v56 = vsel %vm2448_vm2, %v2153_v48, %v2409_v49  ;;  %3782 = vmatmul.msk.f32.gmra.mxu3 %vm2513_vm3, %v2504_v20  ;;  %v5507_v32 = vadd.s32 448, %v4120_v7  ;;  %3929 = vrcp.f32 %v5484_v52  ;;  %vm932_vm10 = vcmp.eq.f32.partialorder %v931_v50, 8.507059e+37  ;;  %3662 = vmatmul.msk.bf16.gmra.mxu2 %vm250_vm0, %v3822_v62 }
 0x12e   :  { %3752 = vmatmul.msk.f32.gmra.mxu1 %vm2513_vm3, %v2474_v56  ;;  %v934_v47 = vor.u32 1.1754944e-38, %v933_v40  ;;  %v1760_v9 = vadd.s32 208, %v4120_v7  ;;  %v3277_v58 = vadd.f32 %v5138_v13, %v3148_v61  ;;  %v930_v14 = vsel %vm929_vm9, %v5356_v51, %v926_v1 }
 0x12f   :  { %v3676_v26 = vmul.f32 -1.442695, %v389_v10  ;;  %v7089_v24 = vsub.f32 1.0, %v5254_v54  ;;  %v3928_v0 = vpop.eup %3927  ;;  %v5517_v22 = vmul.f32 %v4675_v36, %v467_v17  ;;  %v1921_v48 = vcvt.s32.f32 %v5507_v32  ;;  %v3806_v17 = vld [vmem:[%s7059_s0 + $0x78] sm:$0xff] }
 0x130   :  { %v935_v55 = vsel %vm932_vm10, %v934_v47, %v930_v14  ;;  %v1891_v35 = vcvt.s32.f32 %v1760_v9  ;;  %v3341_v57 = vadd.f32 %v3277_v58, %v2840_v11  ;;  %v5521_v5 = vadd.f32 1.0, %v3928_v0  ;;  %3646 = vmatmul.msk.bf16.gmra.mxu0 %vm250_vm0, %v3806_v17 }
 0x131   :  { %v1375_v44 = vmul.f32 %v5249_v53, %v7089_v24  ;;  %v2990_v13 = vmul.f32 %v935_v55, %v935_v55  ;;  %v2926_v51 = vmul.f32 %v4704_v3, %v935_v55  ;;  %3931 = vpow2.f32 %v3676_v26 }
 0x132   :  { %v1992_v54 = vmul.f32 %v4136_v21, %v1921_v48  ;;  %v1962_v49 = vmul.f32 %v4136_v21, %v1891_v35  ;;  %v3406_v63 = vadd.f32 %v4724_v38, %v3341_v57  ;;  %3933 = vrcp.f32 %v5521_v5 }
 0x133   :  { %v3055_v20 = vmul.f32 %v4712_v4, %v2990_v13  ;;  %v1376_v56 = vadd.f32 %v5249_v53, %v1375_v44  ;;  %v5536_v50 = vpop.eup %3929  ;;  %vm1377_vm11 = vweird.f32 %v5216_v37  ;;  %vm1378_vm12 = vweird.f32 %v5249_v53  ;;  %v2753_v13 = vpop.f32.mrf.mxu1 }
 0x134   :  { %v2056_v40 = vfloor.f32 %v1992_v54  ;;  %v2026_v61 = vfloor.f32 %v1962_v49  ;;  %3470 = vst [vmem:[%s7061_s3 + $0x138] sm:$0xff] %v3406_v63  ;;  %v1381_v32 = vand.u32 2147483647, %v5216_v37  ;;  %v1383_v11 = vand.u32 2147483648, %v5216_v37  ;;  %vm1379_vm13 = vmor %vm1377_vm11, %vm1378_vm12 }
 0x135   :  { %v3119_v1 = vadd.f32 %v3055_v20, %v2926_v51  ;;  %v469_v47 = vadd.f32 %v468_v8, %v4580_v60  ;;  %v5552_v44 = vmul.f32 %v4675_v36, %v389_v10  ;;  %v1380_v0 = vsel %vm1379_vm13, %v5249_v53, %v1376_v56 }
 0x136   :  { %v2120_v9 = vmul.f32 16.0, %v2056_v40  ;;  %v2248_v58 = vmul.f32 %v2056_v40, %v4136_v21  ;;  %v2090_v14 = vmul.f32 16.0, %v2026_v61  ;;  %v2218_v26 = vmul.f32 %v2026_v61, %v4136_v21 }
 0x137   :  { %v3248_v24 = vadd.f32 %v5314_v28, %v3119_v1  ;;  %v1384_v55 = vor.u32 1.1754944e-38, %v1383_v11  ;;  %v3932_v57 = vpop.eup %3931  ;;  %v5557_v37 = vmul.f32 %v5536_v50, %v5484_v52  ;;  %vm1382_vm0 = vcmp.eq.f32.partialorder %v1381_v32, 8.507059e+37 }
 0x138   :  { %v2312_v51 = vfloor.f32 %v2248_v58  ;;  %v2282_v54 = vfloor.f32 %v2218_v26  ;;  %v5559_v49 = vpop.eup %3933  ;;  %v5561_v17 = vadd.f32 1.0, %v3932_v57  ;;  %v3708_v10 = vmul.f32 -1.442695, %v469_v47 }
 0x139   :  { %v3312_v8 = vadd.f32 %v3248_v24, %v2753_v13  ;;  %v1385_v28 = vsel %vm1382_vm0, %v1384_v55, %v1380_v0  ;;  %v2184_v62 = vsub.f32 %v1921_v48, %v2120_v9  ;;  %v2154_v53 = vsub.f32 %v1891_v35, %v2090_v14  ;;  %v391_v24 = vpop.f32.mrf.mxu0 }
 0x13a   :  { %v2376_v63 = vmul.f32 16.0, %v2312_v51  ;;  %v2346_v20 = vmul.f32 16.0, %v2282_v54  ;;  %v5565_v56 = vmul.f32 %v5559_v49, %v5521_v5  ;;  %3935 = vrcp.f32 %v5561_v17  ;;  %v2843_v54 = vpop.f32.mrf.mxu3 }
 0x13b   :  { %v3377_v1 = vadd.f32 %v4724_v38, %v3312_v8  ;;  %v3020_v32 = vmul.f32 %v1385_v28, %v1385_v28  ;;  %v2956_v26 = vmul.f32 %v4704_v3, %v1385_v28  ;;  %3937 = vpow2.f32 %v3708_v10 }
 0x13c   :  { %v2440_v11 = vsub.f32 %v2056_v40, %v2376_v63  ;;  %v2410_v58 = vsub.f32 %v2026_v61, %v2346_v20  ;;  %v7090_v35 = vsub.f32 1.0, %v5449_v6  ;;  %vm942_vm14 = vweird.f32 %v5404_v25 }
 0x13d   :  { %3441 = vst [vmem:[%s7061_s3 + $0x50] sm:$0xff] %v3377_v1  ;;  %v3085_v48 = vmul.f32 %v4712_v4, %v3020_v32  ;;  %vm943_vm15 = vweird.f32 %v5437_v15  ;;  %v946_v14 = vand.u32 2147483647, %v5404_v25  ;;  %v948_v0 = vand.u32 2147483648, %v5404_v25 }
 0x13e   :  { %v940_v9 = vmul.f32 %v5437_v15, %v7090_v35  ;;  %v2505_v40 = vsel %vm2448_vm2, %v2184_v62, %v2440_v11  ;;  %v2475_v61 = vsel %vm2448_vm2, %v2154_v53, %v2410_v58  ;;  %v392_v57 = vadd.f32 %v391_v24, %v4580_v60  ;;  %vm944_vm1 = vmor %vm942_vm14, %vm943_vm15 }
 0x13f   :  { %3783 = vmatmul.msk.f32.gmra.mxu3 %vm2513_vm3, %v2505_v40  ;;  %3753 = vmatmul.msk.f32.gmra.mxu1 %vm2513_vm3, %v2475_v61  ;;  %v3149_v6 = vadd.f32 %v3085_v48, %v2956_v26  ;;  %v1791_v13 = vadd.s32 456, %v4120_v7  ;;  %vm947_vm4 = vcmp.eq.f32.partialorder %v946_v14, 8.507059e+37  ;;  %v949_v8 = vor.u32 1.1754944e-38, %v948_v0 }
 0x140   :  { %v941_v55 = vadd.f32 %v5437_v15, %v940_v9  ;;  %v1761_v28 = vadd.s32 216, %v4120_v7  ;;  %v5592_v25 = vpop.eup %3935  ;;  %v3677_v63 = vmul.f32 -1.442695, %v392_v57  ;;  %v7091_v53 = vsub.f32 1.0, %v5327_v34 }
 0x141   :  { %v3278_v10 = vadd.f32 %v5207_v41, %v3149_v6  ;;  %v3938_v1 = vpop.eup %3937  ;;  %v5600_v32 = vmul.f32 %v4675_v36, %v469_v47  ;;  %v1922_v58 = vcvt.s32.f32 %v1791_v13  ;;  %v5605_v48 = vmul.f32 %v5592_v25, %v5561_v17  ;;  %v471_v47 = vpop.f32.mrf.mxu2 }
 0x142   :  { %v945_v62 = vsel %vm944_vm1, %v5437_v15, %v941_v55  ;;  %v1390_v20 = vmul.f32 %v5321_v46, %v7091_v53  ;;  %v1892_v26 = vcvt.s32.f32 %v1761_v28  ;;  %v5607_v35 = vadd.f32 1.0, %v3938_v1 }
 0x143   :  { %v950_v11 = vsel %vm947_vm4, %v949_v8, %v945_v62  ;;  %v3342_v41 = vadd.f32 %v3278_v10, %v2843_v54  ;;  %3939 = vpow2.f32 %v3677_v63  ;;  %v1993_v34 = vmul.f32 %v4136_v21, %v1922_v58 }
 0x144   :  { %v2991_v15 = vmul.f32 %v950_v11, %v950_v11  ;;  %v1963_v9 = vmul.f32 %v4136_v21, %v1892_v26  ;;  %v2927_v61 = vmul.f32 %v4704_v3, %v950_v11  ;;  %v1391_v0 = vadd.f32 %v5321_v46, %v1390_v20 }
 0x145   :  { %v3407_v40 = vadd.f32 %v4724_v38, %v3342_v41  ;;  %v2057_v6 = vfloor.f32 %v1993_v34  ;;  %vm1392_vm5 = vweird.f32 %v5291_v23  ;;  %vm1393_vm6 = vweird.f32 %v5321_v46 }
 0x146   :  { %v3056_v14 = vmul.f32 %v4712_v4, %v2991_v15  ;;  %v2027_v55 = vfloor.f32 %v1963_v9  ;;  %v1396_v54 = vand.u32 2147483647, %v5291_v23  ;;  %v1398_v8 = vand.u32 2147483648, %v5291_v23  ;;  %vm1394_vm7 = vmor %vm1392_vm5, %vm1393_vm6  ;;  %v2756_v15 = vpop.f32.mrf.mxu1 }
 0x147   :  { %3471 = vst [vmem:[%s7061_s3 + $0x140] sm:$0xff] %v3407_v40  ;;  %v472_v28 = vadd.f32 %v471_v47, %v4580_v60  ;;  %v2121_v10 = vmul.f32 16.0, %v2057_v6  ;;  %v2249_v62 = vmul.f32 %v2057_v6, %v4136_v21  ;;  %3941 = vrcp.f32 %v5607_v35 }
 0x148   :  { %v3120_v13 = vadd.f32 %v3056_v14, %v2927_v61  ;;  %v2091_v63 = vmul.f32 16.0, %v2027_v55  ;;  %v2219_v53 = vmul.f32 %v2027_v55, %v4136_v21  ;;  %v1395_v1 = vsel %vm1394_vm7, %v5321_v46, %v1391_v0 }
 0x149   :  { %v1399_v11 = vor.u32 1.1754944e-38, %v1398_v8  ;;  %v3940_v41 = vpop.eup %3939  ;;  %v5629_v23 = vmul.f32 %v4675_v36, %v392_v57  ;;  %v2313_v34 = vfloor.f32 %v2249_v62  ;;  %vm1397_vm8 = vcmp.eq.f32.partialorder %v1396_v54, 8.507059e+37  ;;  %v393_v62 = vpop.f32.mrf.mxu0 }
 0x14a   :  { %v3249_v20 = vadd.f32 %v5402_v43, %v3120_v13  ;;  %v2283_v9 = vfloor.f32 %v2219_v53  ;;  %v5631_v40 = vadd.f32 1.0, %v3940_v41  ;;  %v3709_v14 = vmul.f32 -1.442695, %v472_v28 }
 0x14b   :  { %v1400_v61 = vsel %vm1397_vm8, %v1399_v11, %v1395_v1  ;;  %v2185_v24 = vsub.f32 %v1922_v58, %v2121_v10  ;;  %v2377_v30 = vmul.f32 16.0, %v2313_v34  ;;  %v2155_v51 = vsub.f32 %v1892_v26, %v2091_v63 }
 0x14c   :  { %v3313_v47 = vadd.f32 %v3249_v20, %v2756_v15  ;;  %v2347_v43 = vmul.f32 16.0, %v2283_v9  ;;  %v969_v46 = vsub.f32 1.0, %v5605_v48  ;;  %3943 = vrcp.f32 %v5631_v40 }
 0x14d   :  { %v3021_v57 = vmul.f32 %v1400_v61, %v1400_v61  ;;  %v2441_v13 = vsub.f32 %v2057_v6, %v2377_v30  ;;  %v2957_v54 = vmul.f32 %v4704_v3, %v1400_v61  ;;  %3945 = vpow2.f32 %v3709_v14  ;;  %v5637_v53 = vpop.eup %3941 }
 0x14e   :  { %v3378_v0 = vadd.f32 %v4724_v38, %v3313_v47  ;;  %v2411_v8 = vsub.f32 %v2027_v55, %v2347_v43  ;;  %v7092_v26 = vsub.f32 1.0, %v5557_v37  ;;  %vm957_vm9 = vweird.f32 %v5484_v52 }
 0x14f   :  { %v3086_v58 = vmul.f32 %v4712_v4, %v3021_v57  ;;  %vm958_vm10 = vweird.f32 %v5536_v50  ;;  %v2506_v30 = vsel %vm2448_vm2, %v2185_v24, %v2441_v13  ;;  %v961_v55 = vand.u32 2147483647, %v5484_v52 }
 0x150   :  { %3442 = vst [vmem:[%s7061_s3 + $0x58] sm:$0xff] %v3378_v0  ;;  %v955_v10 = vmul.f32 %v5536_v50, %v7092_v26  ;;  %v2476_v6 = vsel %vm2448_vm2, %v2155_v51, %v2411_v8  ;;  %v963_v63 = vand.u32 2147483648, %v5484_v52  ;;  %3784 = vmatmul.msk.f32.gmra.mxu3 %vm2513_vm3, %v2506_v30  ;;  %v394_v1 = vadd.f32 %v393_v62, %v4580_v60  ;;  %v2846_v51 = vpop.f32.mrf.mxu3  ;;  %vm959_vm11 = vmor %vm957_vm9, %vm958_vm10 }
 0x151   :  { %3754 = vmatmul.msk.f32.gmra.mxu1 %vm2513_vm3, %v2476_v6  ;;  %v3150_v37 = vadd.f32 %v3086_v58, %v2957_v54  ;;  %v1792_v11 = vadd.s32 464, %v4120_v7  ;;  %v5661_v24 = vmul.f32 %v5637_v53, %v5607_v35  ;;  %vm962_vm12 = vcmp.eq.f32.partialorder %v961_v55, 8.507059e+37 }
 0x152   :  { %v956_v20 = vadd.f32 %v5536_v50, %v955_v10  ;;  %v964_v41 = vor.u32 1.1754944e-38, %v963_v63  ;;  %v1762_v52 = vadd.s32 224, %v4120_v7  ;;  %v5664_v15 = vpop.eup %3943  ;;  %v3678_v47 = vmul.f32 -1.442695, %v394_v1 }
 0x153   :  { %v3279_v34 = vadd.f32 %v5288_v12, %v3150_v37  ;;  %v7093_v61 = vsub.f32 1.0, %v5434_v59  ;;  %v3946_v43 = vpop.eup %3945  ;;  %v5672_v0 = vmul.f32 %v4675_v36, %v472_v28  ;;  %v1923_v13 = vcvt.s32.f32 %v1792_v11  ;;  %v473_v28 = vpop.f32.mrf.mxu2 }
 0x154   :  { %v960_v9 = vsel %vm959_vm11, %v5536_v50, %v956_v20  ;;  %v1893_v8 = vcvt.s32.f32 %v1762_v52  ;;  %v5676_v54 = vmul.f32 %v5664_v15, %v5631_v40  ;;  %v5678_v12 = vadd.f32 1.0, %v3946_v43 }
 0x155   :  { %v1405_v14 = vmul.f32 %v5410_v2, %v7093_v61  ;;  %v965_v57 = vsel %vm962_vm12, %v964_v41, %v960_v9  ;;  %v3343_v62 = vadd.f32 %v3279_v34, %v2846_v51  ;;  %3947 = vpow2.f32 %v3678_v47 }
 0x156   :  { %v2992_v50 = vmul.f32 %v965_v57, %v965_v57  ;;  %v2928_v58 = vmul.f32 %v4704_v3, %v965_v57  ;;  %v1994_v59 = vmul.f32 %v4136_v21, %v1923_v13  ;;  %v1964_v26 = vmul.f32 %v4136_v21, %v1893_v8 }
 0x157   :  { %v3408_v10 = vadd.f32 %v4724_v38, %v3343_v62  ;;  %3949 = vrcp.f32 %v5678_v12  ;;  %v1406_v6 = vadd.f32 %v5410_v2, %v1405_v14  ;;  %vm1407_vm13 = vweird.f32 %v5372_v18  ;;  %v2759_v62 = vpop.f32.mrf.mxu1 }
 0x158   :  { %v3057_v30 = vmul.f32 %v4712_v4, %v2992_v50  ;;  %v2058_v55 = vfloor.f32 %v1994_v59  ;;  %v2028_v63 = vfloor.f32 %v1964_v26  ;;  %vm1408_vm0 = vweird.f32 %v5410_v2 }
 0x159   :  { %3472 = vst [vmem:[%s7061_s3 + $0x148] sm:$0xff] %v3408_v10  ;;  %v1411_v20 = vand.u32 2147483647, %v5372_v18  ;;  %v1413_v11 = vand.u32 2147483648, %v5372_v18  ;;  %v474_v51 = vadd.f32 %v473_v28, %v4580_v60  ;;  %vm1409_vm14 = vmor %vm1407_vm13, %vm1408_vm0  ;;  %v5701_v18 = vmul.f32 %v4675_v36, %v394_v1 }
 0x15a   :  { %v3121_v37 = vadd.f32 %v3057_v30, %v2928_v58  ;;  %v2122_v41 = vmul.f32 16.0, %v2058_v55  ;;  %v2250_v52 = vmul.f32 %v2058_v55, %v4136_v21  ;;  %v2092_v34 = vmul.f32 16.0, %v2028_v63 }
 0x15b   :  { %v2220_v9 = vmul.f32 %v2028_v63, %v4136_v21  ;;  %v1410_v14 = vsel %vm1409_vm14, %v5410_v2, %v1406_v6  ;;  %v1414_v43 = vor.u32 1.1754944e-38, %v1413_v11  ;;  %v3948_v57 = vpop.eup %3947  ;;  %vm1412_vm15 = vcmp.eq.f32.partialorder %v1411_v20, 8.507059e+37 }
 0x15c   :  { %v3250_v61 = vadd.f32 %v5474_v39, %v3121_v37  ;;  %v2314_v50 = vfloor.f32 %v2250_v52  ;;  %v3710_v30 = vmul.f32 -1.442695, %v474_v51  ;;  %v2186_v47 = vsub.f32 %v1923_v13, %v2122_v41 }
 0x15d   :  { %v2284_v58 = vfloor.f32 %v2220_v9  ;;  %v5703_v59 = vpop.eup %3949  ;;  %v1415_v10 = vsel %vm1412_vm15, %v1414_v43, %v1410_v14  ;;  %v2156_v37 = vsub.f32 %v1893_v8, %v2092_v34  ;;  %v5711_v11 = vadd.f32 1.0, %v3948_v57 }
 0x15e   :  { %v3314_v28 = vadd.f32 %v3250_v61, %v2759_v62  ;;  %v2378_v39 = vmul.f32 16.0, %v2314_v50  ;;  %v5708_v6 = vmul.f32 %v5703_v59, %v5678_v12  ;;  %v3022_v20 = vmul.f32 %v1415_v10, %v1415_v10  ;;  %v396_v61 = vpop.f32.mrf.mxu0 }
 0x15f   :  { %v2348_v2 = vmul.f32 16.0, %v2284_v58  ;;  %v2958_v26 = vmul.f32 %v4704_v3, %v1415_v10  ;;  %3951 = vpow2.f32 %v3710_v30  ;;  %v970_v8 = vmul.f32 %v5592_v25, %v969_v46 }
 0x160   :  { %v3379_v1 = vadd.f32 %v4724_v38, %v3314_v28  ;;  %v2442_v52 = vsub.f32 %v2058_v55, %v2378_v39  ;;  %v3087_v13 = vmul.f32 %v4712_v4, %v3022_v20  ;;  %vm972_vm1 = vweird.f32 %v5561_v17 }
 0x161   :  { %v2412_v9 = vsub.f32 %v2028_v63, %v2348_v2  ;;  %vm973_vm4 = vweird.f32 %v5592_v25  ;;  %v976_v41 = vand.u32 2147483647, %v5561_v17  ;;  %v978_v34 = vand.u32 2147483648, %v5561_v17 }
 0x162   :  { %3443 = vst [vmem:[%s7061_s3 + $0x60] sm:$0xff] %v3379_v1  ;;  %v2507_v55 = vsel %vm2448_vm2, %v2186_v47, %v2442_v52  ;;  %v3151_v48 = vadd.f32 %v3087_v13, %v2958_v26  ;;  %v971_v46 = vadd.f32 %v5592_v25, %v970_v8  ;;  %v397_v14 = vadd.f32 %v396_v61, %v4580_v60  ;;  %v2849_v47 = vpop.f32.mrf.mxu3  ;;  %vm974_vm5 = vmor %vm972_vm1, %vm973_vm4  ;;  %v476_v61 = vpop.f32.mrf.mxu2 }
 0x163   :  { %v2477_v63 = vsel %vm2448_vm2, %v2156_v37, %v2412_v9  ;;  %3785 = vmatmul.msk.f32.gmra.mxu3 %vm2513_vm3, %v2507_v55  ;;  %v1793_v43 = vadd.s32 472, %v4120_v7  ;;  %3953 = vrcp.f32 %v5711_v11  ;;  %vm977_vm6 = vcmp.eq.f32.partialorder %v976_v41, 8.507059e+37 }
 0x164   :  { %3755 = vmatmul.msk.f32.gmra.mxu1 %vm2513_vm3, %v2477_v63  ;;  %v979_v57 = vor.u32 1.1754944e-38, %v978_v34  ;;  %v1763_v62 = vadd.s32 232, %v4120_v7  ;;  %v3280_v17 = vadd.f32 %v5364_v42, %v3151_v48  ;;  %v975_v50 = vsel %vm974_vm5, %v5592_v25, %v971_v46 }
 0x165   :  { %v3679_v58 = vmul.f32 -1.442695, %v397_v14  ;;  %v7094_v26 = vsub.f32 1.0, %v5481_v45  ;;  %v3952_v10 = vpop.eup %3951  ;;  %v5742_v30 = vmul.f32 %v4675_v36, %v474_v51  ;;  %v1924_v37 = vcvt.s32.f32 %v1793_v43 }
 0x166   :  { %v980_v39 = vsel %vm977_vm6, %v979_v57, %v975_v50  ;;  %v1894_v2 = vcvt.s32.f32 %v1763_v62  ;;  %v3344_v20 = vadd.f32 %v3280_v17, %v2849_v47  ;;  %v5745_v52 = vadd.f32 1.0, %v3952_v10 }
 0x167   :  { %v1420_v28 = vmul.f32 %v5476_v31, %v7094_v26  ;;  %v2993_v42 = vmul.f32 %v980_v39, %v980_v39  ;;  %v2929_v25 = vmul.f32 %v4704_v3, %v980_v39  ;;  %3955 = vpow2.f32 %v3679_v58  ;;  %v2762_v39 = vpop.f32.mrf.mxu1 }
 0x168   :  { %v1995_v45 = vmul.f32 %v4136_v21, %v1924_v37  ;;  %v1965_v9 = vmul.f32 %v4136_v21, %v1894_v2  ;;  %v3409_v51 = vadd.f32 %v4724_v38, %v3344_v20  ;;  %3957 = vrcp.f32 %v5745_v52 }
 0x169   :  { %v3058_v13 = vmul.f32 %v4712_v4, %v2993_v42  ;;  %v1421_v8 = vadd.f32 %v5476_v31, %v1420_v28  ;;  %v5754_v55 = vpop.eup %3953  ;;  %vm1422_vm7 = vweird.f32 %v5451_v27  ;;  %vm1423_vm8 = vweird.f32 %v5476_v31 }
 0x16a   :  { %v2059_v63 = vfloor.f32 %v1995_v45  ;;  %v2029_v41 = vfloor.f32 %v1965_v9  ;;  %3473 = vst [vmem:[%s7061_s3 + $0x150] sm:$0xff] %v3409_v51  ;;  %v1426_v48 = vand.u32 2147483647, %v5451_v27  ;;  %v1428_v46 = vand.u32 2147483648, %v5451_v27  ;;  %vm1424_vm9 = vmor %vm1422_vm7, %vm1423_vm8 }
 0x16b   :  { %v3122_v34 = vadd.f32 %v3058_v13, %v2929_v25  ;;  %v477_v43 = vadd.f32 %v476_v61, %v4580_v60  ;;  %v5768_v58 = vmul.f32 %v4675_v36, %v397_v14  ;;  %v1425_v26 = vsel %vm1424_vm9, %v5476_v31, %v1421_v8 }
 0x16c   :  { %v2123_v47 = vmul.f32 16.0, %v2059_v63  ;;  %v2251_v57 = vmul.f32 %v2059_v63, %v4136_v21  ;;  %v2093_v62 = vmul.f32 16.0, %v2029_v41  ;;  %v2221_v17 = vmul.f32 %v2029_v41, %v4136_v21 }
 0x16d   :  { %v3251_v50 = vadd.f32 %v5552_v44, %v3122_v34  ;;  %v1429_v28 = vor.u32 1.1754944e-38, %v1428_v46  ;;  %v3956_v10 = vpop.eup %3955  ;;  %v5773_v27 = vmul.f32 %v5754_v55, %v5711_v11  ;;  %vm1427_vm10 = vcmp.eq.f32.partialorder %v1426_v48, 8.507059e+37 }
 0x16e   :  { %v2315_v20 = vfloor.f32 %v2251_v57  ;;  %v2285_v42 = vfloor.f32 %v2221_v17  ;;  %v5775_v25 = vpop.eup %3957  ;;  %v5777_v9 = vadd.f32 1.0, %v3956_v10  ;;  %v3711_v14 = vmul.f32 -1.442695, %v477_v43 }
 0x16f   :  { %v3315_v45 = vadd.f32 %v3251_v50, %v2762_v39  ;;  %v1430_v44 = vsel %vm1427_vm10, %v1429_v28, %v1425_v26  ;;  %v2187_v61 = vsub.f32 %v1924_v37, %v2123_v47  ;;  %v2157_v31 = vsub.f32 %v1894_v2, %v2093_v62  ;;  %v398_v50 = vpop.f32.mrf.mxu0 }
 0x170   :  { %v2379_v51 = vmul.f32 16.0, %v2315_v20  ;;  %v2349_v13 = vmul.f32 16.0, %v2285_v42  ;;  %v5781_v8 = vmul.f32 %v5775_v25, %v5745_v52  ;;  %3959 = vrcp.f32 %v5777_v9  ;;  %v2852_v42 = vpop.f32.mrf.mxu3 }
 0x171   :  { %v3380_v34 = vadd.f32 %v4724_v38, %v3315_v45  ;;  %v3023_v48 = vmul.f32 %v1430_v44, %v1430_v44  ;;  %v2959_v17 = vmul.f32 %v4704_v3, %v1430_v44  ;;  %3961 = vpow2.f32 %v3711_v14 }
 0x172   :  { %v2443_v46 = vsub.f32 %v2059_v63, %v2379_v51  ;;  %v2413_v57 = vsub.f32 %v2029_v41, %v2349_v13  ;;  %v7095_v2 = vsub.f32 1.0, %v5676_v54  ;;  %vm987_vm11 = vweird.f32 %v5631_v40 }
 0x173   :  { %3444 = vst [vmem:[%s7061_s3 + $0x68] sm:$0xff] %v3380_v34  ;;  %v3088_v37 = vmul.f32 %v4712_v4, %v3023_v48  ;;  %vm988_vm12 = vweird.f32 %v5664_v15  ;;  %v991_v62 = vand.u32 2147483647, %v5631_v40  ;;  %v993_v26 = vand.u32 2147483648, %v5631_v40 }
 0x174   :  { %v985_v47 = vmul.f32 %v5664_v15, %v7095_v2  ;;  %v2508_v63 = vsel %vm2448_vm2, %v2187_v61, %v2443_v46  ;;  %v2478_v41 = vsel %vm2448_vm2, %v2157_v31, %v2413_v57  ;;  %v399_v10 = vadd.f32 %v398_v50, %v4580_v60  ;;  %vm989_vm13 = vmor %vm987_vm11, %vm988_vm12 }
 0x175   :  { %3786 = vmatmul.msk.f32.gmra.mxu3 %vm2513_vm3, %v2508_v63  ;;  %3756 = vmatmul.msk.f32.gmra.mxu1 %vm2513_vm3, %v2478_v41  ;;  %v3152_v54 = vadd.f32 %v3088_v37, %v2959_v17  ;;  %v1794_v39 = vadd.s32 480, %v4120_v7  ;;  %vm992_vm0 = vcmp.eq.f32.partialorder %v991_v62, 8.507059e+37  ;;  %v994_v45 = vor.u32 1.1754944e-38, %v993_v26 }
 0x176   :  { %v986_v28 = vadd.f32 %v5664_v15, %v985_v47  ;;  %v1764_v44 = vadd.s32 240, %v4120_v7  ;;  %v5808_v40 = vpop.eup %3959  ;;  %v3680_v51 = vmul.f32 -1.442695, %v399_v10  ;;  %v7096_v31 = vsub.f32 1.0, %v5565_v56 }
 0x177   :  { %v3281_v14 = vadd.f32 %v5445_v19, %v3152_v54  ;;  %v3962_v34 = vpop.eup %3961  ;;  %v5816_v48 = vmul.f32 %v4675_v36, %v477_v43  ;;  %v1925_v57 = vcvt.s32.f32 %v1794_v39  ;;  %v5821_v37 = vmul.f32 %v5808_v40, %v5777_v9  ;;  %v478_v43 = vpop.f32.mrf.mxu2 }
 0x178   :  { %v990_v61 = vsel %vm989_vm13, %v5664_v15, %v986_v28  ;;  %v1435_v13 = vmul.f32 %v5559_v49, %v7096_v31  ;;  %v1895_v17 = vcvt.s32.f32 %v1764_v44  ;;  %v5823_v2 = vadd.f32 1.0, %v3962_v34 }
 0x179   :  { %v995_v46 = vsel %vm992_vm0, %v994_v45, %v990_v61  ;;  %v3345_v19 = vadd.f32 %v3281_v14, %v2852_v42  ;;  %3963 = vpow2.f32 %v3680_v51  ;;  %v1996_v56 = vmul.f32 %v4136_v21, %v1925_v57 }
 0x17a   :  { %v2994_v15 = vmul.f32 %v995_v46, %v995_v46  ;;  %v1966_v47 = vmul.f32 %v4136_v21, %v1895_v17  ;;  %v2930_v41 = vmul.f32 %v4704_v3, %v995_v46  ;;  %v1436_v26 = vadd.f32 %v5559_v49, %v1435_v13 }
 0x17b   :  { %v3410_v63 = vadd.f32 %v4724_v38, %v3345_v19  ;;  %v2060_v54 = vfloor.f32 %v1996_v56  ;;  %vm1437_vm14 = vweird.f32 %v5521_v5  ;;  %vm1438_vm15 = vweird.f32 %v5559_v49 }
 0x17c   :  { %v3059_v62 = vmul.f32 %v4712_v4, %v2994_v15  ;;  %v2030_v28 = vfloor.f32 %v1966_v47  ;;  %v1441_v42 = vand.u32 2147483647, %v5521_v5  ;;  %v1443_v45 = vand.u32 2147483648, %v5521_v5  ;;  %vm1439_vm1 = vmor %vm1437_vm14, %vm1438_vm15  ;;  %v2765_v15 = vpop.f32.mrf.mxu1 }
 0x17d   :  { %3474 = vst [vmem:[%s7061_s3 + $0x158] sm:$0xff] %v3410_v63  ;;  %v479_v44 = vadd.f32 %v478_v43, %v4580_v60  ;;  %v2124_v14 = vmul.f32 16.0, %v2060_v54  ;;  %v2252_v61 = vmul.f32 %v2060_v54, %v4136_v21  ;;  %3965 = vrcp.f32 %v5823_v2 }
 0x17e   :  { %v3123_v39 = vadd.f32 %v3059_v62, %v2930_v41  ;;  %v2094_v51 = vmul.f32 16.0, %v2030_v28  ;;  %v2222_v31 = vmul.f32 %v2030_v28, %v4136_v21  ;;  %v1440_v34 = vsel %vm1439_vm1, %v5559_v49, %v1436_v26 }
 0x17f   :  { %v1444_v46 = vor.u32 1.1754944e-38, %v1443_v45  ;;  %v3964_v19 = vpop.eup %3963  ;;  %v5845_v5 = vmul.f32 %v4675_v36, %v399_v10  ;;  %v2316_v56 = vfloor.f32 %v2252_v61  ;;  %vm1442_vm4 = vcmp.eq.f32.partialorder %v1441_v42, 8.507059e+37  ;;  %v401_v61 = vpop.f32.mrf.mxu0 }
 0x180   :  { %v3252_v13 = vadd.f32 %v5629_v23, %v3123_v39  ;;  %v2286_v47 = vfloor.f32 %v2222_v31  ;;  %v5847_v63 = vadd.f32 1.0, %v3964_v19  ;;  %v3712_v62 = vmul.f32 -1.442695, %v479_v44 }
 0x181   :  { %v1445_v41 = vsel %vm1442_vm4, %v1444_v46, %v1440_v34  ;;  %v2188_v50 = vsub.f32 %v1925_v57, %v2124_v14  ;;  %v2380_v1 = vmul.f32 16.0, %v2316_v56  ;;  %v2158_v20 = vsub.f32 %v1895_v17, %v2094_v51 }
 0x182   :  { %v3316_v43 = vadd.f32 %v3252_v13, %v2765_v15  ;;  %v2350_v23 = vmul.f32 16.0, %v2286_v47  ;;  %v1014_v49 = vsub.f32 1.0, %v5821_v37  ;;  %3967 = vrcp.f32 %v5847_v63 }
 0x183   :  { %v3024_v10 = vmul.f32 %v1445_v41, %v1445_v41  ;;  %v2444_v39 = vsub.f32 %v2060_v54, %v2380_v1  ;;  %v2960_v42 = vmul.f32 %v4704_v3, %v1445_v41  ;;  %3969 = vpow2.f32 %v3712_v62  ;;  %v5853_v31 = vpop.eup %3965 }
 0x184   :  { %v3381_v26 = vadd.f32 %v4724_v38, %v3316_v43  ;;  %v2414_v45 = vsub.f32 %v2030_v28, %v2350_v23  ;;  %v7097_v17 = vsub.f32 1.0, %v5773_v27  ;;  %vm1002_vm5 = vweird.f32 %v5711_v11 }
 0x185   :  { %v3089_v57 = vmul.f32 %v4712_v4, %v3024_v10  ;;  %vm1003_vm6 = vweird.f32 %v5754_v55  ;;  %v2509_v1 = vsel %vm2448_vm2, %v2188_v50, %v2444_v39  ;;  %v1006_v28 = vand.u32 2147483647, %v5711_v11 }
 0x186   :  { %3445 = vst [vmem:[%s7061_s3 + $0x70] sm:$0xff] %v3381_v26  ;;  %v1000_v14 = vmul.f32 %v5754_v55, %v7097_v17  ;;  %v2479_v54 = vsel %vm2448_vm2, %v2158_v20, %v2414_v45  ;;  %v1008_v51 = vand.u32 2147483648, %v5711_v11  ;;  %3787 = vmatmul.msk.f32.gmra.mxu3 %vm2513_vm3, %v2509_v1  ;;  %v402_v34 = vadd.f32 %v401_v61, %v4580_v60  ;;  %v2855_v20 = vpop.f32.mrf.mxu3  ;;  %vm1004_vm7 = vmor %vm1002_vm5, %vm1003_vm6 }
 0x187   :  { %3757 = vmatmul.msk.f32.gmra.mxu1 %vm2513_vm3, %v2479_v54  ;;  %v3153_v27 = vadd.f32 %v3089_v57, %v2960_v42  ;;  %v1795_v46 = vadd.s32 488, %v4120_v7  ;;  %v5877_v50 = vmul.f32 %v5853_v31, %v5823_v2  ;;  %vm1007_vm8 = vcmp.eq.f32.partialorder %v1006_v28, 8.507059e+37 }
 0x188   :  { %v1001_v13 = vadd.f32 %v5754_v55, %v1000_v14  ;;  %v1009_v19 = vor.u32 1.1754944e-38, %v1008_v51  ;;  %v1765_v11 = vadd.s32 248, %v4120_v7  ;;  %v5880_v15 = vpop.eup %3967  ;;  %v3681_v43 = vmul.f32 -1.442695, %v402_v34 }
 0x189   :  { %v3282_v56 = vadd.f32 %v5517_v22, %v3153_v27  ;;  %v7098_v41 = vsub.f32 1.0, %v5661_v24  ;;  %v3970_v23 = vpop.eup %3969  ;;  %v5888_v26 = vmul.f32 %v4675_v36, %v479_v44  ;;  %v1926_v39 = vcvt.s32.f32 %v1795_v46  ;;  %v481_v44 = vpop.f32.mrf.mxu2 }
 0x18a   :  { %v1005_v47 = vsel %vm1004_vm7, %v5754_v55, %v1001_v13  ;;  %v1896_v45 = vcvt.s32.f32 %v1765_v11  ;;  %v5892_v42 = vmul.f32 %v5880_v15, %v5847_v63  ;;  %v5894_v22 = vadd.f32 1.0, %v3970_v23 }
 0x18b   :  { %v1450_v62 = vmul.f32 %v5637_v53, %v7098_v41  ;;  %v1010_v10 = vsel %vm1007_vm8, %v1009_v19, %v1005_v47  ;;  %v3346_v61 = vadd.f32 %v3282_v56, %v2855_v20  ;;  %3971 = vpow2.f32 %v3681_v43 }
 0x18c   :  { %v2995_v55 = vmul.f32 %v1010_v10, %v1010_v10  ;;  %v2931_v57 = vmul.f32 %v4704_v3, %v1010_v10  ;;  %v1997_v24 = vmul.f32 %v4136_v21, %v1926_v39  ;;  %v1967_v17 = vmul.f32 %v4136_v21, %v1896_v45 }
 0x18d   :  { %v3411_v14 = vadd.f32 %v4724_v38, %v3346_v61  ;;  %3973 = vrcp.f32 %v5894_v22  ;;  %v1451_v54 = vadd.f32 %v5637_v53, %v1450_v62  ;;  %vm1452_vm9 = vweird.f32 %v5607_v35  ;;  %v2768_v61 = vpop.f32.mrf.mxu1 }
 0x18e   :  { %v3060_v1 = vmul.f32 %v4712_v4, %v2995_v55  ;;  %v2061_v28 = vfloor.f32 %v1997_v24  ;;  %v2031_v51 = vfloor.f32 %v1967_v17  ;;  %vm1453_vm10 = vweird.f32 %v5637_v53 }
 0x18f   :  { %3475 = vst [vmem:[%s7061_s3 + $0x160] sm:$0xff] %v3411_v14  ;;  %v1456_v13 = vand.u32 2147483647, %v5607_v35  ;;  %v1458_v46 = vand.u32 2147483648, %v5607_v35  ;;  %v482_v20 = vadd.f32 %v481_v44, %v4580_v60  ;;  %vm1454_vm11 = vmor %vm1452_vm9, %vm1453_vm10  ;;  %v5917_v35 = vmul.f32 %v4675_v36, %v402_v34 }
 0x190   :  { %v3124_v27 = vadd.f32 %v3060_v1, %v2931_v57  ;;  %v2125_v19 = vmul.f32 16.0, %v2061_v28  ;;  %v2253_v11 = vmul.f32 %v2061_v28, %v4136_v21  ;;  %v2095_v56 = vmul.f32 16.0, %v2031_v51 }
 0x191   :  { %v2223_v47 = vmul.f32 %v2031_v51, %v4136_v21  ;;  %v1455_v62 = vsel %vm1454_vm11, %v5637_v53, %v1451_v54  ;;  %v1459_v23 = vor.u32 1.1754944e-38, %v1458_v46  ;;  %v3972_v10 = vpop.eup %3971  ;;  %vm1457_vm12 = vcmp.eq.f32.partialorder %v1456_v13, 8.507059e+37 }
 0x192   :  { %v3253_v41 = vadd.f32 %v5701_v18, %v3124_v27  ;;  %v2317_v55 = vfloor.f32 %v2253_v11  ;;  %v3713_v1 = vmul.f32 -1.442695, %v482_v20  ;;  %v2189_v43 = vsub.f32 %v1926_v39, %v2125_v19 }
 0x193   :  { %v2287_v57 = vfloor.f32 %v2223_v47  ;;  %v5919_v24 = vpop.eup %3973  ;;  %v1460_v14 = vsel %vm1457_vm12, %v1459_v23, %v1455_v62  ;;  %v2159_v27 = vsub.f32 %v1896_v45, %v2095_v56  ;;  %v5927_v46 = vadd.f32 1.0, %v3972_v10 }
 0x194   :  { %v3317_v44 = vadd.f32 %v3253_v41, %v2768_v61  ;;  %v2381_v18 = vmul.f32 16.0, %v2317_v55  ;;  %v5924_v54 = vmul.f32 %v5919_v24, %v5894_v22  ;;  %v3025_v13 = vmul.f32 %v1460_v14, %v1460_v14  ;;  %v403_v41 = vpop.f32.mrf.mxu0 }
 0x195   :  { %v2351_v53 = vmul.f32 16.0, %v2287_v57  ;;  %v2961_v17 = vmul.f32 %v4704_v3, %v1460_v14  ;;  %3975 = vpow2.f32 %v3713_v1  ;;  %v1015_v45 = vmul.f32 %v5808_v40, %v1014_v49 }
 0x196   :  { %v3382_v34 = vadd.f32 %v4724_v38, %v3317_v44  ;;  %v2445_v11 = vsub.f32 %v2061_v28, %v2381_v18  ;;  %v3090_v39 = vmul.f32 %v4712_v4, %v3025_v13  ;;  %vm1017_vm13 = vweird.f32 %v5777_v9 }
 0x197   :  { %v2415_v47 = vsub.f32 %v2031_v51, %v2351_v53  ;;  %vm1018_vm0 = vweird.f32 %v5808_v40  ;;  %v1021_v19 = vand.u32 2147483647, %v5777_v9  ;;  %v1023_v56 = vand.u32 2147483648, %v5777_v9 }
 0x198   :  { %3446 = vst [vmem:[%s7061_s3 + $0x78] sm:$0xff] %v3382_v34  ;;  %v2510_v28 = vsel %vm2448_vm2, %v2189_v43, %v2445_v11  ;;  %v3154_v37 = vadd.f32 %v3090_v39, %v2961_v17  ;;  %v1016_v49 = vadd.f32 %v5808_v40, %v1015_v45  ;;  %v404_v62 = vadd.f32 %v403_v41, %v4580_v60  ;;  %v2858_v43 = vpop.f32.mrf.mxu3  ;;  %vm1019_vm14 = vmor %vm1017_vm13, %vm1018_vm0  ;;  %v483_v41 = vpop.f32.mrf.mxu2 }
 0x199   :  { %v2480_v51 = vsel %vm2448_vm2, %v2159_v27, %v2415_v47  ;;  %3788 = vmatmul.msk.f32.gmra.mxu3 %vm2513_vm3, %v2510_v28  ;;  %v1796_v23 = vadd.s32 496, %v4120_v7  ;;  %3977 = vrcp.f32 %v5927_v46  ;;  %vm1022_vm15 = vcmp.eq.f32.partialorder %v1021_v19, 8.507059e+37 }
 0x19a   :  { %3758 = vmatmul.msk.f32.gmra.mxu1 %vm2513_vm3, %v2480_v51  ;;  %v1024_v10 = vor.u32 1.1754944e-38, %v1023_v56  ;;  %v1766_v61 = vadd.s32 256, %v4120_v7  ;;  %v3283_v9 = vadd.f32 %v5600_v32, %v3154_v37  ;;  %v1020_v55 = vsel %vm1019_vm14, %v5808_v40, %v1016_v49 }
 0x19b   :  { %v3682_v57 = vmul.f32 -1.442695, %v404_v62  ;;  %v7099_v17 = vsub.f32 1.0, %v5708_v6  ;;  %v3976_v14 = vpop.eup %3975  ;;  %v5958_v1 = vmul.f32 %v4675_v36, %v482_v20  ;;  %v1927_v27 = vcvt.s32.f32 %v1796_v23 }
 0x19c   :  { %v1025_v18 = vsel %vm1022_vm15, %v1024_v10, %v1020_v55  ;;  %v1897_v53 = vcvt.s32.f32 %v1766_v61  ;;  %v1509_v34 = vsub.f32 1.0, %v5924_v54  ;;  %v3347_v13 = vadd.f32 %v3283_v9, %v2858_v43 }
 0x19d   :  { %v1465_v44 = vmul.f32 %v5703_v59, %v7099_v17  ;;  %v5961_v11 = vadd.f32 1.0, %v3976_v14  ;;  %v2996_v32 = vmul.f32 %v1025_v18, %v1025_v18  ;;  %v2932_v40 = vmul.f32 %v4704_v3, %v1025_v18  ;;  %v2771_v18 = vpop.f32.mrf.mxu1 }
 0x19e   :  { %3979 = vpow2.f32 %v3682_v57  ;;  %v1998_v6 = vmul.f32 %v4136_v21, %v1927_v27  ;;  %v1968_v47 = vmul.f32 %v4136_v21, %v1897_v53  ;;  %v3412_v20 = vadd.f32 %v4724_v38, %v3347_v13 }
 0x19f   :  { %3981 = vrcp.f32 %v5961_v11  ;;  %v3061_v39 = vmul.f32 %v4712_v4, %v2996_v32  ;;  %v1466_v45 = vadd.f32 %v5703_v59, %v1465_v44  ;;  %v5970_v28 = vpop.eup %3977  ;;  %vm1467_vm1 = vweird.f32 %v5678_v12 }
 0x1a0   :  { %v2062_v51 = vfloor.f32 %v1998_v6  ;;  %v2032_v19 = vfloor.f32 %v1968_v47  ;;  %vm1468_vm4 = vweird.f32 %v5703_v59  ;;  %3476 = vst [vmem:[%s7061_s3 + $0x168] sm:$0xff] %v3412_v20  ;;  %v1471_v37 = vand.u32 2147483647, %v5678_v12 }
 0x1a1   :  { %v3125_v56 = vadd.f32 %v3061_v39, %v2932_v40  ;;  %v1473_v49 = vand.u32 2147483648, %v5678_v12  ;;  %v484_v23 = vadd.f32 %v483_v41, %v4580_v60  ;;  %vm1469_vm5 = vmor %vm1467_vm1, %vm1468_vm4  ;;  %v5984_v57 = vmul.f32 %v4675_v36, %v404_v62 }
 0x1a2   :  { %v2126_v43 = vmul.f32 16.0, %v2062_v51  ;;  %v2254_v10 = vmul.f32 %v2062_v51, %v4136_v21  ;;  %v2096_v61 = vmul.f32 16.0, %v2032_v19  ;;  %v2224_v9 = vmul.f32 %v2032_v19, %v4136_v21 }
 0x1a3   :  { %v3254_v55 = vadd.f32 %v5768_v58, %v3125_v56  ;;  %v1470_v17 = vsel %vm1469_vm5, %v5703_v59, %v1466_v45  ;;  %v1474_v44 = vor.u32 1.1754944e-38, %v1473_v49  ;;  %v5989_v12 = vmul.f32 %v5970_v28, %v5927_v46 }
 0x1a4   :  { %v3980_v14 = vpop.eup %3979  ;;  %v2318_v13 = vfloor.f32 %v2254_v10  ;;  %v2288_v32 = vfloor.f32 %v2224_v9  ;;  %vm1472_vm6 = vcmp.eq.f32.partialorder %v1471_v37, 8.507059e+37  ;;  %v3714_v62 = vmul.f32 -1.442695, %v484_v23 }
 0x1a5   :  { %v5991_v40 = vpop.eup %3981  ;;  %v3318_v6 = vadd.f32 %v3254_v55, %v2771_v18  ;;  %v5993_v47 = vadd.f32 1.0, %v3980_v14  ;;  %v1475_v58 = vsel %vm1472_vm6, %v1474_v44, %v1470_v17  ;;  %v2190_v41 = vsub.f32 %v1927_v27, %v2126_v43  ;;  %v406_v55 = vpop.f32.mrf.mxu0 }
 0x1a6   :  { %v2382_v20 = vmul.f32 16.0, %v2318_v13  ;;  %v2160_v59 = vsub.f32 %v1897_v53, %v2096_v61  ;;  %v2352_v39 = vmul.f32 16.0, %v2288_v32  ;;  %v5997_v45 = vmul.f32 %v5991_v40, %v5961_v11  ;;  %v2861_v32 = vpop.f32.mrf.mxu3 }
 0x1a7   :  { %v3383_v56 = vadd.f32 %v4724_v38, %v3318_v6  ;;  %3983 = vrcp.f32 %v5993_v47  ;;  %v3026_v37 = vmul.f32 %v1475_v58, %v1475_v58  ;;  %v2962_v9 = vmul.f32 %v4704_v3, %v1475_v58 }
 0x1a8   :  { %v2446_v49 = vsub.f32 %v2062_v51, %v2382_v20  ;;  %v2416_v10 = vsub.f32 %v2032_v19, %v2352_v39  ;;  %3985 = vpow2.f32 %v3714_v62  ;;  %v7100_v53 = vsub.f32 1.0, %v5892_v42 }
 0x1a9   :  { %3447 = vst [vmem:[%s7061_s3 + $0x80] sm:$0xff] %v3383_v56  ;;  %v3091_v27 = vmul.f32 %v4712_v4, %v3026_v37  ;;  %vm1032_vm7 = vweird.f32 %v5847_v63  ;;  %vm1033_vm8 = vweird.f32 %v5880_v15  ;;  %v1036_v61 = vand.u32 2147483647, %v5847_v63 }
 0x1aa   :  { %v1030_v43 = vmul.f32 %v5880_v15, %v7100_v53  ;;  %v2511_v51 = vsel %vm2448_vm2, %v2190_v41, %v2446_v49  ;;  %v2481_v19 = vsel %vm2448_vm2, %v2160_v59, %v2416_v10  ;;  %v1038_v17 = vand.u32 2147483648, %v5847_v63  ;;  %vm1034_vm9 = vmor %vm1032_vm7, %vm1033_vm8 }
 0x1ab   :  { %3789 = vmatmul.msk.f32.gmra.mxu3 %vm2513_vm3, %v2511_v51  ;;  %3759 = vmatmul.msk.f32.gmra.mxu1 %vm2513_vm3, %v2481_v19  ;;  %v3155_v42 = vadd.f32 %v3091_v27, %v2962_v9  ;;  %v407_v14 = vadd.f32 %v406_v55, %v4580_v60  ;;  %v1797_v18 = vadd.s32 504, %v4120_v7  ;;  %v1044_v13 = vsub.f32 1.0, %v5989_v12  ;;  %v486_v9 = vpop.f32.mrf.mxu2 }
 0x1ac   :  { %v1031_v44 = vadd.f32 %v5880_v15, %v1030_v43  ;;  %v6024_v6 = vmul.f32 %v4675_v36, %v484_v23  ;;  %v1039_v58 = vor.u32 1.1754944e-38, %v1038_v17  ;;  %v7101_v62 = vsub.f32 1.0, %v5781_v8 }
 0x1ad   :  { %v6031_v20 = vpop.eup %3983  ;;  %v3284_v59 = vadd.f32 %v5672_v0, %v3155_v42  ;;  %vm1037_vm10 = vcmp.eq.f32.partialorder %v1036_v61, 8.507059e+37  ;;  %v3683_v12 = vmul.f32 -1.442695, %v407_v14  ;;  %v1524_v23 = vsub.f32 1.0, %v5997_v45 }
 0x1ae   :  { %v1480_v41 = vmul.f32 %v5775_v25, %v7101_v62  ;;  %v1035_v7 = vsel %vm1034_vm9, %v5880_v15, %v1031_v44  ;;  %v3986_v39 = vpop.eup %3985  ;;  %v1928_v37 = vcvt.s32.f32 %v1797_v18  ;;  %vm1482_vm11 = vweird.f32 %v5745_v52 }
 0x1af   :  { %v1040_v56 = vsel %vm1037_vm10, %v1039_v58, %v1035_v7  ;;  %v3348_v63 = vadd.f32 %v3284_v59, %v2861_v32  ;;  %v6037_v49 = vadd.f32 1.0, %v3986_v39  ;;  %3987 = vpow2.f32 %v3683_v12  ;;  %v2774_v12 = vpop.f32.mrf.mxu1 }
 0x1b0   :  { %v2997_v8 = vmul.f32 %v1040_v56, %v1040_v56  ;;  %v1481_v10 = vadd.f32 %v5775_v25, %v1480_v41  ;;  %v6041_v0 = vmul.f32 %v4675_v36, %v407_v14  ;;  %v1999_v15 = vmul.f32 %v4136_v21, %v1928_v37 }
 0x1b1   :  { %vm1483_vm12 = vweird.f32 %v5775_v25  ;;  %v3413_v55 = vadd.f32 %v4724_v38, %v3348_v63  ;;  %v2933_v27 = vmul.f32 %v4704_v3, %v1040_v56  ;;  %v1486_v43 = vand.u32 2147483647, %v5745_v52 }
 0x1b2   :  { %v3062_v53 = vmul.f32 %v4712_v4, %v2997_v8  ;;  %3989 = vrcp.f32 %v6037_v49  ;;  %v2063_v51 = vfloor.f32 %v1999_v15  ;;  %vm6052_vm13 = vmor %vm1482_vm11, %vm1483_vm12  ;;  %v1488_v61 = vand.u32 2147483648, %v5745_v52  ;;  %v408_v8 = vpop.f32.mrf.mxu0 }
 0x1b3   :  { %v487_v17 = vadd.f32 %v486_v9, %v4580_v60  ;;  %v6060_v42 = vmul.f32 %v6031_v20, %v5993_v47  ;;  %3477 = vst [vmem:[%s7061_s3 + $0x170] sm:$0xff] %v3413_v55  ;;  %v1485_v14 = vsel %vm6052_vm13, %v5775_v25, %v1481_v10  ;;  %v1045_v18 = vmul.f32 %v5970_v28, %v1044_v13 }
 0x1b4   :  { %v3126_v44 = vadd.f32 %v3062_v53, %v2933_v27  ;;  %v2127_v32 = vmul.f32 16.0, %v2063_v51  ;;  %v2255_v52 = vmul.f32 %v2063_v51, %v4136_v21  ;;  %v1489_v58 = vor.u32 1.1754944e-38, %v1488_v61 }
 0x1b5   :  { %v3715_v62 = vmul.f32 -1.442695, %v487_v17  ;;  %vm1487_vm0 = vcmp.eq.f32.partialorder %v1486_v43, 8.507059e+37  ;;  %v1046_v59 = vadd.f32 %v5970_v28, %v1045_v18  ;;  %vm1047_vm14 = vweird.f32 %v5927_v46  ;;  %v3988_v7 = vpop.eup %3987 }
 0x1b6   :  { %v3255_v41 = vadd.f32 %v5845_v5, %v3126_v44  ;;  %v2319_v39 = vfloor.f32 %v2255_v52  ;;  %v1490_v56 = vsel %vm1487_vm0, %v1489_v58, %v1485_v14  ;;  %vm1048_vm15 = vweird.f32 %v5970_v28  ;;  %v2864_v52 = vpop.f32.mrf.mxu3 }
 0x1b7   :  { %3991 = vpow2.f32 %v3715_v62  ;;  %v1059_v25 = vsub.f32 1.0, %v6060_v42  ;;  %v6075_v21 = vadd.f32 1.0, %v3988_v7  ;;  %v3027_v63 = vmul.f32 %v1490_v56, %v1490_v56  ;;  %vm6086_vm1 = vmor %vm1047_vm14, %vm1048_vm15  ;;  %v488_v7 = vpop.f32.mrf.mxu2 }
 0x1b8   :  { %v3319_v13 = vadd.f32 %v3255_v41, %v2774_v12  ;;  %v6077_v5 = vpop.eup %3989  ;;  %v2191_v10 = vsub.f32 %v1928_v37, %v2127_v32  ;;  %v2383_v9 = vmul.f32 16.0, %v2319_v39  ;;  %v2963_v15 = vmul.f32 %v4704_v3, %v1490_v56 }
 0x1b9   :  { %v1051_v55 = vand.u32 2147483647, %v5927_v46  ;;  %3993 = vrcp.f32 %v6075_v21  ;;  %v3092_v53 = vmul.f32 %v4712_v4, %v3027_v63  ;;  %v1053_v19 = vand.u32 2147483648, %v5927_v46 }
 0x1ba   :  { %v3384_v27 = vadd.f32 %v4724_v38, %v3319_v13  ;;  %v2447_v37 = vsub.f32 %v2063_v51, %v2383_v9  ;;  %v6092_v61 = vmul.f32 %v4675_v36, %v487_v17  ;;  %v1050_v42 = vsel %vm6086_vm1, %v5970_v28, %v1046_v59 }
 0x1bb   :  { %v409_v44 = vadd.f32 %v408_v8, %v4580_v60  ;;  %v6100_v14 = vmul.f32 %v6077_v5, %v6037_v49  ;;  %v3156_v18 = vadd.f32 %v3092_v53, %v2963_v15  ;;  %v1054_v46 = vor.u32 1.1754944e-38, %v1053_v19 }
 0x1bc   :  { %3448 = vst [vmem:[%s7061_s3 + $0x88] sm:$0xff] %v3384_v27  ;;  %v7106_v51 = vsub.f32 1.0, %v5877_v50  ;;  %v2512_v28 = vsel %vm2448_vm2, %v2191_v10, %v2447_v37  ;;  %vm1052_vm4 = vcmp.eq.f32.partialorder %v1051_v55, 8.507059e+37  ;;  %vm1498_vm5 = vweird.f32 %v5853_v31 }
 0x1bd   :  { %v3992_v32 = vpop.eup %3991  ;;  %v3684_v58 = vmul.f32 -1.442695, %v409_v44  ;;  %3790 = vmatmul.msk.f32.gmra.mxu3 %vm2513_vm3, %v2512_v28  ;;  %v3285_v62 = vadd.f32 %v5742_v30, %v3156_v18  ;;  %v1055_v59 = vsel %vm1052_vm4, %v1054_v46, %v1050_v42  ;;  %vm1497_vm6 = vweird.f32 %v5823_v2  ;;  %v411_v46 = vpop.f32.mrf.mxu0 }
 0x1be   :  { %v1495_v17 = vmul.f32 %v5853_v31, %v7106_v51  ;;  %v6113_v41 = vadd.f32 1.0, %v3992_v32  ;;  %v2998_v12 = vmul.f32 %v1055_v59, %v1055_v59  ;;  %v1501_v33 = vand.u32 2147483647, %v5823_v2  ;;  %vm6124_vm2 = vmor %vm1497_vm6, %vm1498_vm5  ;;  %v2777_v28 = vpop.f32.mrf.mxu1 }
 0x1bf   :  { %3995 = vpow2.f32 %v3684_v58  ;;  %v6118_v39 = vpop.eup %3993  ;;  %v1539_v56 = vsub.f32 1.0, %v6100_v14  ;;  %v3349_v13 = vadd.f32 %v3285_v62, %v2864_v52  ;;  %v1503_v63 = vand.u32 2147483648, %v5823_v2 }
 0x1c0   :  { %v1496_v50 = vadd.f32 %v5853_v31, %v1495_v17  ;;  %3997 = vrcp.f32 %v6113_v41  ;;  %v2934_v8 = vmul.f32 %v4704_v3, %v1055_v59  ;;  %v3063_v10 = vmul.f32 %v4712_v4, %v2998_v12 }
 0x1c1   :  { %v6135_v15 = vadd.f32 %v488_v7, %v4580_v60  ;;  %v1073_v55 = vmul.f32 %v6118_v39, %v6075_v21  ;;  %v3414_v27 = vadd.f32 %v4724_v38, %v3349_v13  ;;  %v1504_v53 = vor.u32 1.1754944e-38, %v1503_v63 }
 0x1c2   :  { %v1500_v9 = vsel %vm6124_vm2, %v5853_v31, %v1496_v50  ;;  %v1060_v43 = vmul.f32 %v6031_v20, %v1059_v25  ;;  %v3127_v2 = vadd.f32 %v3063_v10, %v2934_v8  ;;  %v6142_v19 = vmul.f32 %v4675_v36, %v409_v44  ;;  %v2867_v10 = vpop.f32.mrf.mxu3 }
 0x1c3   :  { %vm1502_vm3 = vcmp.eq.f32.partialorder %v1501_v33, 8.507059e+37  ;;  %v3716_v37 = vmul.f32 -1.442695, %v6135_v15  ;;  %3478 = vst [vmem:[%s7061_s3 + $0x178] sm:$0xff] %v3414_v27  ;;  %vm1063_vm7 = vweird.f32 %v6031_v20  ;;  %v1066_v18 = vand.u32 2147483647, %v5993_v47 }
 0x1c4   :  { %v1505_v31 = vsel %vm1502_vm3, %v1504_v53, %v1500_v9  ;;  %v1061_v42 = vadd.f32 %v6031_v20, %v1060_v43  ;;  %v3256_v51 = vadd.f32 %v5917_v35, %v3127_v2  ;;  %vm1062_vm8 = vweird.f32 %v5993_v47 }
 0x1c5   :  { %v3996_v25 = vpop.eup %3995  ;;  %v3028_v44 = vmul.f32 %v1505_v31, %v1505_v31  ;;  %3999 = vpow2.f32 %v3716_v37  ;;  %v1074_v32 = vsub.f32 1.0, %v1073_v55  ;;  %v2964_v58 = vmul.f32 %v4704_v3, %v1505_v31  ;;  %vm6158_vm9 = vmor %vm1062_vm8, %vm1063_vm7  ;;  %v491_v55 = vpop.f32.mrf.mxu2 }
 0x1c6   :  { %v6153_v17 = vpop.eup %3997  ;;  %v6155_v52 = vadd.f32 1.0, %v3996_v25  ;;  %v1068_v59 = vand.u32 2147483648, %v5993_v47  ;;  %v3320_v50 = vadd.f32 %v3256_v51, %v2777_v28  ;;  %v1065_v7 = vsel %vm6158_vm9, %v6031_v20, %v1061_v42 }
 0x1c7   :  { %v3093_v35 = vmul.f32 %v4712_v4, %v3028_v44  ;;  %v412_v12 = vadd.f32 %v411_v46, %v4580_v60  ;;  %vm1067_vm10 = vcmp.eq.f32.partialorder %v1066_v18, 8.507059e+37  ;;  %v1510_v13 = vmul.f32 %v5919_v24, %v1509_v34 }
 0x1c8   :  { %4001 = vrcp.f32 %v6155_v52  ;;  %v1069_v33 = vor.u32 1.1754944e-38, %v1068_v59  ;;  %v6174_v47 = vmul.f32 %v6153_v17, %v6113_v41  ;;  %v3385_v30 = vadd.f32 %v4724_v38, %v3320_v50 }
 0x1c9   :  { %v3157_v63 = vadd.f32 %v3093_v35, %v2964_v58  ;;  %v3685_v8 = vmul.f32 -1.442695, %v412_v12  ;;  %v1511_v9 = vadd.f32 %v5919_v24, %v1510_v13  ;;  %vm1512_vm11 = vweird.f32 %v5894_v22 }
 0x1ca   :  { %v1070_v20 = vsel %vm1067_vm10, %v1069_v33, %v1065_v7  ;;  %vm1513_vm12 = vweird.f32 %v5919_v24  ;;  %3449 = vst [vmem:[%s7061_s3 + $0x90] sm:$0xff] %v3385_v30  ;;  %v1516_v31 = vand.u32 2147483647, %v5894_v22  ;;  %v1518_v42 = vand.u32 2147483648, %v5894_v22  ;;  %v2780_v30 = vpop.f32.mrf.mxu1 }
 0x1cb   :  { %v4000_v54 = vpop.eup %3999  ;;  %v3286_v34 = vadd.f32 %v5816_v48, %v3157_v63  ;;  %v2935_v27 = vmul.f32 %v4704_v3, %v1070_v20  ;;  %v2999_v53 = vmul.f32 %v1070_v20, %v1070_v20  ;;  %4003 = vpow2.f32 %v3685_v8  ;;  %vm6185_vm13 = vmor %vm1512_vm11, %vm1513_vm12 }
 0x1cc   :  { %v6189_v2 = vadd.f32 1.0, %v4000_v54  ;;  %v1515_v37 = vsel %vm6185_vm13, %v5919_v24, %v1511_v9  ;;  %v492_v46 = vadd.f32 %v491_v55, %v4580_v60  ;;  %v1075_v25 = vmul.f32 %v6118_v39, %v1074_v32  ;;  %v413_v32 = vpop.f32.mrf.mxu0 }
 0x1cd   :  { %v3350_v18 = vadd.f32 %v3286_v34, %v2867_v10  ;;  %v3064_v48 = vmul.f32 %v4712_v4, %v2999_v53  ;;  %v1554_v44 = vsub.f32 1.0, %v6174_v47  ;;  %v6205_v24 = vmul.f32 %v4675_v36, %v6135_v15 }
 0x1ce   :  { %v6199_v51 = vpop.eup %4001  ;;  %4005 = vrcp.f32 %v6189_v2  ;;  %v1519_v28 = vor.u32 1.1754944e-38, %v1518_v42  ;;  %vm1517_vm0 = vcmp.eq.f32.partialorder %v1516_v31, 8.507059e+37  ;;  %v3717_v62 = vmul.f32 -1.442695, %v492_v46  ;;  %v2870_v42 = vpop.f32.mrf.mxu3 }
 0x1cf   :  { %v3415_v22 = vadd.f32 %v4724_v38, %v3350_v18  ;;  %v3128_v58 = vadd.f32 %v3064_v48, %v2935_v27  ;;  %v1076_v50 = vadd.f32 %v6118_v39, %v1075_v25  ;;  %vm1077_vm14 = vweird.f32 %v6075_v21 }
 0x1d0   :  { %v1520_v59 = vsel %vm1517_vm0, %v1519_v28, %v1515_v37  ;;  %vm1078_vm15 = vweird.f32 %v6118_v39  ;;  %v1088_v7 = vmul.f32 %v6199_v51, %v6155_v52  ;;  %v6218_v33 = vmul.f32 %v4675_v36, %v412_v12 }
 0x1d1   :  { %v4004_v35 = vpop.eup %4003  ;;  %3479 = vst [vmem:[%s7061_s3 + $0x180] sm:$0xff] %v3415_v22  ;;  %v3257_v15 = vadd.f32 %v5984_v57, %v3128_v58  ;;  %v3029_v13 = vmul.f32 %v1520_v59, %v1520_v59  ;;  %v2965_v8 = vmul.f32 %v4704_v3, %v1520_v59  ;;  %4007 = vpow2.f32 %v3717_v62  ;;  %vm6229_vm1 = vmor %vm1077_vm14, %vm1078_vm15 }
 0x1d2   :  { %v6220_v63 = vadd.f32 1.0, %v4004_v35  ;;  %v1081_v10 = vand.u32 2147483647, %v6075_v21  ;;  %v1083_v12 = vand.u32 2147483648, %v6075_v21  ;;  %v414_v55 = vadd.f32 %v413_v32, %v4580_v60 }
 0x1d3   :  { %v3321_v20 = vadd.f32 %v3257_v15, %v2780_v30  ;;  %v3094_v9 = vmul.f32 %v4712_v4, %v3029_v13  ;;  %v6239_v34 = vmul.f32 %v4675_v36, %v492_v46  ;;  %v1080_v27 = vsel %vm6229_vm1, %v6118_v39, %v1076_v50  ;;  %v493_v39 = vpop.f32.mrf.mxu2 }
 0x1d4   :  { %v6235_v54 = vpop.eup %4005  ;;  %4009 = vrcp.f32 %v6220_v63  ;;  %v1525_v53 = vmul.f32 %v5991_v40, %v1524_v23  ;;  %v1089_v43 = vsub.f32 1.0, %v1088_v7  ;;  %v1084_v31 = vor.u32 1.1754944e-38, %v1083_v12 }
 0x1d5   :  { %v3386_v21 = vadd.f32 %v4724_v38, %v3321_v20  ;;  %v3158_v37 = vadd.f32 %v3094_v9, %v2965_v8  ;;  %vm1082_vm4 = vcmp.eq.f32.partialorder %v1081_v10, 8.507059e+37  ;;  %v3686_v18 = vmul.f32 -1.442695, %v414_v55 }
 0x1d6   :  { %v1526_v48 = vadd.f32 %v5991_v40, %v1525_v53  ;;  %vm1528_vm5 = vweird.f32 %v5991_v40  ;;  %v6252_v46 = vmul.f32 %v6235_v54, %v6189_v2  ;;  %v1085_v23 = vsel %vm1082_vm4, %v1084_v31, %v1080_v27  ;;  %v2783_v31 = vpop.f32.mrf.mxu1 }
 0x1d7   :  { %3450 = vst [vmem:[%s7061_s3 + $0x98] sm:$0xff] %v3386_v21  ;;  %v3287_v45 = vadd.f32 %v5888_v26, %v3158_v37  ;;  %vm1527_vm6 = vweird.f32 %v5961_v11  ;;  %v4008_v25 = vpop.eup %4007  ;;  %v3000_v28 = vmul.f32 %v1085_v23, %v1085_v23  ;;  %4011 = vpow2.f32 %v3686_v18 }
 0x1d8   :  { %v6260_v22 = vmul.f32 %v4675_v36, %v414_v55  ;;  %v1531_v58 = vand.u32 2147483647, %v5961_v11  ;;  %v6263_v59 = vadd.f32 1.0, %v4008_v25  ;;  %v2936_v50 = vmul.f32 %v4704_v3, %v1085_v23  ;;  %vm6268_vm2 = vmor %vm1527_vm6, %vm1528_vm5  ;;  %v416_v55 = vpop.f32.mrf.mxu0 }
 0x1d9   :  { %v3351_v62 = vadd.f32 %v3287_v45, %v2870_v42  ;;  %v1533_v32 = vand.u32 2147483648, %v5961_v11  ;;  %v3065_v7 = vmul.f32 %v4712_v4, %v3000_v28  ;;  %v1530_v15 = vsel %vm6268_vm2, %v5991_v40, %v1526_v48 }
 0x1da   :  { %v6273_v35 = vpop.eup %4009  ;;  %v494_v13 = vadd.f32 %v493_v39, %v4580_v60  ;;  %v1090_v30 = vmul.f32 %v6199_v51, %v1089_v43  ;;  %v1569_v8 = vsub.f32 1.0, %v6252_v46  ;;  %4013 = vrcp.f32 %v6263_v59 }
 0x1db   :  { %v3416_v10 = vadd.f32 %v4724_v38, %v3351_v62  ;;  %v1534_v20 = vor.u32 1.1754944e-38, %v1533_v32  ;;  %v3129_v11 = vadd.f32 %v3065_v7, %v2936_v50  ;;  %vm1532_vm3 = vcmp.eq.f32.partialorder %v1531_v58, 8.507059e+37  ;;  %v2873_v32 = vpop.f32.mrf.mxu3  ;;  %v496_v7 = vpop.f32.mrf.mxu2 }
 0x1dc   :  { %v3718_v9 = vmul.f32 -1.442695, %v494_v13  ;;  %v1091_v57 = vadd.f32 %v6199_v51, %v1090_v30  ;;  %v1103_v12 = vmul.f32 %v6273_v35, %v6220_v63  ;;  %vm1092_vm7 = vweird.f32 %v6155_v52 }
 0x1dd   :  { %3480 = vst [vmem:[%s7061_s3 + $0x188] sm:$0xff] %v3416_v10  ;;  %v1535_v40 = vsel %vm1532_vm3, %v1534_v20, %v1530_v15  ;;  %vm1093_vm8 = vweird.f32 %v6199_v51  ;;  %v4012_v27 = vpop.eup %4011  ;;  %v3258_v53 = vadd.f32 %v6041_v0, %v3129_v11  ;;  %v1096_v37 = vand.u32 2147483647, %v6155_v52 }
 0x1de   :  { %v3030_v43 = vmul.f32 %v1535_v40, %v1535_v40  ;;  %4015 = vpow2.f32 %v3718_v9  ;;  %vm6293_vm9 = vmor %vm1092_vm7, %vm1093_vm8  ;;  %v6298_v42 = vadd.f32 1.0, %v4012_v27  ;;  %v2966_v18 = vmul.f32 %v4704_v3, %v1535_v40 }
 0x1df   :  { %v1095_v48 = vsel %vm6293_vm9, %v6199_v51, %v1091_v57  ;;  %v1098_v45 = vand.u32 2147483648, %v6155_v52  ;;  %v3322_v0 = vadd.f32 %v3258_v53, %v2783_v31  ;;  %v417_v39 = vadd.f32 %v416_v55, %v4580_v60 }
 0x1e0   :  { %v3095_v23 = vmul.f32 %v4712_v4, %v3030_v43  ;;  %v1540_v25 = vmul.f32 %v6077_v5, %v1539_v56  ;;  %v6310_v28 = vpop.eup %4013  ;;  %4017 = vrcp.f32 %v6298_v42  ;;  %v6314_v58 = vmul.f32 %v4675_v36, %v494_v13 }
 0x1e1   :  { %v1099_v62 = vor.u32 1.1754944e-38, %v1098_v45  ;;  %vm1543_vm10 = vweird.f32 %v6077_v5  ;;  %v3387_v52 = vadd.f32 %v4724_v38, %v3322_v0  ;;  %vm1097_vm11 = vcmp.eq.f32.partialorder %v1096_v37, 8.507059e+37 }
 0x1e2   :  { %v3159_v51 = vadd.f32 %v3095_v23, %v2966_v18  ;;  %v3687_v50 = vmul.f32 -1.442695, %v417_v39  ;;  %v1104_v26 = vsub.f32 1.0, %v1103_v12  ;;  %v1541_v56 = vadd.f32 %v6077_v5, %v1540_v25 }
 0x1e3   :  { %v1100_v14 = vsel %vm1097_vm11, %v1099_v62, %v1095_v48  ;;  %vm1542_vm12 = vweird.f32 %v6037_v49  ;;  %v6322_v13 = vmul.f32 %v6310_v28, %v6263_v59  ;;  %3451 = vst [vmem:[%s7061_s3 + $0xa0] sm:$0xff] %v3387_v52  ;;  %v1546_v11 = vand.u32 2147483647, %v6037_v49  ;;  %v418_v62 = vpop.f32.mrf.mxu0  ;;  %v2876_v47 = vpop.f32.mrf.mxu3 }
 0x1e4   :  { %v4016_v15 = vpop.eup %4015  ;;  %v3288_v30 = vadd.f32 %v5958_v1, %v3159_v51  ;;  %v3001_v10 = vmul.f32 %v1100_v14, %v1100_v14  ;;  %vm6330_vm13 = vmor %vm1542_vm12, %vm1543_vm10  ;;  %v2937_v57 = vmul.f32 %v4704_v3, %v1100_v14  ;;  %4019 = vpow2.f32 %v3687_v50  ;;  %v2786_v50 = vpop.f32.mrf.mxu1 }
 0x1e5   :  { %v6335_v9 = vadd.f32 1.0, %v4016_v15  ;;  %v1545_v12 = vsel %vm6330_vm13, %v6077_v5, %v1541_v56  ;;  %v1548_v55 = vand.u32 2147483648, %v6037_v49  ;;  %v497_v27 = vadd.f32 %v496_v7, %v4580_v60 }
 0x1e6   :  { %v3352_v40 = vadd.f32 %v3288_v30, %v2873_v32  ;;  %v3066_v1 = vmul.f32 %v4712_v4, %v3001_v10  ;;  %v6344_v53 = vpop.eup %4017  ;;  %v1105_v43 = vmul.f32 %v6273_v35, %v1104_v26  ;;  %vm1107_vm0 = vweird.f32 %v6220_v63 }
 0x1e7   :  { %4021 = vrcp.f32 %v6335_v9  ;;  %vm1108_vm14 = vweird.f32 %v6273_v35  ;;  %v6352_v37 = vmul.f32 %v4675_v36, %v417_v39  ;;  %v1549_v31 = vor.u32 1.1754944e-38, %v1548_v55 }
 0x1e8   :  { %v3417_v21 = vadd.f32 %v4724_v38, %v3352_v40  ;;  %v3130_v5 = vadd.f32 %v3066_v1, %v2937_v57  ;;  %vm1547_vm15 = vcmp.eq.f32.partialorder %v1546_v11, 8.507059e+37  ;;  %v3719_v49 = vmul.f32 -1.442695, %v497_v27  ;;  %vm6362_vm1 = vmor %vm1107_vm0, %vm1108_vm14  ;;  %v498_v1 = vpop.f32.mrf.mxu2 }
 0x1e9   :  { %v1106_v18 = vadd.f32 %v6273_v35, %v1105_v43  ;;  %v1111_v48 = vand.u32 2147483647, %v6220_v63  ;;  %v1118_v45 = vmul.f32 %v6344_v53, %v6298_v42  ;;  %v1550_v23 = vsel %vm1547_vm15, %v1549_v31, %v1545_v12 }
 0x1ea   :  { %3481 = vst [vmem:[%s7061_s3 + $0x190] sm:$0xff] %v3417_v21  ;;  %v3259_v0 = vadd.f32 %v6142_v19, %v3130_v5  ;;  %v1113_v25 = vand.u32 2147483648, %v6220_v63  ;;  %v4020_v52 = vpop.eup %4019  ;;  %v1584_v51 = vsub.f32 1.0, %v6322_v13  ;;  %v3031_v26 = vmul.f32 %v1550_v23, %v1550_v23 }
 0x1eb   :  { %4023 = vpow2.f32 %v3719_v49  ;;  %v1110_v32 = vsel %vm6362_vm1, %v6273_v35, %v1106_v18  ;;  %v6371_v19 = vadd.f32 1.0, %v4020_v52  ;;  %v2967_v56 = vmul.f32 %v4704_v3, %v1550_v23 }
 0x1ec   :  { %v3323_v14 = vadd.f32 %v3259_v0, %v2786_v50  ;;  %v1114_v7 = vor.u32 1.1754944e-38, %v1113_v25  ;;  %v3096_v63 = vmul.f32 %v4712_v4, %v3031_v26  ;;  %vm1112_vm4 = vcmp.eq.f32.partialorder %v1111_v48, 8.507059e+37 }
 0x1ed   :  { %v6374_v15 = vpop.eup %4021  ;;  %v6378_v30 = vadd.f32 %v418_v62, %v4580_v60  ;;  %v1555_v10 = vmul.f32 %v6153_v17, %v1554_v44  ;;  %v1119_v20 = vsub.f32 1.0, %v1118_v45  ;;  %4025 = vrcp.f32 %v6371_v19 }
 0x1ee   :  { %v3388_v35 = vadd.f32 %v4724_v38, %v3323_v14  ;;  %v1115_v11 = vsel %vm1112_vm4, %v1114_v7, %v1110_v32  ;;  %v3160_v57 = vadd.f32 %v3096_v63, %v2967_v56  ;;  %vm1557_vm5 = vweird.f32 %v6113_v41  ;;  %v2789_v56 = vpop.f32.mrf.mxu1 }
 0x1ef   :  { %v3002_v12 = vmul.f32 %v1115_v11, %v1115_v11  ;;  %v3688_v40 = vmul.f32 -1.442695, %v6378_v30  ;;  %v6389_v55 = vmul.f32 %v6374_v15, %v6335_v9  ;;  %v2938_v44 = vmul.f32 %v4704_v3, %v1115_v11 }
 0x1f0   :  { %3452 = vst [vmem:[%s7061_s3 + $0xa8] sm:$0xff] %v3388_v35  ;;  %v1556_v43 = vadd.f32 %v6153_v17, %v1555_v10  ;;  %vm1558_vm6 = vweird.f32 %v6153_v17  ;;  %v3289_v5 = vadd.f32 %v6024_v6, %v3160_v57  ;;  %v1561_v49 = vand.u32 2147483647, %v6113_v41 }
 0x1f1   :  { %v4024_v21 = vpop.eup %4023  ;;  %v3067_v31 = vmul.f32 %v4712_v4, %v3002_v12  ;;  %4027 = vpow2.f32 %v3688_v40  ;;  %v6403_v48 = vmul.f32 %v4675_v36, %v497_v27  ;;  %vm6407_vm2 = vmor %vm1557_vm5, %vm1558_vm6  ;;  %v1563_v0 = vand.u32 2147483648, %v6113_v41 }
 0x1f2   :  { %v6400_v18 = vadd.f32 1.0, %v4024_v21  ;;  %v499_v6 = vadd.f32 %v498_v1, %v4580_v60  ;;  %v3353_v23 = vadd.f32 %v3289_v5, %v2876_v47  ;;  %v1560_v25 = vsel %vm6407_vm2, %v6153_v17, %v1556_v43  ;;  %v421_v17 = vpop.f32.mrf.mxu0 }
 0x1f3   :  { %v3131_v39 = vadd.f32 %v3067_v31, %v2938_v44  ;;  %v1120_v62 = vmul.f32 %v6344_v53, %v1119_v20  ;;  %v6417_v27 = vpop.eup %4025  ;;  %v1599_v52 = vsub.f32 1.0, %v6389_v55  ;;  %v1564_v50 = vor.u32 1.1754944e-38, %v1563_v0  ;;  %v2879_v0 = vpop.f32.mrf.mxu3 }
 0x1f4   :  { %4029 = vrcp.f32 %v6400_v18  ;;  %v3720_v26 = vmul.f32 -1.442695, %v499_v6  ;;  %v3418_v41 = vadd.f32 %v4724_v38, %v3353_v23  ;;  %vm1562_vm3 = vcmp.eq.f32.partialorder %v1561_v49, 8.507059e+37 }
 0x1f5   :  { %v3260_v32 = vadd.f32 %v6218_v33, %v3131_v39  ;;  %v1121_v14 = vadd.f32 %v6344_v53, %v1120_v62  ;;  %v1565_v7 = vsel %vm1562_vm3, %v1564_v50, %v1560_v25  ;;  %vm1122_vm7 = vweird.f32 %v6298_v42 }
 0x1f6   :  { %4031 = vpow2.f32 %v3720_v26  ;;  %vm1123_vm8 = vweird.f32 %v6344_v53  ;;  %v1133_v10 = vmul.f32 %v6417_v27, %v6371_v19  ;;  %3482 = vst [vmem:[%s7061_s3 + $0x198] sm:$0xff] %v3418_v41  ;;  %v2968_v20 = vmul.f32 %v4704_v3, %v1565_v7 }
 0x1f7   :  { %v4028_v63 = vpop.eup %4027  ;;  %v3324_v33 = vadd.f32 %v3260_v32, %v2789_v56  ;;  %v3032_v35 = vmul.f32 %v1565_v7, %v1565_v7  ;;  %vm6432_vm9 = vmor %vm1122_vm7, %vm1123_vm8  ;;  %v1126_v40 = vand.u32 2147483647, %v6298_v42  ;;  %v1128_v1 = vand.u32 2147483648, %v6298_v42 }
 0x1f8   :  { %v6436_v57 = vadd.f32 1.0, %v4028_v63  ;;  %v1125_v12 = vsel %vm6432_vm9, %v6344_v53, %v1121_v14  ;;  %v422_v43 = vadd.f32 %v421_v17, %v4580_v60  ;;  %v1570_v21 = vmul.f32 %v6235_v54, %v1569_v8 }
 0x1f9   :  { %v3389_v47 = vadd.f32 %v4724_v38, %v3324_v33  ;;  %v3097_v44 = vmul.f32 %v4712_v4, %v3032_v35  ;;  %v6454_v53 = vmul.f32 %v4675_v36, %v6378_v30  ;;  %v6457_v42 = vmul.f32 %v4675_v36, %v499_v6  ;;  %v501_v30 = vpop.f32.mrf.mxu2 }
 0x1fa   :  { %v6449_v5 = vpop.eup %4029  ;;  %4033 = vrcp.f32 %v6436_v57  ;;  %v1129_v31 = vor.u32 1.1754944e-38, %v1128_v1  ;;  %v1134_v49 = vsub.f32 1.0, %v1133_v10  ;;  %vm1127_vm10 = vcmp.eq.f32.partialorder %v1126_v40, 8.507059e+37  ;;  %v423_v40 = vpop.f32.mrf.mxu0 }
 0x1fb   :  { %3453 = vst [vmem:[%s7061_s3 + $0xb0] sm:$0xff] %v3389_v47  ;;  %v3161_v46 = vadd.f32 %v3097_v44, %v2968_v20  ;;  %v3689_v8 = vmul.f32 -1.442695, %v422_v43  ;;  %v1571_v39 = vadd.f32 %v6235_v54, %v1570_v21  ;;  %vm1572_vm11 = vweird.f32 %v6189_v2  ;;  %v2882_v13 = vpop.f32.mrf.mxu3 }
 0x1fc   :  { %v4032_v45 = vpop.eup %4031  ;;  %v1130_v23 = vsel %vm1127_vm10, %v1129_v31, %v1125_v12  ;;  %vm1573_vm12 = vweird.f32 %v6235_v54  ;;  %v6467_v6 = vmul.f32 %v6449_v5, %v6400_v18  ;;  %v6471_v62 = vmul.f32 %v4675_v36, %v422_v43 }
 0x1fd   :  { %v3290_v25 = vadd.f32 %v6092_v61, %v3161_v46  ;;  %v1576_v50 = vand.u32 2147483647, %v6189_v2  ;;  %v6474_v26 = vadd.f32 1.0, %v4032_v45  ;;  %v2939_v41 = vmul.f32 %v4704_v3, %v1130_v23  ;;  %vm6477_vm13 = vmor %vm1572_vm11, %vm1573_vm12  ;;  %v2792_v45 = vpop.f32.mrf.mxu1 }
 0x1fe   :  { %v3003_v32 = vmul.f32 %v1130_v23, %v1130_v23  ;;  %4035 = vpow2.f32 %v3689_v8  ;;  %v1575_v61 = vsel %vm6477_vm13, %v6235_v54, %v1571_v39  ;;  %v1578_v7 = vand.u32 2147483648, %v6189_v2 }
 0x1ff   :  { %v3354_v56 = vadd.f32 %v3290_v25, %v2879_v0  ;;  %v502_v17 = vadd.f32 %v501_v30, %v4580_v60  ;;  %v1135_v33 = vmul.f32 %v6417_v27, %v1134_v49  ;;  %vm1137_vm0 = vweird.f32 %v6371_v19 }
 0x200   :  { %v6486_v63 = vpop.eup %4033  ;;  %v3068_v10 = vmul.f32 %v4712_v4, %v3003_v32  ;;  %vm1138_vm14 = vweird.f32 %v6417_v27  ;;  %vm1577_vm15 = vcmp.eq.f32.partialorder %v1576_v50, 8.507059e+37  ;;  %v1579_v35 = vor.u32 1.1754944e-38, %v1578_v7 }
 0x201   :  { %v3419_v20 = vadd.f32 %v4724_v38, %v3354_v56  ;;  %v3721_v11 = vmul.f32 -1.442695, %v502_v17  ;;  %4037 = vrcp.f32 %v6474_v26  ;;  %v1136_v54 = vadd.f32 %v6417_v27, %v1135_v33  ;;  %vm6503_vm1 = vmor %vm1137_vm0, %vm1138_vm14 }
 0x202   :  { %v3132_v2 = vadd.f32 %v3068_v10, %v2939_v41  ;;  %v1141_v12 = vand.u32 2147483647, %v6371_v19  ;;  %v1148_v1 = vmul.f32 %v6486_v63, %v6436_v57  ;;  %v1580_v47 = vsel %vm1577_vm15, %v1579_v35, %v1575_v61  ;;  %v503_v10 = vpop.f32.mrf.mxu2 }
 0x203   :  { %3483 = vst [vmem:[%s7061_s3 + $0x1a0] sm:$0xff] %v3419_v20  ;;  %4039 = vpow2.f32 %v3721_v11  ;;  %v1143_v43 = vand.u32 2147483648, %v6371_v19  ;;  %v1614_v31 = vsub.f32 1.0, %v6467_v6  ;;  %v3033_v46 = vmul.f32 %v1580_v47, %v1580_v47 }
 0x204   :  { %v4036_v21 = vpop.eup %4035  ;;  %v3261_v49 = vadd.f32 %v6260_v22, %v3132_v2  ;;  %v1140_v8 = vsel %vm6503_vm1, %v6417_v27, %v1136_v54  ;;  %v2969_v23 = vmul.f32 %v4704_v3, %v1580_v47  ;;  %v424_v30 = vadd.f32 %v423_v40, %v4580_v60 }
 0x205   :  { %v6513_v0 = vadd.f32 1.0, %v4036_v21  ;;  %v1144_v39 = vor.u32 1.1754944e-38, %v1143_v43  ;;  %v3098_v19 = vmul.f32 %v4712_v4, %v3033_v46  ;;  %vm1142_vm4 = vcmp.eq.f32.partialorder %v1141_v12, 8.507059e+37 }
 0x206   :  { %v3325_v25 = vadd.f32 %v3261_v49, %v2792_v45  ;;  %v1585_v22 = vmul.f32 %v6310_v28, %v1584_v51  ;;  %v1149_v50 = vsub.f32 1.0, %v1148_v1  ;;  %v3690_v41 = vmul.f32 -1.442695, %v424_v30 }
 0x207   :  { %4041 = vrcp.f32 %v6513_v0  ;;  %v1145_v27 = vsel %vm1142_vm4, %v1144_v39, %v1140_v8  ;;  %v6522_v32 = vpop.eup %4037  ;;  %v3162_v56 = vadd.f32 %v3098_v19, %v2969_v23  ;;  %v6526_v61 = vmul.f32 %v4675_v36, %v502_v17  ;;  %v2795_v19 = vpop.f32.mrf.mxu1 }
 0x208   :  { %v3390_v14 = vadd.f32 %v4724_v38, %v3325_v25  ;;  %v2940_v7 = vmul.f32 %v4704_v3, %v1145_v27  ;;  %v3004_v20 = vmul.f32 %v1145_v27, %v1145_v27  ;;  %4043 = vpow2.f32 %v3690_v41 }
 0x209   :  { %v4040_v33 = vpop.eup %4039  ;;  %v1586_v51 = vadd.f32 %v6310_v28, %v1585_v22  ;;  %vm1587_vm5 = vweird.f32 %v6263_v59  ;;  %v3291_v35 = vadd.f32 %v6205_v24, %v3162_v56  ;;  %vm1588_vm6 = vweird.f32 %v6310_v28 }
 0x20a   :  { %3454 = vst [vmem:[%s7061_s3 + $0xb8] sm:$0xff] %v3390_v14  ;;  %v6535_v11 = vadd.f32 1.0, %v4040_v33  ;;  %v1591_v17 = vand.u32 2147483647, %v6263_v59  ;;  %v3069_v2 = vmul.f32 %v4712_v4, %v3004_v20  ;;  %vm6540_vm2 = vmor %vm1587_vm5, %vm1588_vm6  ;;  %v1593_v12 = vand.u32 2147483648, %v6263_v59 }
 0x20b   :  { %v504_v40 = vadd.f32 %v503_v10, %v4580_v60  ;;  %v1150_v1 = vmul.f32 %v6486_v63, %v1149_v50  ;;  %v6549_v24 = vmul.f32 %v6522_v32, %v6474_v26  ;;  %v3355_v47 = vadd.f32 %v3291_v35, %v2882_v13 }
 0x20c   :  { %4045 = vrcp.f32 %v6535_v11  ;;  %v1590_v44 = vsel %vm6540_vm2, %v6310_v28, %v1586_v51  ;;  %v3133_v21 = vadd.f32 %v3069_v2, %v2940_v7  ;;  %v6558_v59 = vmul.f32 %v4675_v36, %v424_v30  ;;  %v426_v28 = vpop.f32.mrf.mxu0 }
 0x20d   :  { %v6555_v43 = vpop.eup %4041  ;;  %v1594_v49 = vor.u32 1.1754944e-38, %v1593_v12  ;;  %v3722_v46 = vmul.f32 -1.442695, %v504_v40  ;;  %v3420_v8 = vadd.f32 %v4724_v38, %v3355_v47  ;;  %vm1592_vm3 = vcmp.eq.f32.partialorder %v1591_v17, 8.507059e+37 }
 0x20e   :  { %v1151_v45 = vadd.f32 %v6486_v63, %v1150_v1  ;;  %vm1152_vm7 = vweird.f32 %v6436_v57  ;;  %v4044_v23 = vpop.eup %4043  ;;  %v3262_v39 = vadd.f32 %v6352_v37, %v3133_v21  ;;  %vm1153_vm8 = vweird.f32 %v6486_v63 }
 0x20f   :  { %v1595_v25 = vsel %vm1592_vm3, %v1594_v49, %v1590_v44  ;;  %4047 = vpow2.f32 %v3722_v46  ;;  %v1163_v30 = vmul.f32 %v6555_v43, %v6513_v0  ;;  %3484 = vst [vmem:[%s7061_s3 + $0x1a8] sm:$0xff] %v3420_v8  ;;  %v6570_v22 = vadd.f32 1.0, %v4044_v23  ;;  %vm6573_vm9 = vmor %vm1152_vm7, %vm1153_vm8 }
 0x210   :  { %v2970_v50 = vmul.f32 %v4704_v3, %v1595_v25  ;;  %v3034_v27 = vmul.f32 %v1595_v25, %v1595_v25  ;;  %v3326_v41 = vadd.f32 %v3262_v39, %v2795_v19  ;;  %v1155_v14 = vsel %vm6573_vm9, %v6486_v63, %v1151_v45 }
 0x211   :  { %v1156_v56 = vand.u32 2147483647, %v6436_v57  ;;  %v1158_v7 = vand.u32 2147483648, %v6436_v57  ;;  %4049 = vrcp.f32 %v6570_v22  ;;  %v427_v13 = vadd.f32 %v426_v28, %v4580_v60 }
 0x212   :  { %v6582_v10 = vpop.eup %4045  ;;  %v3099_v33 = vmul.f32 %v4712_v4, %v3034_v27  ;;  %v1600_v20 = vmul.f32 %v6374_v15, %v1599_v52  ;;  %v1629_v51 = vsub.f32 1.0, %v6549_v24  ;;  %v3391_v63 = vadd.f32 %v4724_v38, %v3326_v41  ;;  %v2885_v52 = vpop.f32.mrf.mxu3 }
 0x213   :  { %v6593_v35 = vmul.f32 %v4675_v36, %v504_v40  ;;  %v1159_v57 = vor.u32 1.1754944e-38, %v1158_v7  ;;  %vm1157_vm10 = vcmp.eq.f32.partialorder %v1156_v56, 8.507059e+37  ;;  %v3691_v2 = vmul.f32 -1.442695, %v427_v13  ;;  %v506_v40 = vpop.f32.mrf.mxu2 }
 0x214   :  { %v3163_v17 = vadd.f32 %v3099_v33, %v2970_v50  ;;  %v1601_v54 = vadd.f32 %v6374_v15, %v1600_v20  ;;  %v1164_v1 = vsub.f32 1.0, %v1163_v30  ;;  %v6598_v55 = vmul.f32 %v6582_v10, %v6535_v11  ;;  %3455 = vst [vmem:[%s7061_s3 + $0xc0] sm:$0xff] %v3391_v63 }
 0x215   :  { %v4048_v12 = vpop.eup %4047  ;;  %v1160_v47 = vsel %vm1157_vm10, %v1159_v57, %v1155_v14  ;;  %vm1603_vm11 = vweird.f32 %v6374_v15  ;;  %vm1602_vm12 = vweird.f32 %v6335_v9  ;;  %4051 = vpow2.f32 %v3691_v2  ;;  %v428_v14 = vpop.f32.mrf.mxu0 }
 0x216   :  { %v3292_v44 = vadd.f32 %v6239_v34, %v3163_v17  ;;  %v6605_v21 = vadd.f32 1.0, %v4048_v12  ;;  %v3005_v49 = vmul.f32 %v1160_v47, %v1160_v47  ;;  %v2941_v46 = vmul.f32 %v4704_v3, %v1160_v47  ;;  %vm6609_vm13 = vmor %vm1602_vm12, %vm1603_vm11  ;;  %v2798_v57 = vpop.f32.mrf.mxu1 }
 0x217   :  { %v1606_v45 = vand.u32 2147483647, %v6335_v9  ;;  %v1608_v23 = vand.u32 2147483648, %v6335_v9  ;;  %v6615_v39 = vpop.eup %4049  ;;  %v1605_v28 = vsel %vm6609_vm13, %v6374_v15, %v1601_v54  ;;  %v507_v30 = vadd.f32 %v506_v40, %v4580_v60 }
 0x218   :  { %v3356_v25 = vadd.f32 %v3292_v44, %v2885_v52  ;;  %v3070_v34 = vmul.f32 %v4712_v4, %v3005_v49  ;;  %4053 = vrcp.f32 %v6605_v21  ;;  %v6624_v19 = vmul.f32 %v4675_v36, %v427_v13 }
 0x219   :  { %v1609_v50 = vor.u32 1.1754944e-38, %v1608_v23  ;;  %v1165_v27 = vmul.f32 %v6555_v43, %v1164_v1  ;;  %vm1607_vm0 = vcmp.eq.f32.partialorder %v1606_v45, 8.507059e+37  ;;  %v3723_v41 = vmul.f32 -1.442695, %v507_v30 }
 0x21a   :  { %v3421_v9 = vadd.f32 %v4724_v38, %v3356_v25  ;;  %v3134_v37 = vadd.f32 %v3070_v34, %v2941_v46  ;;  %v1178_v56 = vmul.f32 %v6615_v39, %v6570_v22  ;;  %vm1167_vm14 = vweird.f32 %v6513_v0  ;;  %v2888_v23 = vpop.f32.mrf.mxu3 }
 0x21b   :  { %v1610_v15 = vsel %vm1607_vm0, %v1609_v50, %v1605_v28  ;;  %v1166_v7 = vadd.f32 %v6555_v43, %v1165_v27  ;;  %4055 = vpow2.f32 %v3723_v41  ;;  %v4052_v63 = vpop.eup %4051  ;;  %vm1168_vm15 = vweird.f32 %v6555_v43  ;;  %v508_v34 = vpop.f32.mrf.mxu2 }
 0x21c   :  { %3485 = vst [vmem:[%s7061_s3 + $0x1b0] sm:$0xff] %v3421_v9  ;;  %v3263_v33 = vadd.f32 %v6454_v53, %v3134_v37  ;;  %v2971_v13 = vmul.f32 %v4704_v3, %v1610_v15  ;;  %v3035_v20 = vmul.f32 %v1610_v15, %v1610_v15  ;;  %v1171_v17 = vand.u32 2147483647, %v6513_v0  ;;  %vm1169_vm1 = vmor %vm1167_vm14, %vm1168_vm15 }
 0x21d   :  { %v1173_v2 = vand.u32 2147483648, %v6513_v0  ;;  %v6641_v54 = vadd.f32 %v428_v14, %v4580_v60  ;;  %v6643_v1 = vadd.f32 1.0, %v4052_v63  ;;  %v1615_v52 = vmul.f32 %v6449_v5, %v1614_v31 }
 0x21e   :  { %v3327_v12 = vadd.f32 %v3263_v33, %v2798_v57  ;;  %v3100_v53 = vmul.f32 %v4712_v4, %v3035_v20  ;;  %v6651_v47 = vpop.eup %4053  ;;  %v1644_v40 = vsub.f32 1.0, %v6598_v55  ;;  %v1170_v44 = vsel %vm1169_vm1, %v6555_v43, %v1166_v7 }
 0x21f   :  { %vm1172_vm4 = vcmp.eq.f32.partialorder %v1171_v17, 8.507059e+37  ;;  %v1174_v49 = vor.u32 1.1754944e-38, %v1173_v2  ;;  %4057 = vrcp.f32 %v6643_v1  ;;  %v3692_v0 = vmul.f32 -1.442695, %v6641_v54 }
 0x220   :  { %v3392_v46 = vadd.f32 %v4724_v38, %v3327_v12  ;;  %v3164_v8 = vadd.f32 %v3100_v53, %v2971_v13  ;;  %v1179_v45 = vsub.f32 1.0, %v1178_v56  ;;  %v6659_v6 = vmul.f32 %v4675_v36, %v507_v30 }
 0x221   :  { %v1175_v31 = vsel %vm1172_vm4, %v1174_v49, %v1170_v44  ;;  %v1616_v25 = vadd.f32 %v6449_v5, %v1615_v52  ;;  %v4056_v28 = vpop.eup %4055  ;;  %4059 = vpow2.f32 %v3692_v0  ;;  %vm1617_vm5 = vweird.f32 %v6400_v18  ;;  %v431_v52 = vpop.f32.mrf.mxu0 }
 0x222   :  { %3456 = vst [vmem:[%s7061_s3 + $0xc8] sm:$0xff] %v3392_v46  ;;  %v3293_v43 = vadd.f32 %v6314_v58, %v3164_v8  ;;  %v2942_v50 = vmul.f32 %v4704_v3, %v1175_v31  ;;  %v3006_v27 = vmul.f32 %v1175_v31, %v1175_v31  ;;  %v6667_v9 = vadd.f32 1.0, %v4056_v28  ;;  %v2801_v49 = vpop.f32.mrf.mxu1  ;;  %v2891_v28 = vpop.f32.mrf.mxu3 }
 0x223   :  { %vm1618_vm6 = vweird.f32 %v6449_v5  ;;  %v1621_v30 = vand.u32 2147483647, %v6400_v18  ;;  %v1623_v58 = vand.u32 2147483648, %v6400_v18  ;;  %v6679_v56 = vadd.f32 %v508_v34, %v4580_v60 }
 0x224   :  { %v3357_v37 = vadd.f32 %v3293_v43, %v2888_v23  ;;  %v3071_v41 = vmul.f32 %v4712_v4, %v3006_v27  ;;  %vm6673_vm2 = vmor %vm1617_vm5, %vm1618_vm6  ;;  %v6683_v15 = vmul.f32 %v6651_v47, %v6605_v21  ;;  %4061 = vrcp.f32 %v6667_v9 }
 0x225   :  { %v1620_v7 = vsel %vm6673_vm2, %v6449_v5, %v1616_v25  ;;  %v1180_v33 = vmul.f32 %v6615_v39, %v1179_v45  ;;  %v6690_v13 = vpop.eup %4057  ;;  %v1624_v63 = vor.u32 1.1754944e-38, %v1623_v58  ;;  %v3724_v57 = vmul.f32 -1.442695, %v6679_v56 }
 0x226   :  { %v3422_v20 = vadd.f32 %v4724_v38, %v3357_v37  ;;  %v3135_v18 = vadd.f32 %v3071_v41, %v2942_v50  ;;  %v1193_v17 = vmul.f32 %v6690_v13, %v6643_v1  ;;  %vm1622_vm3 = vcmp.eq.f32.partialorder %v1621_v30, 8.507059e+37 }
 0x227   :  { %v1181_v2 = vadd.f32 %v6615_v39, %v1180_v33  ;;  %vm1182_vm7 = vweird.f32 %v6570_v22  ;;  %v4060_v12 = vpop.eup %4059  ;;  %v1625_v53 = vsel %vm1622_vm3, %v1624_v63, %v1620_v7  ;;  %4063 = vpow2.f32 %v3724_v57 }
 0x228   :  { %3486 = vst [vmem:[%s7061_s3 + $0x1b8] sm:$0xff] %v3422_v20  ;;  %v3264_v5 = vadd.f32 %v6471_v62, %v3135_v18  ;;  %vm1183_vm8 = vweird.f32 %v6615_v39  ;;  %v1659_v44 = vsub.f32 1.0, %v6683_v15  ;;  %v6704_v46 = vadd.f32 1.0, %v4060_v12 }
 0x229   :  { %v2972_v8 = vmul.f32 %v4704_v3, %v1625_v53  ;;  %v3036_v0 = vmul.f32 %v1625_v53, %v1625_v53  ;;  %vm6707_vm9 = vmor %vm1182_vm7, %vm1183_vm8  ;;  %v1186_v31 = vand.u32 2147483647, %v6570_v22  ;;  %v1188_v25 = vand.u32 2147483648, %v6570_v22 }
 0x22a   :  { %v3328_v23 = vadd.f32 %v3264_v5, %v2801_v49  ;;  %v1185_v62 = vsel %vm6707_vm9, %v6615_v39, %v1181_v2  ;;  %v6716_v34 = vpop.eup %4061  ;;  %4065 = vrcp.f32 %v6704_v46  ;;  %v432_v50 = vadd.f32 %v431_v52, %v4580_v60 }
 0x22b   :  { %v3101_v43 = vmul.f32 %v4712_v4, %v3036_v0  ;;  %v1630_v27 = vmul.f32 %v6522_v32, %v1629_v51  ;;  %v1194_v30 = vsub.f32 1.0, %v1193_v17  ;;  %v6727_v37 = vmul.f32 %v4675_v36, %v6641_v54  ;;  %v511_v51 = vpop.f32.mrf.mxu2 }
 0x22c   :  { %v3393_v39 = vadd.f32 %v4724_v38, %v3328_v23  ;;  %v1189_v22 = vor.u32 1.1754944e-38, %v1188_v25  ;;  %vm1187_vm10 = vcmp.eq.f32.partialorder %v1186_v31, 8.507059e+37  ;;  %v3693_v14 = vmul.f32 -1.442695, %v432_v50 }
 0x22d   :  { %v3165_v41 = vadd.f32 %v3101_v43, %v2972_v8  ;;  %v1631_v58 = vadd.f32 %v6522_v32, %v1630_v27  ;;  %v4064_v7 = vpop.eup %4063  ;;  %v6732_v33 = vmul.f32 %v6716_v34, %v6667_v9  ;;  %vm1632_vm11 = vweird.f32 %v6474_v26  ;;  %v2804_v43 = vpop.f32.mrf.mxu1 }
 0x22e   :  { %3457 = vst [vmem:[%s7061_s3 + $0xd0] sm:$0xff] %v3393_v39  ;;  %v1190_v24 = vsel %vm1187_vm10, %v1189_v22, %v1185_v62  ;;  %vm1633_vm12 = vweird.f32 %v6522_v32  ;;  %v6740_v20 = vadd.f32 1.0, %v4064_v7  ;;  %4067 = vpow2.f32 %v3693_v14  ;;  %v433_v62 = vpop.f32.mrf.mxu0  ;;  %v2894_v27 = vpop.f32.mrf.mxu3 }
 0x22f   :  { %v3294_v54 = vadd.f32 %v6403_v48, %v3165_v41  ;;  %v2943_v18 = vmul.f32 %v4704_v3, %v1190_v24  ;;  %v3007_v63 = vmul.f32 %v1190_v24, %v1190_v24  ;;  %vm6743_vm13 = vmor %vm1632_vm11, %vm1633_vm12  ;;  %v1636_v2 = vand.u32 2147483647, %v6474_v26 }
 0x230   :  { %v1635_v17 = vsel %vm6743_vm13, %v6522_v32, %v1631_v58  ;;  %v1638_v12 = vand.u32 2147483648, %v6474_v26  ;;  %v6752_v5 = vpop.eup %4065  ;;  %4069 = vrcp.f32 %v6740_v20  ;;  %v6757_v52 = vadd.f32 %v511_v51, %v4580_v60 }
 0x231   :  { %v3358_v48 = vadd.f32 %v3294_v54, %v2891_v28  ;;  %v3072_v53 = vmul.f32 %v4712_v4, %v3007_v63  ;;  %v1674_v49 = vsub.f32 1.0, %v6732_v33  ;;  %v6761_v8 = vmul.f32 %v4675_v36, %v432_v50 }
 0x232   :  { %v1639_v32 = vor.u32 1.1754944e-38, %v1638_v12  ;;  %v1195_v0 = vmul.f32 %v6690_v13, %v1194_v30  ;;  %vm1637_vm0 = vcmp.eq.f32.partialorder %v1636_v2, 8.507059e+37  ;;  %v3725_v23 = vmul.f32 -1.442695, %v6757_v52 }
 0x233   :  { %v3423_v26 = vadd.f32 %v4724_v38, %v3358_v48  ;;  %v3136_v45 = vadd.f32 %v3072_v53, %v2943_v18  ;;  %v1208_v31 = vmul.f32 %v6752_v5, %v6704_v46  ;;  %vm1197_vm14 = vweird.f32 %v6643_v1  ;;  %v513_v53 = vpop.f32.mrf.mxu2 }
 0x234   :  { %v1640_v25 = vsel %vm1637_vm0, %v1639_v32, %v1635_v17  ;;  %v1196_v28 = vadd.f32 %v6690_v13, %v1195_v0  ;;  %4071 = vpow2.f32 %v3725_v23  ;;  %v4068_v22 = vpop.eup %4067  ;;  %vm1198_vm15 = vweird.f32 %v6690_v13 }
 0x235   :  { %3487 = vst [vmem:[%s7061_s3 + $0x1c0] sm:$0xff] %v3423_v26  ;;  %v3265_v50 = vadd.f32 %v6558_v59, %v3136_v45  ;;  %v2973_v30 = vmul.f32 %v4704_v3, %v1640_v25  ;;  %v3037_v39 = vmul.f32 %v1640_v25, %v1640_v25  ;;  %v1201_v41 = vand.u32 2147483647, %v6643_v1  ;;  %vm1199_vm1 = vmor %vm1197_vm14, %vm1198_vm15 }
 0x236   :  { %v1203_v14 = vand.u32 2147483648, %v6643_v1  ;;  %v434_v58 = vadd.f32 %v433_v62, %v4580_v60  ;;  %v6779_v7 = vpop.eup %4069  ;;  %v6781_v51 = vadd.f32 1.0, %v4068_v22  ;;  %v1645_v54 = vmul.f32 %v6582_v10, %v1644_v40  ;;  %v2807_v22 = vpop.f32.mrf.mxu1 }
 0x237   :  { %v3329_v24 = vadd.f32 %v3265_v50, %v2804_v43  ;;  %v3102_v59 = vmul.f32 %v4712_v4, %v3037_v39  ;;  %v6791_v18 = vmul.f32 %v6779_v7, %v6740_v20  ;;  %v1200_v63 = vsel %vm1199_vm1, %v6690_v13, %v1196_v28 }
 0x238   :  { %vm1202_vm4 = vcmp.eq.f32.partialorder %v1201_v41, 8.507059e+37  ;;  %v1204_v57 = vor.u32 1.1754944e-38, %v1203_v14  ;;  %4073 = vrcp.f32 %v6781_v51  ;;  %v3694_v12 = vmul.f32 -1.442695, %v434_v58 }
 0x239   :  { %v3394_v17 = vadd.f32 %v4724_v38, %v3329_v24  ;;  %v3166_v2 = vadd.f32 %v3102_v59, %v2973_v30  ;;  %v1209_v1 = vsub.f32 1.0, %v1208_v31  ;;  %v1689_v48 = vsub.f32 1.0, %v6791_v18 }
 0x23a   :  { %v1205_v55 = vsel %vm1202_vm4, %v1204_v57, %v1200_v63  ;;  %v1646_v40 = vadd.f32 %v6582_v10, %v1645_v54  ;;  %v4072_v32 = vpop.eup %4071  ;;  %4075 = vpow2.f32 %v3694_v12  ;;  %vm1647_vm5 = vweird.f32 %v6535_v11 }
 0x23b   :  { %3458 = vst [vmem:[%s7061_s3 + $0xd8] sm:$0xff] %v3394_v17  ;;  %v3295_v13 = vadd.f32 %v6457_v42, %v3166_v2  ;;  %v2944_v0 = vmul.f32 %v4704_v3, %v1205_v55  ;;  %v3008_v26 = vmul.f32 %v1205_v55, %v1205_v55  ;;  %v6803_v45 = vadd.f32 1.0, %v4072_v32 }
 0x23c   :  { %vm1648_vm6 = vweird.f32 %v6582_v10  ;;  %v1651_v23 = vand.u32 2147483647, %v6535_v11  ;;  %v1653_v42 = vand.u32 2147483648, %v6535_v11  ;;  %v6815_v28 = vadd.f32 %v513_v53, %v4580_v60  ;;  %v2897_v60 = vpop.f32.mrf.mxu3 }
 0x23d   :  { %v3359_v62 = vadd.f32 %v3295_v13, %v2894_v27  ;;  %v3073_v31 = vmul.f32 %v4712_v4, %v3008_v26  ;;  %vm6809_vm2 = vmor %vm1647_vm5, %vm1648_vm6  ;;  %4077 = vrcp.f32 %v6803_v45  ;;  %v6819_v43 = vmul.f32 %v4675_v36, %v434_v58 }
 0x23e   :  { %v1650_v50 = vsel %vm6809_vm2, %v6582_v10, %v1646_v40  ;;  %v1210_v27 = vmul.f32 %v6752_v5, %v1209_v1  ;;  %v6825_v30 = vpop.eup %4073  ;;  %v1654_v41 = vor.u32 1.1754944e-38, %v1653_v42  ;;  %v3726_v14 = vmul.f32 -1.442695, %v6815_v28 }
 0x23f   :  { %v3424_v39 = vadd.f32 %v4724_v38, %v3359_v62  ;;  %v3137_v11 = vadd.f32 %v3073_v31, %v2944_v0  ;;  %v1223_v58 = vmul.f32 %v6825_v30, %v6781_v51  ;;  %vm1652_vm3 = vcmp.eq.f32.partialorder %v1651_v23, 8.507059e+37 }
 0x240   :  { %v1211_v24 = vadd.f32 %v6752_v5, %v1210_v27  ;;  %vm1212_vm7 = vweird.f32 %v6704_v46  ;;  %v4076_v10 = vpop.eup %4075  ;;  %v1655_v54 = vsel %vm1652_vm3, %v1654_v41, %v1650_v50  ;;  %4079 = vpow2.f32 %v3726_v14 }
 0x241   :  { %3488 = vst [vmem:[%s7061_s3 + $0x1c8] sm:$0xff] %v3424_v39  ;;  %v3266_v59 = vadd.f32 %v6624_v19, %v3137_v11  ;;  %vm1213_vm8 = vweird.f32 %v6752_v5  ;;  %v1224_v63 = vsub.f32 1.0, %v1223_v58  ;;  %v6838_v57 = vadd.f32 1.0, %v4076_v10  ;;  %v2810_v11 = vpop.f32.mrf.mxu1 }
 0x242   :  { %v2974_v17 = vmul.f32 %v4704_v3, %v1655_v54  ;;  %v3038_v2 = vmul.f32 %v1655_v54, %v1655_v54  ;;  %vm6841_vm9 = vmor %vm1212_vm7, %vm1213_vm8  ;;  %v1216_v19 = vand.u32 2147483647, %v6704_v46  ;;  %v1218_v40 = vand.u32 2147483648, %v6704_v46 }
 0x243   :  { %v3330_v1 = vadd.f32 %v3266_v59, %v2807_v22  ;;  %v1215_v55 = vsel %vm6841_vm9, %v6752_v5, %v1211_v24  ;;  %v6850_v53 = vpop.eup %4077  ;;  %4081 = vrcp.f32 %v6838_v57  ;;  %v1660_v13 = vmul.f32 %v6651_v47, %v1659_v44 }
 0x244   :  { %v3103_v32 = vmul.f32 %v4712_v4, %v3038_v2  ;;  %vm1662_vm10 = vweird.f32 %v6605_v21  ;;  %v6860_v0 = vmul.f32 %v6850_v53, %v6803_v45  ;;  %vm1217_vm11 = vcmp.eq.f32.partialorder %v1216_v19, 8.507059e+37  ;;  %v2900_v58 = vpop.f32.mrf.mxu3  ;;  %v7161_v19 = vld [vmem:[#allocation3_spill] sm:$0xff] }
 0x245   :  { %v3395_v5 = vadd.f32 %v4724_v38, %v3330_v1  ;;  %v1219_v46 = vor.u32 1.1754944e-38, %v1218_v40  ;;  %v1661_v23 = vadd.f32 %v6651_v47, %v1660_v13  ;;  %vm1663_vm12 = vweird.f32 %v6651_v47 }
 0x246   :  { %v3167_v26 = vadd.f32 %v3103_v32, %v2974_v17  ;;  %v1666_v62 = vand.u32 2147483647, %v6605_v21  ;;  %v4080_v15 = vpop.eup %4079  ;;  %v1704_v44 = vsub.f32 1.0, %v6860_v0  ;;  %v1668_v25 = vand.u32 2147483648, %v6605_v21  ;;  %vm1664_vm13 = vmor %vm1662_vm10, %vm1663_vm12 }
 0x247   :  { %3459 = vst [vmem:[%s7061_s3 + $0xe0] sm:$0xff] %v3395_v5  ;;  %v1220_v31 = vsel %vm1217_vm11, %v1219_v46, %v1215_v55  ;;  %v1225_v42 = vmul.f32 %v6825_v30, %v1224_v63  ;;  %v6873_v27 = vadd.f32 1.0, %v4080_v15  ;;  %v1665_v41 = vsel %vm1664_vm13, %v6651_v47, %v1661_v23 }
 0x248   :  { %v3296_v50 = vadd.f32 %v6526_v61, %v3167_v26  ;;  %v2945_v39 = vmul.f32 %v4704_v3, %v1220_v31  ;;  %v3009_v22 = vmul.f32 %v1220_v31, %v1220_v31  ;;  %vm1667_vm0 = vcmp.eq.f32.partialorder %v1666_v62, 8.507059e+37 }
 0x249   :  { %v1669_v14 = vor.u32 1.1754944e-38, %v1668_v25  ;;  %v1226_v24 = vadd.f32 %v6825_v30, %v1225_v42  ;;  %v6880_v10 = vpop.eup %4081  ;;  %4083 = vrcp.f32 %v6873_v27  ;;  %vm1227_vm14 = vweird.f32 %v6781_v51 }
 0x24a   :  { %v3360_v59 = vadd.f32 %v3296_v50, %v2897_v60  ;;  %v3074_v61 = vmul.f32 %v4712_v4, %v3009_v22  ;;  %v1238_v21 = vmul.f32 %v6880_v10, %v6838_v57  ;;  %vm1228_vm15 = vweird.f32 %v6825_v30 }
 0x24b   :  { %v1670_v54 = vsel %vm1667_vm0, %v1669_v14, %v1665_v41  ;;  %v1231_v47 = vand.u32 2147483647, %v6781_v51  ;;  %vm6891_vm1 = vmor %vm1227_vm14, %vm1228_vm15  ;;  %v1233_v40 = vand.u32 2147483648, %v6781_v51  ;;  %v1675_v5 = vmul.f32 %v6716_v34, %v1674_v49  ;;  %v2813_v41 = vpop.f32.mrf.mxu1 }
 0x24c   :  { %v3425_v63 = vadd.f32 %v4724_v38, %v3360_v59  ;;  %v3138_v17 = vadd.f32 %v3074_v61, %v2945_v39  ;;  %v2975_v2 = vmul.f32 %v4704_v3, %v1670_v54  ;;  %v3039_v60 = vmul.f32 %v1670_v54, %v1670_v54 }
 0x24d   :  { %v1239_v1 = vsub.f32 1.0, %v1238_v21  ;;  %v1230_v55 = vsel %vm6891_vm1, %v6825_v30, %v1226_v24  ;;  %vm6898_vm4 = vcmp.eq.f32.partialorder %v1231_v47, 8.507059e+37  ;;  %vm1677_vm5 = vweird.f32 %v6667_v9  ;;  %v2903_v24 = vpop.f32.mrf.mxu3 }
 0x24e   :  { %3489 = vst [vmem:[%s7061_s3 + $0x1d0] sm:$0xff] %v3425_v63  ;;  %v3267_v32 = vadd.f32 %v6727_v37, %v3138_v17  ;;  %v3104_v13 = vmul.f32 %v4712_v4, %v3039_v60  ;;  %v1234_v30 = vor.u32 1.1754944e-38, %v1233_v40  ;;  %vm1678_vm6 = vweird.f32 %v6716_v34 }
 0x24f   :  { %v1681_v46 = vand.u32 2147483647, %v6667_v9  ;;  %v1683_v51 = vand.u32 2147483648, %v6667_v9  ;;  %v6915_v26 = vpop.eup %4083  ;;  %v1676_v37 = vadd.f32 %v6716_v34, %v1675_v5  ;;  %v1240_v15 = vmul.f32 %v6880_v10, %v1239_v1  ;;  %vm1679_vm3 = vmor %vm1677_vm5, %vm1678_vm6 }
 0x250   :  { %v3331_v23 = vadd.f32 %v3267_v32, %v2810_v11  ;;  %v3168_v62 = vadd.f32 %v3104_v13, %v2975_v2  ;;  %v6921_v33 = vmul.f32 %v6915_v26, %v6873_v27  ;;  %v1235_v49 = vsel %vm6898_vm4, %v1234_v30, %v1230_v55 }
 0x251   :  { %vm6925_vm2 = vcmp.eq.f32.partialorder %v1681_v46, 8.507059e+37  ;;  %v1684_v25 = vor.u32 1.1754944e-38, %v1683_v51  ;;  %v2946_v39 = vmul.f32 %v4704_v3, %v1235_v49  ;;  %v3010_v22 = vmul.f32 %v1235_v49, %v1235_v49 }
 0x252   :  { %v3396_v42 = vadd.f32 %v4724_v38, %v3331_v23  ;;  %v3297_v50 = vadd.f32 %v6593_v35, %v3168_v62  ;;  %v1719_v11 = vsub.f32 1.0, %v6921_v33  ;;  %v1680_v14 = vsel %vm1679_vm3, %v6716_v34, %v1676_v37  ;;  %v7158_v37 = vld [vmem:[#allocation2_spill] sm:$0xff] }
 0x253   :  { %v1241_v59 = vadd.f32 %v6880_v10, %v1240_v15  ;;  %vm1242_vm7 = vweird.f32 %v6838_v57  ;;  %v3075_v61 = vmul.f32 %v4712_v4, %v3010_v22  ;;  %v1685_v9 = vsel %vm6925_vm2, %v1684_v25, %v1680_v14  ;;  %v2816_v49 = vpop.f32.mrf.mxu1 }
 0x254   :  { %3460 = vst [vmem:[%s7061_s3 + $0xe8] sm:$0xff] %v3396_v42  ;;  %v3361_v35 = vadd.f32 %v3297_v50, %v2900_v58  ;;  %vm1243_vm8 = vweird.f32 %v6880_v10  ;;  %v2976_v21 = vmul.f32 %v4704_v3, %v1685_v9  ;;  %v3040_v34 = vmul.f32 %v1685_v9, %v1685_v9 }
 0x255   :  { %vm6948_vm9 = vmor %vm1242_vm7, %vm1243_vm8  ;;  %v1246_v47 = vand.u32 2147483647, %v6838_v57  ;;  %v1248_v63 = vand.u32 2147483648, %v6838_v57  ;;  %v3139_v17 = vadd.f32 %v3075_v61, %v2946_v39  ;;  %v1690_v60 = vmul.f32 %v6779_v7, %v1689_v48  ;;  %v2906_v25 = vpop.f32.mrf.mxu3 }
 0x256   :  { %v3426_v58 = vadd.f32 %v4724_v38, %v3361_v35  ;;  %v1245_v2 = vsel %vm6948_vm9, %v6880_v10, %v1241_v59  ;;  %v3105_v12 = vmul.f32 %v4712_v4, %v3040_v34  ;;  %vm1692_vm11 = vweird.f32 %v6740_v20 }
 0x257   :  { %vm1247_vm10 = vcmp.eq.f32.partialorder %v1246_v47, 8.507059e+37  ;;  %v1249_v1 = vor.u32 1.1754944e-38, %v1248_v63  ;;  %v3268_v57 = vadd.f32 %v6761_v8, %v3139_v17  ;;  %v1691_v55 = vadd.f32 %v6779_v7, %v1690_v60 }
 0x258   :  { %3490 = vst [vmem:[%s7061_s3 + $0x1d8] sm:$0xff] %v3426_v58  ;;  %vm1693_vm12 = vweird.f32 %v6779_v7  ;;  %v1696_v18 = vand.u32 2147483647, %v6740_v20  ;;  %v3169_v10 = vadd.f32 %v3105_v12, %v2976_v21  ;;  %v1698_v40 = vand.u32 2147483648, %v6740_v20 }
 0x259   :  { %v1250_v48 = vsel %vm1247_vm10, %v1249_v1, %v1245_v2  ;;  %vm6970_vm13 = vmor %vm1692_vm11, %vm1693_vm12  ;;  %v7157_v32 = vsub.f32 1.0, %v4794_v29  ;;  %v3332_v5 = vadd.f32 %v3268_v57, %v2813_v41  ;;  %vm1257_vm14 = vweird.f32 %v7158_v37 }
 0x25a   :  { %v2947_v8 = vmul.f32 %v4704_v3, %v1250_v48  ;;  %v3011_v30 = vmul.f32 %v1250_v48, %v1250_v48  ;;  %v1695_v46 = vsel %vm6970_vm13, %v6779_v7, %v1691_v55  ;;  %v3298_v51 = vadd.f32 %v6659_v6, %v3169_v10 }
 0x25b   :  { %v1255_v13 = vmul.f32 %v4779_v16, %v7157_v32  ;;  %vm1697_vm0 = vcmp.eq.f32.partialorder %v1696_v18, 8.507059e+37  ;;  %v1699_v23 = vor.u32 1.1754944e-38, %v1698_v40  ;;  %v3397_v20 = vadd.f32 %v4724_v38, %v3332_v5  ;;  %v2819_v57 = vpop.f32.mrf.mxu1 }
 0x25c   :  { %v3076_v29 = vmul.f32 %v4712_v4, %v3011_v30  ;;  %vm1258_vm15 = vweird.f32 %v4779_v16  ;;  %v3362_v15 = vadd.f32 %v3298_v51, %v2903_v24  ;;  %v1261_v6 = vand.u32 2147483647, %v7158_v37 }
 0x25d   :  { %v1256_v62 = vadd.f32 %v4779_v16, %v1255_v13  ;;  %v1700_v31 = vsel %vm1697_vm0, %v1699_v23, %v1695_v46  ;;  %vm6988_vm1 = vmor %vm1257_vm14, %vm1258_vm15  ;;  %v1263_v42 = vand.u32 2147483648, %v7158_v37  ;;  %3461 = vst [vmem:[%s7061_s3 + $0xf0] sm:$0xff] %v3397_v20  ;;  %v1705_v59 = vmul.f32 %v6850_v53, %v1704_v44  ;;  %v2909_v55 = vpop.f32.mrf.mxu3 }
 0x25e   :  { %v3140_v50 = vadd.f32 %v3076_v29, %v2947_v8  ;;  %v2977_v39 = vmul.f32 %v4704_v3, %v1700_v31  ;;  %v3041_v22 = vmul.f32 %v1700_v31, %v1700_v31  ;;  %v3427_v14 = vadd.f32 %v4724_v38, %v3362_v15 }
 0x25f   :  { %v1260_v41 = vsel %vm6988_vm1, %v4779_v16, %v1256_v62  ;;  %vm1262_vm4 = vcmp.eq.f32.partialorder %v1261_v6, 8.507059e+37  ;;  %v1264_v24 = vor.u32 1.1754944e-38, %v1263_v42  ;;  %vm1707_vm5 = vweird.f32 %v6803_v45 }
 0x260   :  { %v3269_v35 = vadd.f32 %v6819_v43, %v3140_v50  ;;  %v3106_v61 = vmul.f32 %v4712_v4, %v3041_v22  ;;  %vm1708_vm6 = vweird.f32 %v6850_v53  ;;  %3491 = vst [vmem:[%s7061_s3 + $0x1e0] sm:$0xff] %v3427_v14  ;;  %v1706_v9 = vadd.f32 %v6850_v53, %v1705_v59 }
 0x261   :  { %v1265_v16 = vsel %vm1262_vm4, %v1264_v24, %v1260_v41  ;;  %v1711_v21 = vand.u32 2147483647, %v6803_v45  ;;  %v1713_v0 = vand.u32 2147483648, %v6803_v45  ;;  %v3235_v43 = vmul.f32 %v4675_v36, %v6679_v56  ;;  %vm1709_vm2 = vmor %vm1707_vm5, %vm1708_vm6 }
 0x262   :  { %v3333_v44 = vadd.f32 %v3269_v35, %v2816_v49  ;;  %v3170_v34 = vadd.f32 %v3106_v61, %v2977_v39  ;;  %v3012_v54 = vmul.f32 %v1265_v16, %v1265_v16  ;;  %v2948_v47 = vmul.f32 %v4704_v3, %v1265_v16 }
 0x263   :  { %v1710_v63 = vsel %vm1709_vm2, %v6850_v53, %v1706_v9  ;;  %v1714_v58 = vor.u32 1.1754944e-38, %v1713_v0  ;;  %v1720_v17 = vmul.f32 %v6915_v26, %v1719_v11  ;;  %vm1712_vm3 = vcmp.eq.f32.partialorder %v1711_v21, 8.507059e+37 }
 0x264   :  { %v3398_v2 = vadd.f32 %v4724_v38, %v3333_v44  ;;  %v3299_v60 = vadd.f32 %v3235_v43, %v3170_v34  ;;  %v3077_v45 = vmul.f32 %v4712_v4, %v3012_v54  ;;  %vm1722_vm7 = vweird.f32 %v6873_v27 }
 0x265   :  { %v1715_v56 = vsel %vm1712_vm3, %v1714_v58, %v1710_v63  ;;  %v1721_v12 = vadd.f32 %v6915_v26, %v1720_v17  ;;  %vm1723_vm8 = vweird.f32 %v6915_v26  ;;  %v1726_v1 = vand.u32 2147483647, %v6873_v27  ;;  %v2912_v49 = vpop.f32.mrf.mxu3 }
 0x266   :  { %3462 = vst [vmem:[%s7061_s3 + $0xf8] sm:$0xff] %v3398_v2  ;;  %v3363_v53 = vadd.f32 %v3299_v60, %v2906_v25  ;;  %v3141_v33 = vadd.f32 %v3077_v45, %v2948_v47  ;;  %v3042_v11 = vmul.f32 %v1715_v56, %v1715_v56  ;;  %v2978_v18 = vmul.f32 %v4704_v3, %v1715_v56  ;;  %vm1724_vm9 = vmor %vm1722_vm7, %vm1723_vm8 }
 0x267   :  { %v1728_v10 = vand.u32 2147483648, %v6873_v27  ;;  %v1725_v13 = vsel %vm1724_vm9, %v6915_v26, %v1721_v12  ;;  %v3236_v8 = vmul.f32 %v4675_v36, %v6757_v52  ;;  %vm1727_vm10 = vcmp.eq.f32.partialorder %v1726_v1, 8.507059e+37 }
 0x268   :  { %v3428_v48 = vadd.f32 %v4724_v38, %v3363_v53  ;;  %v3270_v40 = vadd.f32 %v7161_v19, %v3141_v33  ;;  %v3107_v32 = vmul.f32 %v4712_v4, %v3042_v11  ;;  %v3237_v29 = vmul.f32 %v4675_v36, %v6815_v28 }
 0x269   :  { %v1729_v5 = vor.u32 1.1754944e-38, %v1728_v10 }
 0x26a   :  { %3492 = vst [vmem:[%s7061_s3 + $0x1e8] sm:$0xff] %v3428_v48  ;;  %v3334_v30 = vadd.f32 %v3270_v40, %v2819_v57  ;;  %v3171_v46 = vadd.f32 %v3107_v32, %v2978_v18 }
 0x26b   :  { %v1730_v27 = vsel %vm1727_vm10, %v1729_v5, %v1725_v13 }
 0x26c   :  { %v3399_v51 = vadd.f32 %v4724_v38, %v3334_v30  ;;  %v3300_v23 = vadd.f32 %v3236_v8, %v3171_v46  ;;  %v3043_v62 = vmul.f32 %v1730_v27, %v1730_v27  ;;  %v2979_v20 = vmul.f32 %v4704_v3, %v1730_v27 }
 0x26e   :  { %3463 = vst [vmem:[%s7061_s3 + $0x100] sm:$0xff] %v3399_v51  ;;  %v3364_v26 = vadd.f32 %v3300_v23, %v2909_v55  ;;  %v3108_v52 = vmul.f32 %v4712_v4, %v3043_v62 }
 0x270   :  { %v3429_v37 = vadd.f32 %v4724_v38, %v3364_v26  ;;  %v3172_v15 = vadd.f32 %v3108_v52, %v2979_v20 }
 0x272   :  { %3493 = vst [vmem:[%s7061_s3 + $0x1f0] sm:$0xff] %v3429_v37  ;;  %v3301_v31 = vadd.f32 %v3237_v29, %v3172_v15 }
 0x274   :  { %v3365_v25 = vadd.f32 %v3301_v31, %v2912_v49 }
 0x276   :  { %v3430_v7 = vadd.f32 %v4724_v38, %v3365_v25 }
 0x278   :  { %3494 = vst [vmem:[%s7061_s3 + $0x1f8] sm:$0xff] %v3430_v7 }

// kernel: detect_forward.4
= control target key start
LH: loop header
LB: loop body
LE: loop exit
PB: predicated region body
PF: predicated region fallthrough
CT: control target
= control target key end

     0   :  { %v1099_v1 = vmov 8.0   ;;  %v469_v4 = vlaneseq  ;;  %vm90_vm0 = vcmask 261120   ;;  %vm673_vm3 = vcmask 64512   ;;  %s1875_s1 = inlined_call_operand.vmem [shape: bf16[32,128], index: 1, kind: input, shape index: {}]   ;;  %s1876_s2 = inlined_call_operand.vmem [shape: f32[16,128], index: 2, kind: input, shape index: {}]   ;;  %s1877_s0 = inlined_call_operand.vmem [shape: bf16[128,32], index: 0, kind: input, shape index: {}]   ;;  %s1878_s3 = inlined_call_operand.vmem [shape: f32[128,128], index: 3, kind: output, shape index: {}]  }
   0x1   :  { %v1028_v0 = vld [vmem:[%s1875_s1 + $0x8] sm:$0xff]  ;;  %1033 = vrcp.f32 %v1099_v1  ;;  %v1027_v2 = vld [vmem:[%s1875_s1] sm:$0xff] }
   0x2   :  { %121 = vmatpush.bf16.msra.mxu0 %v1028_v0  ;;  %1029 = vmatpush.bf16.msra.mxu2 %v1028_v0  ;;  %v36_v3 = vld [vmem:[%s1876_s2 + $0x8] sm:$0xff]  ;;  %v1019_v5 = vld [vmem:[%s1877_s0] sm:$0xff]  ;;  %v1135_v8 = vshrl.u32 %v469_v4, 7  ;;  %v1169_v36 = vand.u32 127, %v469_v4 }
   0x3   :  { %737 = vmatpush.msra.mxu1 %v36_v3  ;;  %1031 = vmatpush.msra.mxu3 %v36_v3  ;;  %v1023_v6 = vld [vmem:[%s1877_s0 + $0x20] sm:$0xff]  ;;  %v1020_v34 = vld [vmem:[%s1877_s0 + $0x8] sm:$0xff] }
   0x4   :  { %v471_v10 = vadd.s32 8, %v1135_v8  ;;  %v1141_v12 = vadd.s32 16, %v1135_v8  ;;  %v479_v13 = vadd.s32 72, %v1135_v8  ;;  %v505_v15 = vcvt.s32.f32 %v1135_v8  ;;  %v1024_v35 = vld [vmem:[%s1877_s0 + $0x28] sm:$0xff] }
   0x5   :  { %v1149_v21 = vadd.s32 80, %v1135_v8  ;;  %v1157_v25 = vadd.s32 24, %v1135_v8  ;;  %v1175_v41 = vadd.s32 32, %v1135_v8  ;;  %vm656_vm2 = vcmp.eq.s32.totalorder %v1169_v36, 0 }
   0x6   :  { %122 = vmatpush.bf16.msra.mxu0 %v1027_v2  ;;  %1030 = vmatpush.bf16.msra.mxu2 %v1027_v2  ;;  %v506_v16 = vcvt.s32.f32 %v471_v10  ;;  %v507_v18 = vcvt.s32.f32 %v1141_v12  ;;  %v514_v19 = vcvt.s32.f32 %v479_v13  ;;  %v481_v0 = vadd.s32 88, %v1135_v8 }
   0x7   :  { %v1034_v7 = vpop.eup %1033  ;;  %v515_v29 = vcvt.s32.f32 %v1149_v21  ;;  %v508_v38 = vcvt.s32.f32 %v1157_v25  ;;  %v509_v53 = vcvt.s32.f32 %v1175_v41  ;;  %v1196_v2 = vadd.s32 96, %v1135_v8 }
   0x8   :  { %v522_v9 = vmul.f32 8.0, %v1034_v7  ;;  %vm526_vm1 = vweird.f32 %v1034_v7  ;;  %v1266_v25 = vadd.s32 112, %v1135_v8 }
   0x9   :  { %979 = vmatmul.msk.bf16.vlgmr.msra.gmra.mxu0 %vm90_vm0, %v1019_v5  ;;  %983 = vmatmul.msk.bf16.vlgmr.msra.gmra.mxu2 %vm90_vm0, %v1023_v6  ;;  %v516_v6 = vcvt.s32.f32 %v481_v0 }
   0xa   :  { %v523_v11 = vsub.f32 1.0, %v522_v9 }
   0xc   :  { %v524_v14 = vmul.f32 %v1034_v7, %v523_v11  ;;  %v517_v11 = vcvt.s32.f32 %v1196_v2 }
   0xe   :  { %v525_v17 = vadd.f32 %v1034_v7, %v524_v14 }
  0x10   :  { %v1146_v20 = vsel %vm526_vm1, %v1034_v7, %v525_v17 }
  0x11   :  { %v528_v22 = vmul.f32 %v1146_v20, %v505_v15  ;;  %v529_v23 = vmul.f32 %v1146_v20, %v506_v16  ;;  %v530_v24 = vmul.f32 %v1146_v20, %v507_v18  ;;  %v537_v26 = vmul.f32 %v1146_v20, %v514_v19 }
  0x12   :  { %v538_v42 = vmul.f32 %v1146_v20, %v515_v29  ;;  %v531_v49 = vmul.f32 %v1146_v20, %v508_v38  ;;  %v532_v4 = vmul.f32 %v1146_v20, %v509_v53 }
  0x13   :  { %v544_v27 = vfloor.f32 %v528_v22  ;;  %v545_v28 = vfloor.f32 %v529_v23  ;;  %v553_v33 = vfloor.f32 %v537_v26  ;;  %v1171_v37 = vfloor.f32 %v530_v24  ;;  %v1021_v24 = vld [vmem:[%s1877_s0 + $0x10] sm:$0xff] }
  0x14   :  { %v554_v57 = vfloor.f32 %v538_v42  ;;  %v1191_v60 = vfloor.f32 %v531_v49  ;;  %v1215_v21 = vfloor.f32 %v532_v4  ;;  %v1025_v26 = vld [vmem:[%s1877_s0 + $0x30] sm:$0xff] }
  0x15   :  { %v560_v30 = vmul.f32 8.0, %v544_v27  ;;  %v592_v31 = vmul.f32 %v544_v27, %v1146_v20  ;;  %v593_v32 = vmul.f32 %v545_v28, %v1146_v20  ;;  %v569_v45 = vmul.f32 8.0, %v553_v33 }
  0x16   :  { %v601_v46 = vmul.f32 %v553_v33, %v1146_v20  ;;  %v561_v47 = vmul.f32 8.0, %v545_v28  ;;  %v594_v48 = vmul.f32 %v1171_v37, %v1146_v20  ;;  %v602_v63 = vmul.f32 %v554_v57, %v1146_v20 }
  0x17   :  { %v608_v39 = vfloor.f32 %v592_v31  ;;  %v609_v40 = vfloor.f32 %v593_v32  ;;  %v576_v43 = vsub.f32 %v505_v15, %v560_v30  ;;  %v585_v55 = vsub.f32 %v514_v19, %v569_v45 }
  0x18   :  { %v617_v52 = vfloor.f32 %v601_v46  ;;  %v577_v58 = vsub.f32 %v506_v16, %v561_v47  ;;  %v610_v59 = vfloor.f32 %v594_v48  ;;  %v570_v1 = vmul.f32 8.0, %v554_v57 }
  0x19   :  { %v624_v44 = vmul.f32 8.0, %v608_v39  ;;  %980 = vmatmul.msk.bf16.gmra.mxu0 %vm90_vm0, %v1020_v34  ;;  %984 = vmatmul.msk.bf16.gmra.mxu2 %vm90_vm0, %v1024_v35  ;;  %v625_v51 = vmul.f32 8.0, %v609_v40  ;;  %v618_v5 = vfloor.f32 %v602_v63  ;;  %v562_v7 = vmul.f32 8.0, %v1171_v37 }
  0x1a   :  { %v633_v56 = vmul.f32 8.0, %v617_v52  ;;  %v626_v9 = vmul.f32 8.0, %v610_v59  ;;  %v595_v10 = vmul.f32 %v1191_v60, %v1146_v20  ;;  %v1211_v15 = vadd.s32 40, %v1135_v8 }
  0x1b   :  { %v640_v50 = vsub.f32 %v544_v27, %v624_v44  ;;  %v641_v61 = vsub.f32 %v545_v28, %v625_v51  ;;  %v634_v14 = vmul.f32 8.0, %v618_v5  ;;  %v539_v16 = vmul.f32 %v1146_v20, %v516_v6 }
  0x1c   :  { %v649_v62 = vsub.f32 %v553_v33, %v633_v56  ;;  %v586_v17 = vsub.f32 %v515_v29, %v570_v1  ;;  %v540_v19 = vmul.f32 %v1146_v20, %v517_v11  ;;  %v578_v27 = vsub.f32 %v507_v18, %v562_v7 }
  0x1d   :  { %v657_v54 = vsel %vm656_vm2, %v576_v43, %v640_v50  ;;  %v658_v13 = vsel %vm656_vm2, %v577_v58, %v641_v61  ;;  %v650_v22 = vsub.f32 %v554_v57, %v634_v14  ;;  %v555_v23 = vfloor.f32 %v539_v16 }
  0x1e   :  { %1003 = vmatmul.msk.f32.vlgmr.msra.gmra.mxu1 %vm673_vm3, %v657_v54  ;;  %v666_v3 = vsel %vm656_vm2, %v585_v55, %v649_v62  ;;  %v1226_v28 = vfloor.f32 %v540_v19  ;;  %v642_v29 = vsub.f32 %v1171_v37, %v626_v9  ;;  %v611_v30 = vfloor.f32 %v595_v10  ;;  %v1026_v19 = vld [vmem:[%s1877_s0 + $0x38] sm:$0xff] }
  0x1f   :  { %1012 = vmatmul.msk.f32.vlgmr.msra.gmra.mxu3 %vm673_vm3, %v666_v3  ;;  %v510_v31 = vcvt.s32.f32 %v1211_v15  ;;  %v603_v32 = vmul.f32 %v555_v23, %v1146_v20  ;;  %v667_v33 = vsel %vm656_vm2, %v586_v17, %v650_v22  ;;  %v571_v34 = vmul.f32 8.0, %v555_v23  ;;  %v1022_v17 = vld [vmem:[%s1877_s0 + $0x18] sm:$0xff] }
  0x20   :  { %v596_v35 = vmul.f32 %v1215_v21, %v1146_v20  ;;  %v604_v12 = vmul.f32 %v1226_v28, %v1146_v20  ;;  %v563_v18 = vmul.f32 8.0, %v1191_v60  ;;  %v1241_v37 = vadd.s32 48, %v1135_v8 }
  0x21   :  { %v619_v39 = vfloor.f32 %v603_v32  ;;  %v1244_v40 = vadd.s32 104, %v1135_v8  ;;  %v659_v42 = vsel %vm656_vm2, %v578_v27, %v642_v29  ;;  %v627_v43 = vmul.f32 8.0, %v611_v30 }
  0x22   :  { %v533_v44 = vmul.f32 %v1146_v20, %v510_v31  ;;  %v587_v46 = vsub.f32 %v516_v6, %v571_v34  ;;  %v620_v47 = vfloor.f32 %v604_v12  ;;  %v612_v49 = vfloor.f32 %v596_v35 }
  0x23   :  { %v635_v45 = vmul.f32 8.0, %v619_v39  ;;  %v518_v48 = vcvt.s32.f32 %v1244_v40  ;;  %v579_v51 = vsub.f32 %v508_v38, %v563_v18  ;;  %v511_v52 = vcvt.s32.f32 %v1241_v37 }
  0x24   :  { %v643_v55 = vsub.f32 %v1191_v60, %v627_v43  ;;  %v1259_v56 = vfloor.f32 %v533_v44  ;;  %v572_v57 = vmul.f32 8.0, %v1226_v28  ;;  %v478_v58 = vadd.s32 64, %v1135_v8 }
  0x25   :  { %v651_v50 = vsub.f32 %v555_v23, %v635_v45  ;;  %v541_v54 = vmul.f32 %v1146_v20, %v518_v48  ;;  %v636_v61 = vmul.f32 8.0, %v620_v47  ;;  %v564_v38 = vmul.f32 8.0, %v1215_v21 }
  0x26   :  { %1004 = vmatmul.msk.f32.gmra.mxu1 %vm673_vm3, %v658_v13  ;;  %v628_v63 = vmul.f32 8.0, %v612_v49  ;;  %v513_v0 = vcvt.s32.f32 %v478_v58  ;;  %v534_v60 = vmul.f32 %v1146_v20, %v511_v52  ;;  %v1273_v1 = vadd.s32 56, %v1135_v8 }
  0x27   :  { %1013 = vmatmul.msk.f32.gmra.mxu3 %vm673_vm3, %v667_v33  ;;  %v668_v59 = vsel %vm656_vm2, %v587_v46, %v651_v50  ;;  %v557_v62 = vfloor.f32 %v541_v54  ;;  %v519_v3 = vcvt.s32.f32 %v1266_v25  ;;  %v660_v4 = vsel %vm656_vm2, %v579_v51, %v643_v55 }
  0x28   :  { %v597_v5 = vmul.f32 %v1259_v56, %v1146_v20  ;;  %v536_v6 = vmul.f32 %v1146_v20, %v513_v0  ;;  %v588_v7 = vsub.f32 %v517_v11, %v572_v57  ;;  %v652_v9 = vsub.f32 %v1226_v28, %v636_v61 }
  0x29   :  { %981 = vmatmul.msk.bf16.gmra.mxu0 %vm90_vm0, %v1021_v24  ;;  %985 = vmatmul.msk.bf16.gmra.mxu2 %vm90_vm0, %v1025_v26  ;;  %v605_v2 = vmul.f32 %v557_v62, %v1146_v20  ;;  %v542_v13 = vmul.f32 %v1146_v20, %v519_v3  ;;  %v580_v14 = vsub.f32 %v509_v53, %v564_v38  ;;  %v550_v22 = vfloor.f32 %v534_v60 }
  0x2a   :  { %v552_v16 = vfloor.f32 %v536_v6  ;;  %v644_v11 = vsub.f32 %v1215_v21, %v628_v63  ;;  %v512_v23 = vcvt.s32.f32 %v1273_v1  ;;  %v613_v26 = vfloor.f32 %v597_v5 }
  0x2b   :  { %v621_v10 = vfloor.f32 %v605_v2  ;;  %v558_v24 = vfloor.f32 %v542_v13  ;;  %v485_v27 = vadd.s32 120, %v1135_v8  ;;  %v669_v28 = vsel %vm656_vm2, %v588_v7, %v652_v9  ;;  %v35_v13 = vld [vmem:[%s1876_s2] sm:$0xff] }
  0x2c   :  { %v568_v41 = vmul.f32 8.0, %v552_v16  ;;  %v600_v53 = vmul.f32 %v552_v16, %v1146_v20  ;;  %v573_v29 = vmul.f32 8.0, %v557_v62  ;;  %v661_v21 = vsel %vm656_vm2, %v580_v14, %v644_v11 }
  0x2d   :  { %v637_v30 = vmul.f32 8.0, %v621_v10  ;;  %v606_v32 = vmul.f32 %v558_v24, %v1146_v20  ;;  %v520_v34 = vcvt.s32.f32 %v485_v27  ;;  %v565_v35 = vmul.f32 8.0, %v1259_v56 }
  0x2e   :  { %1005 = vmatmul.msk.f32.gmra.mxu1 %vm673_vm3, %v659_v42  ;;  %v616_v33 = vfloor.f32 %v600_v53  ;;  %v598_v8 = vmul.f32 %v550_v22, %v1146_v20  ;;  %v535_v39 = vmul.f32 %v1146_v20, %v512_v23  ;;  %v629_v12 = vmul.f32 8.0, %v613_v26 }
  0x2f   :  { %1014 = vmatmul.msk.f32.gmra.mxu3 %vm673_vm3, %v668_v59  ;;  %v584_v18 = vsub.f32 %v513_v0, %v568_v41  ;;  %v543_v42 = vmul.f32 %v1146_v20, %v520_v34  ;;  %v589_v43 = vsub.f32 %v518_v48, %v573_v29  ;;  %v653_v44 = vsub.f32 %v557_v62, %v637_v30 }
  0x30   :  { %v632_v40 = vmul.f32 8.0, %v616_v33  ;;  %v622_v45 = vfloor.f32 %v606_v32  ;;  %v581_v49 = vsub.f32 %v510_v31, %v565_v35  ;;  %v645_v50 = vsub.f32 %v1259_v56, %v629_v12 }
  0x31   :  { %v559_v47 = vfloor.f32 %v543_v42  ;;  %v614_v51 = vfloor.f32 %v598_v8  ;;  %v551_v54 = vfloor.f32 %v535_v39  ;;  %v670_v57 = vsel %vm656_vm2, %v589_v43, %v653_v44 }
  0x32   :  { %v648_v46 = vsub.f32 %v552_v16, %v632_v40  ;;  %v574_v48 = vmul.f32 8.0, %v558_v24  ;;  %v638_v58 = vmul.f32 8.0, %v622_v45  ;;  %v662_v61 = vsel %vm656_vm2, %v581_v49, %v645_v50 }
  0x33   :  { %v607_v59 = vmul.f32 %v559_v47, %v1146_v20  ;;  %v566_v62 = vmul.f32 8.0, %v550_v22  ;;  %v630_v15 = vmul.f32 8.0, %v614_v51  ;;  %v599_v31 = vmul.f32 %v551_v54, %v1146_v20 }
  0x34   :  { %v665_v55 = vsel %vm656_vm2, %v584_v18, %v648_v46  ;;  %v590_v56 = vsub.f32 %v519_v3, %v574_v48  ;;  %v654_v25 = vsub.f32 %v558_v24, %v638_v58  ;;  %v575_v2 = vmul.f32 8.0, %v559_v47 }
  0x35   :  { %v623_v38 = vfloor.f32 %v607_v59  ;;  %v582_v63 = vsub.f32 %v511_v52, %v566_v62  ;;  %v646_v0 = vsub.f32 %v550_v22, %v630_v15  ;;  %v615_v60 = vfloor.f32 %v599_v31 }
  0x36   :  { %1006 = vmatmul.msk.f32.gmra.mxu1 %vm673_vm3, %v660_v4  ;;  %v671_v1 = vsel %vm656_vm2, %v590_v56, %v654_v25  ;;  %v567_v5 = vmul.f32 8.0, %v551_v54  ;;  %v591_v3 = vsub.f32 %v520_v34, %v575_v2  ;;  %v1342_v14 = vperm.slane %v35_v13, 0 }
  0x37   :  { %1015 = vmatmul.msk.f32.gmra.mxu3 %vm673_vm3, %v669_v28  ;;  %v639_v4 = vmul.f32 8.0, %v623_v38  ;;  %v663_v20 = vsel %vm656_vm2, %v582_v63, %v646_v0  ;;  %v631_v6 = vmul.f32 8.0, %v615_v60  ;;  %v1351_v35 = vperm.slane %v35_v13, 3 }
  0x38   :  { %v583_v37 = vsub.f32 %v512_v23, %v567_v5  ;;  %v1357_v43 = vperm.slane %v35_v13, 1 }
  0x39   :  { %982 = vmatmul.msk.bf16.gmra.mxu0 %vm90_vm0, %v1022_v17  ;;  %986 = vmatmul.msk.bf16.gmra.mxu2 %vm90_vm0, %v1026_v19  ;;  %v655_v7 = vsub.f32 %v559_v47, %v639_v4  ;;  %v647_v52 = vsub.f32 %v551_v54, %v631_v6  ;;  %v1362_v47 = vperm.slane %v35_v13, 2  ;;  %v1371_v54 = vperm.slane %v35_v13, 4 }
  0x3b   :  { %v672_v9 = vsel %vm656_vm2, %v591_v3, %v655_v7  ;;  %v664_v10 = vsel %vm656_vm2, %v583_v37, %v647_v52 }
  0x3e   :  { %1007 = vmatmul.msk.f32.gmra.mxu1 %vm673_vm3, %v661_v21 }
  0x3f   :  { %1016 = vmatmul.msk.f32.gmra.mxu3 %vm673_vm3, %v670_v57 }
  0x46   :  { %1008 = vmatmul.msk.f32.gmra.mxu1 %vm673_vm3, %v662_v61 }
  0x47   :  { %1017 = vmatmul.msk.f32.gmra.mxu3 %vm673_vm3, %v671_v1 }
  0x4e   :  { %1009 = vmatmul.msk.f32.gmra.mxu1 %vm673_vm3, %v663_v20 }
  0x4f   :  { %1018 = vmatmul.msk.f32.gmra.mxu3 %vm673_vm3, %v672_v9 }
  0x56   :  { %1010 = vmatmul.msk.f32.gmra.mxu1 %vm673_vm3, %v664_v10 }
  0x5e   :  { %1011 = vmatmul.msk.f32.gmra.mxu1 %vm673_vm3, %v665_v55 }
  0x86   :  { %v124_v16 = vpop.f32.mrf.mxu0 }
  0x87   :  { %v125_v17 = vadd.f32 %v124_v16, %v1342_v14 }
  0x89   :  { %v987_v19 = vmul.f32 -1.442695, %v125_v17  ;;  %v1360_v46 = vmul.f32 %v1351_v35, %v125_v17 }
  0x8b   :  { %1035 = vpow2.f32 %v987_v19 }
  0x8c   :  { %v144_v11 = vpop.f32.mrf.mxu2 }
  0x8d   :  { %v145_v36 = vadd.f32 %v144_v11, %v1342_v14 }
  0x8e   :  { %v126_v22 = vpop.f32.mrf.mxu0 }
  0x8f   :  { %v995_v23 = vmul.f32 -1.442695, %v145_v36  ;;  %v127_v24 = vadd.f32 %v126_v22, %v1342_v14  ;;  %v1366_v50 = vmul.f32 %v1351_v35, %v145_v36 }
  0x91   :  { %v1036_v26 = vpop.eup %1035  ;;  %1037 = vpow2.f32 %v995_v23  ;;  %v988_v41 = vmul.f32 -1.442695, %v127_v24  ;;  %v1369_v51 = vmul.f32 %v1351_v35, %v127_v24 }
  0x92   :  { %v212_v53 = vadd.f32 1.0, %v1036_v26 }
  0x93   :  { %1039 = vpow2.f32 %v988_v41 }
  0x94   :  { %1041 = vrcp.f32 %v212_v53  ;;  %v146_v27 = vpop.f32.mrf.mxu2  ;;  %v237_v40 = vand.u32 2147483647, %v212_v53  ;;  %v239_v42 = vand.u32 2147483648, %v212_v53  ;;  %vm233_vm4 = vweird.f32 %v212_v53 }
  0x95   :  { %v147_v28 = vadd.f32 %v146_v27, %v1342_v14 }
  0x96   :  { %v129_v29 = vpop.f32.mrf.mxu0  ;;  %vm1378_vm6 = vcmp.eq.f32.partialorder %v237_v40, 8.507059e+37  ;;  %v240_v31 = vor.u32 1.1754944e-38, %v239_v42 }
  0x97   :  { %v1038_v30 = vpop.eup %1037  ;;  %v996_v32 = vmul.f32 -1.442695, %v147_v28  ;;  %v130_v33 = vadd.f32 %v129_v29, %v1342_v14  ;;  %v1392_v4 = vmul.f32 %v1351_v35, %v147_v28 }
  0x98   :  { %v1349_v34 = vadd.f32 1.0, %v1038_v30 }
  0x99   :  { %v1040_v21 = vpop.eup %1039  ;;  %1043 = vpow2.f32 %v996_v32  ;;  %v989_v8 = vmul.f32 -1.442695, %v130_v33  ;;  %v1400_v6 = vmul.f32 %v1351_v35, %v130_v33 }
  0x9a   :  { %v1042_v39 = vpop.eup %1041  ;;  %1045 = vrcp.f32 %v1349_v34  ;;  %v1354_v12 = vadd.f32 1.0, %v1040_v21 }
  0x9b   :  { %v229_v18 = vmul.f32 %v1042_v39, %v212_v53  ;;  %1047 = vpow2.f32 %v989_v8  ;;  %vm234_vm5 = vweird.f32 %v1042_v39  ;;  %v1382_v56 = vpop.f32.mrf.mxu1 }
  0x9c   :  { %1049 = vrcp.f32 %v1354_v12  ;;  %v149_v44 = vpop.f32.mrf.mxu2  ;;  %v252_v25 = vand.u32 2147483647, %v1354_v12  ;;  %v254_v60 = vand.u32 2147483648, %v1354_v12  ;;  %vm235_vm7 = vmor %vm233_vm4, %vm234_vm5  ;;  %vm248_vm8 = vweird.f32 %v1354_v12 }
  0x9d   :  { %v230_v45 = vsub.f32 1.0, %v229_v18  ;;  %v150_v49 = vadd.f32 %v149_v44, %v1342_v14 }
  0x9e   :  { %v131_v55 = vpop.f32.mrf.mxu0  ;;  %vm1406_vm9 = vcmp.eq.f32.partialorder %v252_v25, 8.507059e+37  ;;  %v255_v13 = vor.u32 1.1754944e-38, %v254_v60 }
  0x9f   :  { %v1044_v57 = vpop.eup %1043  ;;  %v231_v48 = vmul.f32 %v1042_v39, %v230_v45  ;;  %v997_v58 = vmul.f32 -1.442695, %v150_v49  ;;  %v132_v59 = vadd.f32 %v131_v55, %v1342_v14  ;;  %v1413_v19 = vmul.f32 %v1351_v35, %v150_v49 }
  0xa0   :  { %v1374_v61 = vpop.eup %1045  ;;  %v1376_v62 = vadd.f32 1.0, %v1044_v57 }
  0xa1   :  { %v1048_v38 = vpop.eup %1047  ;;  %v232_v63 = vadd.f32 %v1042_v39, %v231_v48  ;;  %1051 = vpow2.f32 %v997_v58  ;;  %v990_v0 = vmul.f32 -1.442695, %v132_v59  ;;  %v1388_v2 = vmul.f32 %v1374_v61, %v1349_v34 }
  0xa2   :  { %v1050_v1 = vpop.eup %1049  ;;  %1053 = vrcp.f32 %v1376_v62  ;;  %v1394_v20 = vadd.f32 1.0, %v1048_v38  ;;  %v1416_v11 = vmul.f32 %v1351_v35, %v132_v59  ;;  %v372_v8 = vand.u32 2147483647, %v1376_v62 }
  0xa3   :  { %v244_v5 = vmul.f32 %v1050_v1, %v1354_v12  ;;  %v236_v3 = vsel %vm235_vm7, %v1042_v39, %v232_v63  ;;  %1055 = vpow2.f32 %v990_v0  ;;  %v350_v17 = vsub.f32 1.0, %v1388_v2  ;;  %v742_v40 = vpop.f32.mrf.mxu1 }
  0xa4   :  { %1057 = vrcp.f32 %v1394_v20  ;;  %v241_v7 = vsel %vm1378_vm6, %v240_v31, %v236_v3  ;;  %v151_v52 = vpop.f32.mrf.mxu2  ;;  %vm249_vm10 = vweird.f32 %v1050_v1  ;;  %vm263_vm11 = vweird.f32 %v1394_v20 }
  0xa5   :  { %v245_v9 = vsub.f32 1.0, %v244_v5  ;;  %v804_v10 = vmul.f32 %v241_v7, %v241_v7  ;;  %v152_v16 = vadd.f32 %v151_v52, %v1342_v14  ;;  %v788_v23 = vmul.f32 %v1357_v43, %v241_v7  ;;  %vm250_vm12 = vmor %vm248_vm8, %vm249_vm10 }
  0xa6   :  { %v134_v36 = vpop.f32.mrf.mxu0  ;;  %v267_v29 = vand.u32 2147483647, %v1394_v20  ;;  %v269_v30 = vand.u32 2147483648, %v1394_v20  ;;  %v374_v44 = vand.u32 2147483648, %v1376_v62  ;;  %vm368_vm2 = vweird.f32 %v1376_v62 }
  0xa7   :  { %v1052_v22 = vpop.eup %1051  ;;  %v821_v24 = vmul.f32 %v1362_v47, %v804_v10  ;;  %v246_v26 = vmul.f32 %v1050_v1, %v245_v9  ;;  %v998_v41 = vmul.f32 -1.442695, %v152_v16  ;;  %v135_v28 = vadd.f32 %v134_v36, %v1342_v14 }
  0xa8   :  { %v1421_v53 = vpop.eup %1053  ;;  %v1423_v27 = vadd.f32 1.0, %v1052_v22  ;;  %v1439_v57 = vmul.f32 %v1351_v35, %v152_v16  ;;  %vm1446_vm13 = vcmp.eq.f32.partialorder %v267_v29, 8.507059e+37  ;;  %v270_v9 = vor.u32 1.1754944e-38, %v269_v30 }
  0xa9   :  { %v1056_v32 = vpop.eup %1055  ;;  %v837_v33 = vadd.f32 %v821_v24, %v788_v23  ;;  %v247_v21 = vadd.f32 %v1050_v1, %v246_v26  ;;  %1059 = vpow2.f32 %v998_v41  ;;  %v991_v42 = vmul.f32 -1.442695, %v135_v28 }
  0xaa   :  { %v1058_v39 = vpop.eup %1057  ;;  %1061 = vrcp.f32 %v1423_v27  ;;  %v1430_v18 = vadd.f32 1.0, %v1056_v32  ;;  %v364_v48 = vmul.f32 %v1421_v53, %v1376_v62  ;;  %v1465_v16 = vmul.f32 %v1351_v35, %v135_v28  ;;  %v766_v62 = vpop.f32.mrf.mxu3 }
  0xab   :  { %v259_v45 = vmul.f32 %v1058_v39, %v1394_v20  ;;  %v870_v49 = vadd.f32 %v1360_v46, %v837_v33  ;;  %v251_v55 = vsel %vm250_vm12, %v1050_v1, %v247_v21  ;;  %vm264_vm14 = vweird.f32 %v1058_v39  ;;  %v745_v21 = vpop.f32.mrf.mxu1 }
  0xac   :  { %1063 = vrcp.f32 %v1430_v18  ;;  %v256_v12 = vsel %vm1406_vm9, %v255_v13, %v251_v55  ;;  %v154_v59 = vpop.f32.mrf.mxu2  ;;  %v282_v0 = vand.u32 2147483647, %v1430_v18  ;;  %v284_v22 = vand.u32 2147483648, %v1430_v18  ;;  %vm265_vm15 = vmor %vm263_vm11, %vm264_vm14 }
  0xad   :  { %v260_v15 = vsub.f32 1.0, %v259_v45  ;;  %v886_v46 = vadd.f32 %v870_v49, %v1382_v56  ;;  %v805_v31 = vmul.f32 %v256_v12, %v256_v12  ;;  %v789_v25 = vmul.f32 %v1357_v43, %v256_v12 }
  0xae   :  { %1065 = vpow2.f32 %v991_v42  ;;  %v155_v38 = vadd.f32 %v154_v59, %v1342_v14  ;;  %v136_v63 = vpop.f32.mrf.mxu0  ;;  %v365_v56 = vsub.f32 1.0, %v364_v48  ;;  %vm278_vm0 = vweird.f32 %v1430_v18 }
  0xaf   :  { %v1060_v60 = vpop.eup %1059  ;;  %v903_v1 = vadd.f32 %v1371_v54, %v886_v46  ;;  %v822_v5 = vmul.f32 %v1362_v47, %v805_v31  ;;  %v261_v3 = vmul.f32 %v1058_v39, %v260_v15  ;;  %v137_v7 = vadd.f32 %v136_v63, %v1342_v14 }
  0xb0   :  { %v1457_v37 = vpop.eup %1061  ;;  %v1459_v52 = vadd.f32 1.0, %v1060_v60  ;;  %v999_v10 = vmul.f32 -1.442695, %v155_v38  ;;  %v1473_v24 = vmul.f32 %v1351_v35, %v155_v38  ;;  %vm1482_vm1 = vcmp.eq.f32.partialorder %v282_v0, 8.507059e+37 }
  0xb1   :  { %919 = vst [vmem:[%s1878_s3] sm:$0xff] %v903_v1  ;;  %v838_v13 = vadd.f32 %v822_v5, %v789_v25  ;;  %v262_v36 = vadd.f32 %v1058_v39, %v261_v3  ;;  %v992_v26 = vmul.f32 -1.442695, %v137_v7  ;;  %v1478_v41 = vmul.f32 %v1457_v37, %v1423_v27 }
  0xb2   :  { %v1064_v23 = vpop.eup %1063  ;;  %1067 = vrcp.f32 %v1459_v52  ;;  %v1489_v42 = vmul.f32 %v1351_v35, %v137_v7  ;;  %v366_v49 = vmul.f32 %v1421_v53, %v365_v56  ;;  %v285_v48 = vor.u32 1.1754944e-38, %v284_v22 }
  0xb3   :  { %v274_v28 = vmul.f32 %v1064_v23, %v1430_v18  ;;  %v871_v29 = vadd.f32 %v1369_v51, %v838_v13  ;;  %v266_v30 = vsel %vm265_vm15, %v1058_v39, %v262_v36  ;;  %1069 = vpow2.f32 %v999_v10 }
  0xb4   :  { %v1066_v20 = vpop.eup %1065  ;;  %v271_v33 = vsel %vm1446_vm13, %v270_v9, %v266_v30  ;;  %v156_v45 = vpop.f32.mrf.mxu2  ;;  %1071 = vpow2.f32 %v992_v26  ;;  %vm279_vm3 = vweird.f32 %v1064_v23  ;;  %v367_v0 = vadd.f32 %v1421_v53, %v366_v49 }
  0xb5   :  { %v275_v51 = vsub.f32 1.0, %v274_v28  ;;  %v887_v39 = vadd.f32 %v871_v29, %v742_v40  ;;  %v1493_v55 = vadd.f32 1.0, %v1066_v20  ;;  %v806_v12 = vmul.f32 %v271_v33, %v271_v33  ;;  %vm280_vm5 = vmor %vm278_vm0, %vm279_vm3  ;;  %v748_v49 = vpop.f32.mrf.mxu1 }
  0xb6   :  { %v1496_v58 = vadd.f32 %v156_v45, %v1342_v14  ;;  %v139_v59 = vpop.f32.mrf.mxu0  ;;  %v790_v40 = vmul.f32 %v1357_v43, %v271_v33  ;;  %vm369_vm4 = vweird.f32 %v1421_v53  ;;  %v380_v10 = vsub.f32 1.0, %v1478_v41 }
  0xb7   :  { %v904_v15 = vadd.f32 %v1371_v54, %v887_v39  ;;  %1073 = vrcp.f32 %v1493_v55  ;;  %v276_v46 = vmul.f32 %v1064_v23, %v275_v51  ;;  %v140_v31 = vadd.f32 %v139_v59, %v1342_v14  ;;  %vm1538_vm7 = vmor %vm368_vm2, %vm369_vm4 }
  0xb8   :  { %v1501_v25 = vpop.eup %1067  ;;  %v823_v38 = vmul.f32 %v1362_v47, %v806_v12  ;;  %v1000_v63 = vmul.f32 -1.442695, %v1496_v58  ;;  %v297_v56 = vand.u32 2147483647, %v1493_v55  ;;  %v299_v9 = vand.u32 2147483648, %v1493_v55 }
  0xb9   :  { %920 = vst [vmem:[%s1878_s3 + $0x8] sm:$0xff] %v904_v15  ;;  %v1512_v60 = vmul.f32 %v1501_v25, %v1459_v52  ;;  %v277_v1 = vadd.f32 %v1064_v23, %v276_v46  ;;  %v993_v5 = vmul.f32 -1.442695, %v140_v31  ;;  %v1070_v3 = vpop.eup %1069  ;;  %v1527_v18 = vmul.f32 %v1351_v35, %v140_v31 }
  0xba   :  { %v839_v7 = vadd.f32 %v823_v38, %v790_v40  ;;  %1075 = vpow2.f32 %v1000_v63  ;;  %v1521_v13 = vadd.f32 1.0, %v1070_v3  ;;  %v1072_v22 = vpop.eup %1071  ;;  %vm293_vm6 = vweird.f32 %v1493_v55 }
  0xbb   :  { %v281_v36 = vsel %vm280_vm5, %v1064_v23, %v277_v1  ;;  %1077 = vpow2.f32 %v993_v5  ;;  %v395_v30 = vsub.f32 1.0, %v1512_v60  ;;  %v1532_v20 = vadd.f32 1.0, %v1072_v22 }
  0xbc   :  { %v872_v26 = vadd.f32 %v1400_v6, %v839_v7  ;;  %v286_v28 = vsel %vm1482_vm1, %v285_v48, %v281_v36  ;;  %1079 = vrcp.f32 %v1521_v13  ;;  %v159_v32 = vpop.f32.mrf.mxu2  ;;  %vm1543_vm8 = vcmp.eq.f32.partialorder %v297_v56, 8.507059e+37 }
  0xbd   :  { %v1074_v29 = vpop.eup %1073  ;;  %v807_v23 = vmul.f32 %v286_v28, %v286_v28  ;;  %v300_v39 = vor.u32 1.1754944e-38, %v299_v9  ;;  %v371_v48 = vsel %vm1538_vm7, %v1421_v53, %v367_v0  ;;  %1081 = vrcp.f32 %v1532_v20 }
  0xbe   :  { %v289_v33 = vmul.f32 %v1074_v29, %v1493_v55  ;;  %v888_v45 = vadd.f32 %v872_v26, %v745_v21  ;;  %v141_v12 = vpop.f32.mrf.mxu0  ;;  %v791_v59 = vmul.f32 %v1357_v43, %v286_v28  ;;  %v375_v21 = vor.u32 1.1754944e-38, %v374_v44 }
  0xbf   :  { %v824_v15 = vmul.f32 %v1362_v47, %v807_v23  ;;  %vm373_vm9 = vcmp.eq.f32.partialorder %v372_v8, 8.507059e+37  ;;  %v1559_v38 = vadd.f32 %v159_v32, %v1342_v14  ;;  %v142_v5 = vadd.f32 %v141_v12, %v1342_v14 }
  0xc0   :  { %v1076_v46 = vpop.eup %1075  ;;  %v290_v31 = vsub.f32 1.0, %v289_v33  ;;  %v905_v40 = vadd.f32 %v1371_v54, %v888_v45  ;;  %v376_v1 = vsel %vm373_vm9, %v375_v21, %v371_v48  ;;  %vm294_vm10 = vweird.f32 %v1074_v29 }
  0xc1   :  { %v1078_v53 = vpop.eup %1077  ;;  %v840_v63 = vadd.f32 %v824_v15, %v791_v59  ;;  %v1561_v0 = vadd.f32 1.0, %v1076_v46  ;;  %v813_v8 = vmul.f32 %v376_v1, %v376_v1  ;;  %v797_v9 = vmul.f32 %v1357_v43, %v376_v1  ;;  %vm295_vm11 = vmor %vm293_vm6, %vm294_vm10  ;;  %v751_v15 = vpop.f32.mrf.mxu1 }
  0xc2   :  { %921 = vst [vmem:[%s1878_s3 + $0x10] sm:$0xff] %v905_v40  ;;  %v1567_v44 = vadd.f32 1.0, %v1078_v53  ;;  %v291_v3 = vmul.f32 %v1074_v29, %v290_v31  ;;  %v1569_v7 = vpop.eup %1079  ;;  %v1001_v36 = vmul.f32 -1.442695, %v1559_v38  ;;  %vm308_vm12 = vweird.f32 %v1532_v20 }
  0xc3   :  { %v873_v56 = vadd.f32 %v1416_v11, %v840_v63  ;;  %1083 = vrcp.f32 %v1561_v0  ;;  %v1577_v22 = vmul.f32 %v1569_v7, %v1521_v13  ;;  %v830_v28 = vmul.f32 %v1362_v47, %v813_v8  ;;  %v1082_v23 = vpop.eup %1081 }
  0xc4   :  { %1085 = vrcp.f32 %v1567_v44  ;;  %v292_v26 = vadd.f32 %v1074_v29, %v291_v3  ;;  %v994_v11 = vmul.f32 -1.442695, %v142_v5  ;;  %v304_v32 = vmul.f32 %v1082_v23, %v1532_v20 }
  0xc5   :  { %v889_v6 = vadd.f32 %v873_v56, %v748_v49  ;;  %1087 = vpow2.f32 %v1001_v36  ;;  %v846_v45 = vadd.f32 %v830_v28, %v797_v9  ;;  %v1586_v48 = vmul.f32 %v1351_v35, %v142_v5  ;;  %v161_v28 = vpop.f32.mrf.mxu2 }
  0xc6   :  { %v296_v33 = vsel %vm295_vm11, %v1074_v29, %v292_v26  ;;  %v410_v12 = vsub.f32 1.0, %v1577_v22  ;;  %1089 = vpow2.f32 %v994_v11  ;;  %v305_v55 = vsub.f32 1.0, %v304_v32  ;;  %v1622_v26 = vpop.f32.mrf.mxu3 }
  0xc7   :  { %v906_v59 = vadd.f32 %v1371_v54, %v889_v6  ;;  %v301_v49 = vsel %vm1543_vm8, %v300_v39, %v296_v33  ;;  %v879_v46 = vadd.f32 %v1392_v4, %v846_v45  ;;  %vm309_vm13 = vweird.f32 %v1082_v23 }
  0xc8   :  { %v808_v21 = vmul.f32 %v301_v49, %v301_v49  ;;  %v792_v29 = vmul.f32 %v1357_v43, %v301_v49  ;;  %v312_v40 = vand.u32 2147483647, %v1532_v20  ;;  %v314_v51 = vand.u32 2147483648, %v1532_v20  ;;  %vm1627_vm0 = vmor %vm308_vm12, %vm309_vm13 }
  0xc9   :  { %v1593_v31 = vpop.eup %1083  ;;  %922 = vst [vmem:[%s1878_s3 + $0x18] sm:$0xff] %v906_v59  ;;  %v381_v39 = vmul.f32 %v1457_v37, %v380_v10  ;;  %v895_v63 = vadd.f32 %v879_v46, %v766_v62  ;;  %v306_v1 = vmul.f32 %v1082_v23, %v305_v55  ;;  %vm383_vm14 = vweird.f32 %v1423_v27 }
  0xca   :  { %v1604_v53 = vpop.eup %1085  ;;  %v825_v4 = vmul.f32 %v1362_v47, %v808_v21  ;;  %v1610_v3 = vmul.f32 %v1593_v31, %v1561_v0  ;;  %vm1614_vm15 = vcmp.eq.f32.partialorder %v312_v40, 8.507059e+37  ;;  %v315_v36 = vor.u32 1.1754944e-38, %v314_v51 }
  0xcb   :  { %v1088_v5 = vpop.eup %1087  ;;  %v319_v8 = vmul.f32 %v1604_v53, %v1567_v44  ;;  %v382_v10 = vadd.f32 %v1457_v37, %v381_v39  ;;  %v912_v62 = vadd.f32 %v1371_v54, %v895_v63  ;;  %v307_v32 = vadd.f32 %v1082_v23, %v306_v1  ;;  %v754_v1 = vpop.f32.mrf.mxu1 }
  0xcc   :  { %v841_v56 = vadd.f32 %v825_v4, %v792_v29  ;;  %v1620_v9 = vadd.f32 1.0, %v1088_v5  ;;  %v1090_v6 = vpop.eup %1089  ;;  %vm384_vm1 = vweird.f32 %v1457_v37  ;;  %v387_v45 = vand.u32 2147483647, %v1423_v27 }
  0xcd   :  { %v320_v11 = vsub.f32 1.0, %v319_v8  ;;  %928 = vst [vmem:[%s1878_s3 + $0x48] sm:$0xff] %v912_v62  ;;  %v1638_v49 = vadd.f32 1.0, %v1090_v6  ;;  %vm1642_vm2 = vmor %vm383_vm14, %vm384_vm1  ;;  %v389_v55 = vand.u32 2147483648, %v1423_v27  ;;  %v425_v21 = vsub.f32 1.0, %v1610_v3 }
  0xce   :  { %v874_v59 = vadd.f32 %v1465_v16, %v841_v56  ;;  %1091 = vrcp.f32 %v1620_v9  ;;  %v311_v16 = vsel %vm1627_vm0, %v1082_v23, %v307_v32  ;;  %v386_v46 = vsel %vm1642_vm2, %v1457_v37, %v382_v10 }
  0xcf   :  { %v1654_v29 = vadd.f32 %v161_v28, %v1342_v14  ;;  %1093 = vrcp.f32 %v1638_v49  ;;  %v316_v51 = vsel %vm1614_vm15, %v315_v36, %v311_v16  ;;  %v390_v39 = vor.u32 1.1754944e-38, %v389_v55 }
  0xd0   :  { %v890_v40 = vadd.f32 %v874_v59, %v751_v15  ;;  %v793_v27 = vmul.f32 %v1357_v43, %v316_v51  ;;  %v809_v4 = vmul.f32 %v316_v51, %v316_v51  ;;  %vm388_vm3 = vcmp.eq.f32.partialorder %v387_v45, 8.507059e+37 }
  0xd1   :  { %v1002_v23 = vmul.f32 -1.442695, %v1654_v29  ;;  %v391_v37 = vsel %vm388_vm3, %v390_v39, %v386_v46  ;;  %v321_v14 = vmul.f32 %v1604_v53, %v320_v11  ;;  %vm323_vm4 = vweird.f32 %v1567_v44 }
  0xd2   :  { %v907_v63 = vadd.f32 %v1371_v54, %v890_v40  ;;  %v826_v15 = vmul.f32 %v1362_v47, %v809_v4  ;;  %v798_v5 = vmul.f32 %v1357_v43, %v391_v37  ;;  %v814_v8 = vmul.f32 %v391_v37, %v391_v37 }
  0xd3   :  { %1095 = vpow2.f32 %v1002_v23  ;;  %v322_v10 = vadd.f32 %v1604_v53, %v321_v14  ;;  %vm324_vm5 = vweird.f32 %v1604_v53  ;;  %v327_v56 = vand.u32 2147483647, %v1567_v44 }
  0xd4   :  { %v1666_v41 = vpop.eup %1091  ;;  %923 = vst [vmem:[%s1878_s3 + $0x20] sm:$0xff] %v907_v63  ;;  %v329_v62 = vand.u32 2147483648, %v1567_v44  ;;  %v842_v28 = vadd.f32 %v826_v15, %v793_v27  ;;  %v831_v6 = vmul.f32 %v1362_v47, %v814_v8  ;;  %vm325_vm6 = vmor %vm323_vm4, %vm324_vm5  ;;  %v396_v11 = vmul.f32 %v1501_v25, %v395_v30  ;;  %v1685_v44 = vpop.f32.mrf.mxu3 }
  0xd5   :  { %v1677_v36 = vmul.f32 %v1666_v41, %v1620_v9  ;;  %v1094_v32 = vpop.eup %1093  ;;  %v326_v33 = vsel %vm325_vm6, %v1604_v53, %v322_v10  ;;  %vm328_vm7 = vcmp.eq.f32.partialorder %v327_v56, 8.507059e+37  ;;  %vm398_vm8 = vweird.f32 %v1459_v52 }
  0xd6   :  { %v330_v45 = vor.u32 1.1754944e-38, %v329_v62  ;;  %v334_v20 = vmul.f32 %v1094_v32, %v1638_v49  ;;  %v875_v55 = vadd.f32 %v1489_v42, %v842_v28  ;;  %v847_v16 = vadd.f32 %v831_v6, %v798_v5  ;;  %v757_v5 = vpop.f32.mrf.mxu1 }
  0xd7   :  { %v440_v59 = vsub.f32 1.0, %v1677_v36  ;;  %v397_v60 = vadd.f32 %v1501_v25, %v396_v11  ;;  %vm399_vm9 = vweird.f32 %v1501_v25  ;;  %v402_v30 = vand.u32 2147483647, %v1459_v52 }
  0xd8   :  { %v331_v46 = vsel %vm328_vm7, %v330_v45, %v326_v33  ;;  %v335_v40 = vsub.f32 1.0, %v334_v20  ;;  %v891_v51 = vadd.f32 %v875_v55, %v754_v1  ;;  %v880_v39 = vadd.f32 %v1413_v19, %v847_v16  ;;  %vm1697_vm10 = vmor %vm398_vm8, %vm399_vm9 }
  0xd9   :  { %v1096_v53 = vpop.eup %1095  ;;  %v794_v27 = vmul.f32 %v1357_v43, %v331_v46  ;;  %v810_v23 = vmul.f32 %v331_v46, %v331_v46  ;;  %v401_v63 = vsel %vm1697_vm10, %v1501_v25, %v397_v60  ;;  %vm1706_vm11 = vcmp.eq.f32.partialorder %v402_v30, 8.507059e+37 }
  0xda   :  { %v1701_v42 = vadd.f32 1.0, %v1096_v53  ;;  %v908_v19 = vadd.f32 %v1371_v54, %v891_v51  ;;  %v896_v1 = vadd.f32 %v880_v39, %v1622_v26  ;;  %v404_v14 = vand.u32 2147483648, %v1459_v52 }
  0xdb   :  { %v336_v15 = vmul.f32 %v1094_v32, %v335_v40  ;;  %v827_v8 = vmul.f32 %v1362_v47, %v810_v23  ;;  %vm338_vm12 = vweird.f32 %v1638_v49  ;;  %vm339_vm13 = vweird.f32 %v1094_v32 }
  0xdc   :  { %1097 = vrcp.f32 %v1701_v42  ;;  %924 = vst [vmem:[%s1878_s3 + $0x28] sm:$0xff] %v908_v19  ;;  %v913_v25 = vadd.f32 %v1371_v54, %v896_v1  ;;  %v405_v10 = vor.u32 1.1754944e-38, %v404_v14  ;;  %v342_v26 = vand.u32 2147483647, %v1638_v49  ;;  %vm1721_vm14 = vmor %vm338_vm12, %vm339_vm13  ;;  %v1740_v20 = vpop.f32.mrf.mxu3 }
  0xdd   :  { %v337_v56 = vadd.f32 %v1094_v32, %v336_v15  ;;  %v843_v52 = vadd.f32 %v827_v8, %v794_v27  ;;  %v344_v28 = vand.u32 2147483648, %v1638_v49  ;;  %v411_v6 = vmul.f32 %v1569_v7, %v410_v12 }
  0xde   :  { %vm413_vm15 = vweird.f32 %v1521_v13  ;;  %929 = vst [vmem:[%s1878_s3 + $0x50] sm:$0xff] %v913_v25  ;;  %v406_v11 = vsel %vm1706_vm11, %v405_v10, %v401_v63  ;;  %vm343_vm0 = vcmp.eq.f32.partialorder %v342_v26, 8.507059e+37  ;;  %vm414_vm1 = vweird.f32 %v1569_v7  ;;  %v760_v1 = vpop.f32.mrf.mxu1 }
  0xdf   :  { %v341_v33 = vsel %vm1721_vm14, %v1094_v32, %v337_v56  ;;  %v876_v49 = vadd.f32 %v1527_v18, %v843_v52  ;;  %v799_v22 = vmul.f32 %v1357_v43, %v406_v11  ;;  %v815_v12 = vmul.f32 %v406_v11, %v406_v11  ;;  %vm1753_vm2 = vmor %vm413_vm15, %vm414_vm1 }
  0xe0   :  { %v345_v45 = vor.u32 1.1754944e-38, %v344_v28  ;;  %v412_v55 = vadd.f32 %v1569_v7, %v411_v6  ;;  %v417_v16 = vand.u32 2147483647, %v1521_v13  ;;  %v419_v46 = vand.u32 2147483648, %v1521_v13 }
  0xe1   :  { %v351_v32 = vmul.f32 %v1374_v61, %v350_v17  ;;  %v892_v30 = vadd.f32 %v876_v49, %v757_v5  ;;  %v832_v18 = vmul.f32 %v1362_v47, %v815_v12  ;;  %vm353_vm3 = vweird.f32 %v1349_v34 }
  0xe2   :  { %v1748_v60 = vpop.eup %1097  ;;  %v346_v53 = vsel %vm343_vm0, %v345_v45, %v341_v33  ;;  %v416_v39 = vsel %vm1753_vm2, %v1569_v7, %v412_v55  ;;  %vm418_vm4 = vcmp.eq.f32.partialorder %v417_v16, 8.507059e+37  ;;  %v420_v13 = vor.u32 1.1754944e-38, %v419_v46 }
  0xe3   :  { %v454_v51 = vmul.f32 %v1748_v60, %v1701_v42  ;;  %v795_v2 = vmul.f32 %v1357_v43, %v346_v53  ;;  %v811_v17 = vmul.f32 %v346_v53, %v346_v53  ;;  %v909_v27 = vadd.f32 %v1371_v54, %v892_v30 }
  0xe4   :  { %v848_v4 = vadd.f32 %v832_v18, %v799_v22  ;;  %v352_v37 = vadd.f32 %v1374_v61, %v351_v32  ;;  %vm354_vm5 = vweird.f32 %v1374_v61  ;;  %v421_v7 = vsel %vm418_vm4, %v420_v13, %v416_v39  ;;  %v778_v11 = vpop.f32.mrf.mxu3 }
  0xe5   :  { %v455_v23 = vsub.f32 1.0, %v454_v51  ;;  %v828_v63 = vmul.f32 %v1362_v47, %v811_v17  ;;  %925 = vst [vmem:[%s1878_s3 + $0x30] sm:$0xff] %v909_v27  ;;  %vm1774_vm6 = vmor %vm353_vm3, %vm354_vm5  ;;  %v357_v15 = vand.u32 2147483647, %v1349_v34  ;;  %v359_v5 = vand.u32 2147483648, %v1349_v34 }
  0xe6   :  { %v881_v19 = vadd.f32 %v1439_v57, %v848_v4  ;;  %v800_v25 = vmul.f32 %v1357_v43, %v421_v7  ;;  %v816_v10 = vmul.f32 %v421_v7, %v421_v7  ;;  %v356_v57 = vsel %vm1774_vm6, %v1374_v61, %v352_v37  ;;  %v763_v40 = vpop.f32.mrf.mxu1 }
  0xe7   :  { %v844_v8 = vadd.f32 %v828_v63, %v795_v2  ;;  %vm358_vm7 = vcmp.eq.f32.partialorder %v357_v15, 8.507059e+37  ;;  %v360_v26 = vor.u32 1.1754944e-38, %v359_v5  ;;  %v426_v52 = vmul.f32 %v1593_v31, %v425_v21 }
  0xe8   :  { %v897_v56 = vadd.f32 %v881_v19, %v1685_v44  ;;  %v833_v34 = vmul.f32 %v1362_v47, %v816_v10  ;;  %vm428_vm8 = vweird.f32 %v1561_v0  ;;  %vm429_vm9 = vweird.f32 %v1593_v31 }
  0xe9   :  { %v877_v62 = vadd.f32 %v1586_v48, %v844_v8  ;;  %v361_v6 = vsel %vm358_vm7, %v360_v26, %v356_v57  ;;  %v427_v61 = vadd.f32 %v1593_v31, %v426_v52  ;;  %v432_v44 = vand.u32 2147483647, %v1561_v0  ;;  %vm1796_vm10 = vmor %vm428_vm8, %vm429_vm9 }
  0xea   :  { %v914_v28 = vadd.f32 %v1371_v54, %v897_v56  ;;  %v849_v3 = vadd.f32 %v833_v34, %v800_v25  ;;  %v796_v21 = vmul.f32 %v1357_v43, %v361_v6  ;;  %v812_v49 = vmul.f32 %v361_v6, %v361_v6 }
  0xeb   :  { %v893_v33 = vadd.f32 %v877_v62, %v760_v1  ;;  %v431_v22 = vsel %vm1796_vm10, %v1593_v31, %v427_v61  ;;  %vm1806_vm11 = vcmp.eq.f32.partialorder %v432_v44, 8.507059e+37  ;;  %v434_v45 = vand.u32 2147483648, %v1561_v0 }
  0xec   :  { %930 = vst [vmem:[%s1878_s3 + $0x58] sm:$0xff] %v914_v28  ;;  %v441_v55 = vmul.f32 %v1666_v41, %v440_v59  ;;  %v882_v46 = vadd.f32 %v1473_v24, %v849_v3  ;;  %v829_v32 = vmul.f32 %v1362_v47, %v812_v49  ;;  %vm443_vm12 = vweird.f32 %v1620_v9  ;;  %v781_v19 = vpop.f32.mrf.mxu3 }
  0xed   :  { %v910_v16 = vadd.f32 %v1371_v54, %v893_v33  ;;  %v435_v30 = vor.u32 1.1754944e-38, %v434_v45  ;;  %vm444_vm13 = vweird.f32 %v1666_v41  ;;  %v447_v18 = vand.u32 2147483647, %v1620_v9 }
  0xee   :  { %v442_v31 = vadd.f32 %v1666_v41, %v441_v55  ;;  %v898_v0 = vadd.f32 %v882_v46, %v1740_v20  ;;  %v845_v36 = vadd.f32 %v829_v32, %v796_v21  ;;  %vm1825_vm14 = vmor %vm443_vm12, %vm444_vm13  ;;  %v449_v59 = vand.u32 2147483648, %v1620_v9 }
  0xef   :  { %926 = vst [vmem:[%s1878_s3 + $0x38] sm:$0xff] %v910_v16  ;;  %v456_v53 = vmul.f32 %v1748_v60, %v455_v23  ;;  %v436_v51 = vsel %vm1806_vm11, %v435_v30, %v431_v22  ;;  %vm448_vm15 = vcmp.eq.f32.partialorder %v447_v18, 8.507059e+37  ;;  %vm458_vm0 = vweird.f32 %v1701_v42 }
  0xf0   :  { %v446_v2 = vsel %vm1825_vm14, %v1666_v41, %v442_v31  ;;  %v915_v20 = vadd.f32 %v1371_v54, %v898_v0  ;;  %v878_v17 = vadd.f32 %v1366_v50, %v845_v36  ;;  %v817_v39 = vmul.f32 %v436_v51, %v436_v51 }
  0xf1   :  { %v801_v9 = vmul.f32 %v1357_v43, %v436_v51  ;;  %v450_v27 = vor.u32 1.1754944e-38, %v449_v59  ;;  %v457_v4 = vadd.f32 %v1748_v60, %v456_v53  ;;  %vm459_vm1 = vweird.f32 %v1748_v60 }
  0xf2   :  { %931 = vst [vmem:[%s1878_s3 + $0x60] sm:$0xff] %v915_v20  ;;  %v894_v41 = vadd.f32 %v878_v17, %v763_v40  ;;  %v834_v13 = vmul.f32 %v1362_v47, %v817_v39  ;;  %v462_v23 = vand.u32 2147483647, %v1701_v42  ;;  %v464_v50 = vand.u32 2147483648, %v1701_v42  ;;  %vm460_vm2 = vmor %vm458_vm0, %vm459_vm1 }
  0xf3   :  { %v867_v63 = vmul.f32 %v1351_v35, %v1496_v58  ;;  %v451_v37 = vsel %vm448_vm15, %v450_v27, %v446_v2  ;;  %v461_v15 = vsel %vm460_vm2, %v1748_v60, %v457_v4  ;;  %v868_v10 = vmul.f32 %v1351_v35, %v1559_v38 }
  0xf4   :  { %v911_v1 = vadd.f32 %v1371_v54, %v894_v41  ;;  %v850_v7 = vadd.f32 %v834_v13, %v801_v9  ;;  %v818_v14 = vmul.f32 %v451_v37, %v451_v37  ;;  %v465_v5 = vor.u32 1.1754944e-38, %v464_v50  ;;  %v784_v38 = vpop.f32.mrf.mxu3 }
  0xf5   :  { %v802_v42 = vmul.f32 %v1357_v43, %v451_v37  ;;  %vm463_vm3 = vcmp.eq.f32.partialorder %v462_v23, 8.507059e+37  ;;  %v869_v28 = vmul.f32 %v1351_v35, %v1654_v29 }
  0xf6   :  { %927 = vst [vmem:[%s1878_s3 + $0x40] sm:$0xff] %v911_v1  ;;  %v883_v8 = vadd.f32 %v867_v63, %v850_v7  ;;  %v835_v25 = vmul.f32 %v1362_v47, %v818_v14  ;;  %v466_v58 = vsel %vm463_vm3, %v465_v5, %v461_v15 }
  0xf7   :  { %v819_v26 = vmul.f32 %v466_v58, %v466_v58  ;;  %v803_v62 = vmul.f32 %v1357_v43, %v466_v58 }
  0xf8   :  { %v899_v57 = vadd.f32 %v883_v8, %v778_v11  ;;  %v851_v56 = vadd.f32 %v835_v25, %v802_v42 }
  0xf9   :  { %v836_v34 = vmul.f32 %v1362_v47, %v819_v26 }
  0xfa   :  { %v916_v60 = vadd.f32 %v1371_v54, %v899_v57  ;;  %v884_v52 = vadd.f32 %v868_v10, %v851_v56 }
  0xfb   :  { %v852_v61 = vadd.f32 %v836_v34, %v803_v62 }
  0xfc   :  { %932 = vst [vmem:[%s1878_s3 + $0x68] sm:$0xff] %v916_v60  ;;  %v900_v6 = vadd.f32 %v884_v52, %v781_v19 }
  0xfd   :  { %v885_v11 = vadd.f32 %v869_v28, %v852_v61 }
  0xfe   :  { %v917_v44 = vadd.f32 %v1371_v54, %v900_v6 }
  0xff   :  { %v901_v43 = vadd.f32 %v885_v11, %v784_v38 }
 0x100   :  { %933 = vst [vmem:[%s1878_s3 + $0x70] sm:$0xff] %v917_v44 }
 0x101   :  { %v918_v47 = vadd.f32 %v1371_v54, %v901_v43 }
 0x103   :  { %934 = vst [vmem:[%s1878_s3 + $0x78] sm:$0xff] %v918_v47 }

// kernel: detect_forward.5
= control target key start
LH: loop header
LB: loop body
LE: loop exit
PB: predicated region body
PF: predicated region fallthrough
CT: control target
= control target key end

     0   :  { %v167_v1 = vlaneseq  ;;  %v377_v2 = vmov 4.0   ;;  %vm64_vm1 = vcmask 523264   ;;  %vm227_vm3 = vcmask 64512   ;;  %s494_s1 = inlined_call_operand.vmem [shape: bf16[64,128], index: 1, kind: input, shape index: {}]   ;;  %s495_s2 = inlined_call_operand.vmem [shape: f32[16,128], index: 2, kind: input, shape index: {}]   ;;  %s496_s0 = inlined_call_operand.vmem [shape: bf16[32,64], index: 0, kind: input, shape index: {}]   ;;  %s497_s3 = inlined_call_operand.vmem [shape: f32[32,128], index: 3, kind: output, shape index: {}]  }
   0x1   :  { %v352_v0 = vld [vmem:[%s494_s1 + $0x18] sm:$0xff]  ;;  %359 = vrcp.f32 %v377_v2  ;;  %v351_v3 = vld [vmem:[%s494_s1 + $0x10] sm:$0xff]  ;;  %v28_v4 = vld [vmem:[%s495_s2 + $0x8] sm:$0xff] }
   0x2   :  { %75 = vmatpush.bf16.msra.mxu0 %v352_v0  ;;  %353 = vmatpush.bf16.msra.mxu2 %v352_v0  ;;  %v168_v5 = vshrl.u32 %v167_v1, 7  ;;  %v350_v7 = vld [vmem:[%s494_s1 + $0x8] sm:$0xff]  ;;  %v349_v12 = vld [vmem:[%s494_s1] sm:$0xff]  ;;  %v178_v34 = vand.u32 127, %v167_v1 }
   0x3   :  { %357 = vmatpush.msra.mxu3 %v28_v4  ;;  %255 = vmatpush.msra.mxu1 %v28_v4  ;;  %v347_v18 = vld [vmem:[%s496_s0] sm:$0xff]  ;;  %v348_v19 = vld [vmem:[%s496_s0 + $0x8] sm:$0xff] }
   0x4   :  { %v169_v9 = vadd.s32 8, %v168_v5  ;;  %v170_v10 = vadd.s32 16, %v168_v5  ;;  %v171_v13 = vadd.s32 24, %v168_v5  ;;  %v179_v16 = vcvt.s32.f32 %v168_v5  ;;  %v430_v60 = vld [vmem:[%s495_s2] sm:$0xff] }
   0x5   :  { %vm222_vm2 = vcmp.eq.s32.totalorder %v178_v34, 0  ;;  %v29_v61 = vperm.slane %v430_v60, 0  ;;  %v455_v34 = vperm.slane %v430_v60, 3 }
   0x6   :  { %76 = vmatpush.bf16.msra.mxu0 %v351_v3  ;;  %354 = vmatpush.bf16.msra.mxu2 %v351_v3  ;;  %v180_v15 = vcvt.s32.f32 %v169_v9  ;;  %v181_v17 = vcvt.s32.f32 %v170_v10  ;;  %v182_v21 = vcvt.s32.f32 %v171_v13 }
   0x7   :  { %v360_v6 = vpop.eup %359 }
   0x8   :  { %v184_v8 = vmul.f32 4.0, %v360_v6  ;;  %vm188_vm0 = vweird.f32 %v360_v6 }
   0xa   :  { %v185_v11 = vsub.f32 1.0, %v184_v8  ;;  %77 = vmatpush.bf16.msra.mxu0 %v350_v7  ;;  %355 = vmatpush.bf16.msra.mxu2 %v350_v7 }
   0xc   :  { %v186_v14 = vmul.f32 %v360_v6, %v185_v11 }
   0xe   :  { %v187_v20 = vadd.f32 %v360_v6, %v186_v14  ;;  %78 = vmatpush.bf16.msra.mxu0 %v349_v12  ;;  %356 = vmatpush.bf16.msra.mxu2 %v349_v12 }
  0x10   :  { %v189_v22 = vsel %vm188_vm0, %v360_v6, %v187_v20 }
  0x11   :  { %v191_v23 = vmul.f32 %v189_v22, %v180_v15  ;;  %v190_v24 = vmul.f32 %v189_v22, %v179_v16  ;;  %v192_v25 = vmul.f32 %v189_v22, %v181_v17  ;;  %337 = vmatmul.msk.bf16.vlgmr.msra.gmra.mxu0 %vm64_vm1, %v347_v18  ;;  %338 = vmatmul.msk.bf16.vlgmr.msra.gmra.mxu2 %vm64_vm1, %v348_v19 }
  0x12   :  { %v193_v29 = vmul.f32 %v189_v22, %v182_v21 }
  0x13   :  { %v195_v26 = vfloor.f32 %v191_v23  ;;  %v194_v27 = vfloor.f32 %v190_v24  ;;  %v196_v28 = vfloor.f32 %v192_v25 }
  0x14   :  { %v197_v38 = vfloor.f32 %v193_v29  ;;  %v451_v29 = vperm.slane %v430_v60, 2 }
  0x15   :  { %v199_v30 = vmul.f32 4.0, %v195_v26  ;;  %v207_v31 = vmul.f32 %v195_v26, %v189_v22  ;;  %v198_v32 = vmul.f32 4.0, %v194_v27  ;;  %v206_v33 = vmul.f32 %v194_v27, %v189_v22 }
  0x16   :  { %v208_v35 = vmul.f32 %v196_v28, %v189_v22  ;;  %v200_v44 = vmul.f32 4.0, %v196_v28  ;;  %v209_v48 = vmul.f32 %v197_v38, %v189_v22  ;;  %v201_v55 = vmul.f32 4.0, %v197_v38 }
  0x17   :  { %v211_v36 = vfloor.f32 %v207_v31  ;;  %v210_v37 = vfloor.f32 %v206_v33  ;;  %v203_v40 = vsub.f32 %v180_v15, %v199_v30  ;;  %v202_v42 = vsub.f32 %v179_v16, %v198_v32 }
  0x18   :  { %v212_v39 = vfloor.f32 %v208_v35  ;;  %v204_v51 = vsub.f32 %v181_v17, %v200_v44  ;;  %v213_v53 = vfloor.f32 %v209_v48  ;;  %v205_v57 = vsub.f32 %v182_v21, %v201_v55 }
  0x19   :  { %v215_v41 = vmul.f32 4.0, %v211_v36  ;;  %v214_v43 = vmul.f32 4.0, %v210_v37  ;;  %v300_v55 = vperm.slane %v430_v60, 4 }
  0x1a   :  { %v216_v47 = vmul.f32 4.0, %v212_v39  ;;  %v217_v56 = vmul.f32 4.0, %v213_v53 }
  0x1b   :  { %v219_v45 = vsub.f32 %v195_v26, %v215_v41  ;;  %v218_v46 = vsub.f32 %v194_v27, %v214_v43 }
  0x1c   :  { %v220_v52 = vsub.f32 %v196_v28, %v216_v47  ;;  %v221_v58 = vsub.f32 %v197_v38, %v217_v56  ;;  %v448_v28 = vperm.slane %v430_v60, 1 }
  0x1d   :  { %v224_v49 = vsel %vm222_vm2, %v203_v40, %v219_v45  ;;  %v223_v50 = vsel %vm222_vm2, %v202_v42, %v218_v46 }
  0x1e   :  { %344 = vmatmul.msk.f32.vlgmr.msra.gmra.mxu3 %vm227_vm3, %v224_v49  ;;  %343 = vmatmul.msk.f32.vlgmr.msra.gmra.mxu1 %vm227_vm3, %v223_v50  ;;  %v225_v54 = vsel %vm222_vm2, %v204_v51, %v220_v52  ;;  %v226_v59 = vsel %vm222_vm2, %v205_v57, %v221_v58 }
  0x26   :  { %345 = vmatmul.msk.f32.gmra.mxu3 %vm227_vm3, %v225_v54 }
  0x2e   :  { %346 = vmatmul.msk.f32.gmra.mxu3 %vm227_vm3, %v226_v59 }
  0x8e   :  { %v80_v62 = vpop.f32.mrf.mxu0 }
  0x8f   :  { %v433_v63 = vadd.f32 %v80_v62, %v29_v61 }
  0x91   :  { %v339_v0 = vmul.f32 -1.442695, %v433_v63  ;;  %v288_v49 = vmul.f32 %v455_v34, %v433_v63 }
  0x93   :  { %361 = vpow2.f32 %v339_v0 }
  0x94   :  { %v85_v1 = vpop.f32.mrf.mxu2 }
  0x95   :  { %v436_v2 = vadd.f32 %v85_v1, %v29_v61 }
  0x96   :  { %v82_v3 = vpop.f32.mrf.mxu0 }
  0x97   :  { %v341_v4 = vmul.f32 -1.442695, %v436_v2  ;;  %v439_v5 = vadd.f32 %v82_v3, %v29_v61 }
  0x99   :  { %v362_v6 = vpop.eup %361  ;;  %363 = vpow2.f32 %v341_v4  ;;  %v340_v7 = vmul.f32 -1.442695, %v439_v5 }
  0x9a   :  { %v102_v8 = vadd.f32 1.0, %v362_v6 }
  0x9b   :  { %365 = vpow2.f32 %v340_v7  ;;  %v257_v57 = vpop.f32.mrf.mxu1 }
  0x9c   :  { %367 = vrcp.f32 %v102_v8  ;;  %v87_v9 = vpop.f32.mrf.mxu2  ;;  %v117_v19 = vand.u32 2147483648, %v102_v8  ;;  %vm111_vm4 = vweird.f32 %v102_v8  ;;  %v115_v22 = vand.u32 2147483647, %v102_v8 }
  0x9d   :  { %v442_v10 = vadd.f32 %v87_v9, %v29_v61 }
  0x9e   :  { %v118_v30 = vor.u32 1.1754944e-38, %v117_v19  ;;  %vm116_vm7 = vcmp.eq.f32.partialorder %v115_v22, 8.507059e+37 }
  0x9f   :  { %v364_v11 = vpop.eup %363  ;;  %v342_v12 = vmul.f32 -1.442695, %v442_v10 }
  0xa0   :  { %v104_v13 = vadd.f32 1.0, %v364_v11 }
  0xa1   :  { %v366_v14 = vpop.eup %365  ;;  %369 = vpow2.f32 %v342_v12  ;;  %v457_v35 = vpop.f32.mrf.mxu3 }
  0xa2   :  { %v368_v15 = vpop.eup %367  ;;  %371 = vrcp.f32 %v104_v13  ;;  %v103_v16 = vadd.f32 1.0, %v366_v14  ;;  %v145_v37 = vand.u32 2147483647, %v104_v13  ;;  %v147_v38 = vand.u32 2147483648, %v104_v13 }
  0xa3   :  { %v107_v17 = vmul.f32 %v368_v15, %v102_v8  ;;  %vm112_vm5 = vweird.f32 %v368_v15  ;;  %vm141_vm10 = vweird.f32 %v104_v13 }
  0xa4   :  { %373 = vrcp.f32 %v103_v16  ;;  %vm113_vm6 = vmor %vm111_vm4, %vm112_vm5  ;;  %v130_v42 = vand.u32 2147483647, %v103_v16  ;;  %v132_v43 = vand.u32 2147483648, %v103_v16  ;;  %vm126_vm11 = vweird.f32 %v103_v16 }
  0xa5   :  { %v108_v18 = vsub.f32 1.0, %v107_v17  ;;  %vm146_vm13 = vcmp.eq.f32.partialorder %v145_v37, 8.507059e+37  ;;  %v148_v50 = vor.u32 1.1754944e-38, %v147_v38 }
  0xa6   :  { %v133_v56 = vor.u32 1.1754944e-38, %v132_v43  ;;  %vm131_vm15 = vcmp.eq.f32.partialorder %v130_v42, 8.507059e+37 }
  0xa7   :  { %v370_v20 = vpop.eup %369  ;;  %v109_v21 = vmul.f32 %v368_v15, %v108_v18  ;;  %v289_v18 = vmul.f32 %v455_v34, %v439_v5  ;;  %v291_v5 = vmul.f32 %v455_v34, %v442_v10 }
  0xa8   :  { %v372_v23 = vpop.eup %371  ;;  %v445_v24 = vadd.f32 1.0, %v370_v20 }
  0xa9   :  { %v137_v25 = vmul.f32 %v372_v23, %v104_v13  ;;  %v110_v26 = vadd.f32 %v368_v15, %v109_v21  ;;  %vm142_vm8 = vweird.f32 %v372_v23  ;;  %v263_v60 = vpop.f32.mrf.mxu3 }
  0xaa   :  { %v374_v27 = vpop.eup %373  ;;  %375 = vrcp.f32 %v445_v24  ;;  %vm143_vm12 = vmor %vm141_vm10, %vm142_vm8  ;;  %v160_v1 = vand.u32 2147483647, %v445_v24  ;;  %v162_v3 = vand.u32 2147483648, %v445_v24  ;;  %vm156_vm1 = vweird.f32 %v445_v24 }
  0xab   :  { %v138_v31 = vsub.f32 1.0, %v137_v25  ;;  %v122_v32 = vmul.f32 %v374_v27, %v103_v16  ;;  %v114_v33 = vsel %vm113_vm6, %v368_v15, %v110_v26  ;;  %vm127_vm9 = vweird.f32 %v374_v27 }
  0xac   :  { %v119_v36 = vsel %vm116_vm7, %v118_v30, %v114_v33  ;;  %vm128_vm14 = vmor %vm126_vm11, %vm127_vm9  ;;  %v290_v15 = vmul.f32 %v455_v34, %v436_v2  ;;  %v163_v17 = vor.u32 1.1754944e-38, %v162_v3  ;;  %vm161_vm3 = vcmp.eq.f32.partialorder %v160_v1, 8.507059e+37 }
  0xad   :  { %v123_v39 = vsub.f32 1.0, %v122_v32  ;;  %v274_v40 = vmul.f32 %v119_v36, %v119_v36  ;;  %v139_v41 = vmul.f32 %v372_v23, %v138_v31  ;;  %v270_v45 = vmul.f32 %v448_v28, %v119_v36 }
  0xaf   :  { %v124_v44 = vmul.f32 %v374_v27, %v123_v39  ;;  %v279_v46 = vmul.f32 %v451_v29, %v274_v40  ;;  %v140_v47 = vadd.f32 %v372_v23, %v139_v41 }
  0xb0   :  { %v376_v48 = vpop.eup %375 }
  0xb1   :  { %v152_v51 = vmul.f32 %v376_v48, %v445_v24  ;;  %v125_v52 = vadd.f32 %v374_v27, %v124_v44  ;;  %v283_v53 = vadd.f32 %v279_v46, %v270_v45  ;;  %v144_v54 = vsel %vm143_vm12, %v372_v23, %v140_v47  ;;  %v266_v33 = vpop.f32.mrf.mxu3 }
  0xb2   :  { %v149_v58 = vsel %vm146_vm13, %v148_v50, %v144_v54  ;;  %vm157_vm0 = vweird.f32 %v376_v48 }
  0xb3   :  { %v153_v59 = vsub.f32 1.0, %v152_v51  ;;  %v129_v61 = vsel %vm128_vm14, %v374_v27, %v125_v52  ;;  %v292_v62 = vadd.f32 %v288_v49, %v283_v53  ;;  %v276_v0 = vmul.f32 %v149_v58, %v149_v58  ;;  %vm158_vm2 = vmor %vm156_vm1, %vm157_vm0 }
  0xb4   :  { %v134_v63 = vsel %vm131_vm15, %v133_v56, %v129_v61  ;;  %v272_v8 = vmul.f32 %v448_v28, %v149_v58 }
  0xb5   :  { %v275_v4 = vmul.f32 %v134_v63, %v134_v63  ;;  %v296_v6 = vadd.f32 %v292_v62, %v257_v57  ;;  %v154_v7 = vmul.f32 %v376_v48, %v153_v59  ;;  %v281_v9 = vmul.f32 %v451_v29, %v276_v0 }
  0xb6   :  { %v271_v11 = vmul.f32 %v448_v28, %v134_v63 }
  0xb7   :  { %v280_v12 = vmul.f32 %v451_v29, %v275_v4  ;;  %v301_v13 = vadd.f32 %v300_v55, %v296_v6  ;;  %v155_v14 = vadd.f32 %v376_v48, %v154_v7  ;;  %v285_v16 = vadd.f32 %v281_v9, %v272_v8 }
  0xb9   :  { %v284_v19 = vadd.f32 %v280_v12, %v271_v11  ;;  %305 = vst [vmem:[%s497_s3] sm:$0xff] %v301_v13  ;;  %v159_v20 = vsel %vm158_vm2, %v376_v48, %v155_v14  ;;  %v294_v21 = vadd.f32 %v290_v15, %v285_v16 }
  0xba   :  { %v164_v22 = vsel %vm161_vm3, %v163_v17, %v159_v20 }
  0xbb   :  { %v293_v23 = vadd.f32 %v289_v18, %v284_v19  ;;  %v277_v24 = vmul.f32 %v164_v22, %v164_v22  ;;  %v298_v25 = vadd.f32 %v294_v21, %v263_v60  ;;  %v273_v26 = vmul.f32 %v448_v28, %v164_v22 }
  0xbd   :  { %v297_v2 = vadd.f32 %v293_v23, %v457_v35  ;;  %v282_v27 = vmul.f32 %v451_v29, %v277_v24  ;;  %v303_v30 = vadd.f32 %v300_v55, %v298_v25 }
  0xbf   :  { %v302_v31 = vadd.f32 %v300_v55, %v297_v2  ;;  %v286_v32 = vadd.f32 %v282_v27, %v273_v26  ;;  %307 = vst [vmem:[%s497_s3 + $0x10] sm:$0xff] %v303_v30 }
  0xc1   :  { %306 = vst [vmem:[%s497_s3 + $0x8] sm:$0xff] %v302_v31  ;;  %v295_v35 = vadd.f32 %v291_v5, %v286_v32 }
  0xc3   :  { %v299_v36 = vadd.f32 %v295_v35, %v266_v33 }
  0xc5   :  { %v304_v28 = vadd.f32 %v300_v55, %v299_v36 }
  0xc7   :  { %308 = vst [vmem:[%s497_s3 + $0x18] sm:$0xff] %v304_v28 }

</bundles_post_ra>
